<compile_context>
chip_gen: v6e
topology: v6e:2x2x1
jax: 0.10.0
libtpu: 0.0.40
codegen_flags: <defaults>
</compile_context>

<pallas_src>
import functools

import jax
import jax.numpy as jnp
from jax.experimental import pallas as pl
from jax.experimental.pallas import tpu as pltpu


# ----------------------------------------------------------------------------
# Fused forward kernel (single invocation, everything VMEM resident).
# ----------------------------------------------------------------------------
def _fused_ae_kernel(x_ref,
                     e0_wx_ref, e0_wh_ref, e0_b_ref,
                     e1_wx_ref, e1_wh_ref, e1_b_ref,
                     fce_w_ref, fce_b_ref,
                     fcd_w_ref, fcd_b_ref,
                     d0_wh_ref, d0_b_ref,
                     d1_wx_ref, d1_wh_ref, d1_b_ref,
                     fco_w_ref, fco_b_ref,
                     out_ref):
    S, B, Din = x_ref.shape
    H = d0_wh_ref.shape[0]
    H4 = 4 * H
    f32 = jnp.float32

    def gate_update(g, h_prev):
        # g: (B, 4H) pre-activations in [r | z | gi_n | gh_n] layout.
        sig = jax.nn.sigmoid(g[:, 0:2 * H])          # one EUP region for r,z
        r = sig[:, 0:H]
        z = sig[:, H:2 * H]
        n = jnp.tanh(g[:, 2 * H:3 * H] + r * g[:, 3 * H:4 * H])
        return n + z * (h_prev - n)                  # == (1-z)*n + z*h_prev

    # Weights loaded once; resident for the whole kernel.
    w_e0h = e0_wh_ref[...]
    w_e1x = e1_wx_ref[...]
    w_e1h = e1_wh_ref[...]
    w_d0h = d0_wh_ref[...]
    w_d1x = d1_wx_ref[...]
    w_d1h = d1_wh_ref[...]
    w_o = fco_w_ref[...]

    # Hoisted bias broadcasts (JAX does not CSE per-step broadcast_in_dim).
    b_e1 = jnp.broadcast_to(e1_b_ref[...], (B, H4))
    b_d0 = jnp.broadcast_to(d0_b_ref[...], (B, H4))
    b_d1 = jnp.broadcast_to(d1_b_ref[...], (B, H4))
    b_o = jnp.broadcast_to(fco_b_ref[...], (B, Din))

    # ---- Encoder layer-0 input projection hoisted out of the serial loop ---
    x_flat = x_ref[...].reshape(S * B, Din)
    x_proj = (jnp.dot(x_flat, e0_wx_ref[...], preferred_element_type=f32)
              + e0_b_ref[...])                       # (S*B, 4H), bias folded in

    # ---- Encoder: both stacked GRU layers advance in lockstep over time ----
    # TODO(synk): nn.GRU inter-layer dropout (p=0.2) is training-only; identity here.
    # TODO(synk): S is small & static -> fully unrolled Python loop; for long
    # sequences switch to a partial unroll / time grid axis to bound live ranges.
    h0 = jnp.zeros((B, H), f32)
    h1 = jnp.zeros((B, H), f32)
    for t in range(S):
        g0 = x_proj[t * B:(t + 1) * B, :] + jnp.dot(
            h0, w_e0h, preferred_element_type=f32)
        h0 = gate_update(g0, h0)
        g1 = (jnp.dot(h0, w_e1x, preferred_element_type=f32)
              + jnp.dot(h1, w_e1h, preferred_element_type=f32) + b_e1)
        h1 = gate_update(g1, h1)

    # ---- Bottleneck: latent = fc_enc(h_enc); dec_h = fc_dec(latent) --------
    latent = jnp.dot(h1, fce_w_ref[...],
                     preferred_element_type=f32) + fce_b_ref[...]
    dec_h = jnp.dot(latent, fcd_w_ref[...],
                    preferred_element_type=f32) + fcd_b_ref[...]

    # ---- Decoder: zero-input layer 0 + layer 1 (both seeded from dec_h) ----
    d0 = dec_h
    d1 = dec_h
    y_cols = []
    for t in range(S):
        # Layer 0 input is all-zero -> x matmul skipped; b_in already in b_d0.
        g0 = jnp.dot(d0, w_d0h, preferred_element_type=f32) + b_d0
        d0 = gate_update(g0, d0)
        g1 = (jnp.dot(d0, w_d1x, preferred_element_type=f32)
              + jnp.dot(d1, w_d1h, preferred_element_type=f32) + b_d1)
        d1 = gate_update(g1, d1)
        # fc_out is off the recurrence critical path; sigmoid deferred.
        y_cols.append(jnp.dot(d1, w_o, preferred_element_type=f32) + b_o)

    # ---- Lane-dense output: one fused sigmoid, one unmasked store ----------
    out_ref[...] = jax.nn.sigmoid(
        jnp.concatenate(y_cols, axis=1)).astype(out_ref.dtype)


# ----------------------------------------------------------------------------
# Parameter init (PyTorch layout) and one-time packing.
# ----------------------------------------------------------------------------
def init_params(key, input_dim, hidden_dim, latent_dim, num_layers=2):
    H = hidden_dim
    keys = iter(jax.random.split(key, 64))

    def u(shape, scale):
        return jax.random.uniform(next(keys), shape, jnp.float32, -scale, scale)

    k_gru = 1.0 / float(H) ** 0.5
    params = {}

    enc = []
    for l in range(num_layers):
        din = input_dim if l == 0 else H
        enc.append(dict(w_ih=u((3 * H, din), k_gru), w_hh=u((3 * H, H), k_gru),
                        b_ih=u((3 * H,), k_gru), b_hh=u((3 * H,), k_gru)))
    params["enc_gru"] = enc

    k_h = 1.0 / float(H) ** 0.5
    k_l = 1.0 / float(latent_dim) ** 0.5
    params["fc_enc"] = dict(w=u((latent_dim, H), k_h), b=u((latent_dim,), k_h))
    params["fc_dec"] = dict(w=u((H, latent_dim), k_l), b=u((H,), k_l))

    dec = []
    for l in range(num_layers):
        dec.append(dict(w_ih=u((3 * H, H), k_gru), w_hh=u((3 * H, H), k_gru),
                        b_ih=u((3 * H,), k_gru), b_hh=u((3 * H,), k_gru)))
    params["dec_gru"] = dec

    params["fc_out"] = dict(w=u((input_dim, H), k_h), b=u((input_dim,), k_h))
    return params


def pack_params(params):
    """One-time packing into the kernel layout (split W_x / W_h, fused biases)."""
    H = params["enc_gru"][0]["w_hh"].shape[1]
    # TODO(synk): kernel hard-codes num_layers=2 (module default); generalize
    # by stacking per-layer packed weights if other depths are needed.
    assert len(params["enc_gru"]) == 2 and len(params["dec_gru"]) == 2

    def pack_gru(p):
        wih_t = jnp.asarray(p["w_ih"], jnp.float32).T          # (din, 3H)
        whh_t = jnp.asarray(p["w_hh"], jnp.float32).T          # (H, 3H)
        din = wih_t.shape[0]
        w_x = jnp.concatenate(
            [wih_t[:, 0:H], wih_t[:, H:2 * H], wih_t[:, 2 * H:3 * H],
             jnp.zeros((din, H), jnp.float32)], axis=1)        # (din, 4H)
        w_h = jnp.concatenate(
            [whh_t[:, 0:H], whh_t[:, H:2 * H],
             jnp.zeros((H, H), jnp.float32), whh_t[:, 2 * H:3 * H]], axis=1)
        b_ih = jnp.asarray(p["b_ih"], jnp.float32)
        b_hh = jnp.asarray(p["b_hh"], jnp.float32)
        b = jnp.concatenate(
            [b_ih[0:H] + b_hh[0:H], b_ih[H:2 * H] + b_hh[H:2 * H],
             b_ih[2 * H:3 * H], b_hh[2 * H:3 * H]]).reshape(1, 4 * H)
        return w_x, w_h, b

    def pack_linear(p):
        return (jnp.asarray(p["w"], jnp.float32).T,            # (K, N)
                jnp.asarray(p["b"], jnp.float32).reshape(1, -1))

    packed = {}
    packed["enc0_wx"], packed["enc0_wh"], packed["enc0_b"] = pack_gru(
        params["enc_gru"][0])
    packed["enc1_wx"], packed["enc1_wh"], packed["enc1_b"] = pack_gru(
        params["enc_gru"][1])
    packed["fce_w"], packed["fce_b"] = pack_linear(params["fc_enc"])
    packed["fcd_w"], packed["fcd_b"] = pack_linear(params["fc_dec"])
    _, packed["dec0_wh"], packed["dec0_b"] = pack_gru(params["dec_gru"][0])
    packed["dec1_wx"], packed["dec1_wh"], packed["dec1_b"] = pack_gru(
        params["dec_gru"][1])
    packed["fco_w"], packed["fco_b"] = pack_linear(params["fc_out"])
    # TODO(synk): for v6e/v7x at scale, cast packed weights (MXU operands only)
    # to bf16 with f32 accumulate; keep elementwise gate math f32 for v5e.
    return packed


# ----------------------------------------------------------------------------
# Forward pass (mirrors GRU_Autoencoder.forward, eval mode).
# ----------------------------------------------------------------------------
def gru_autoencoder_forward(packed, x):
    # x: (B, S, input_dim), batch-first like the PyTorch module.
    B, S, Din = x.shape
    # Pad batch to a multiple of 8 sublanes (padded rows are dead work, sliced off).
    B_pad = max(8, ((B + 7) // 8) * 8)
    x_f = x.astype(jnp.float32)
    if B_pad != B:
        x_f = jnp.pad(x_f, ((0, B_pad - B), (0, 0), (0, 0)))
    x_t = jnp.transpose(x_f, (1, 0, 2))                         # (S, B_pad, Din)

    # TODO(synk): on v7x, add a 'parallel' grid axis over (padded) batch so both
    # TensorCores run, and tile x along S for long sequences (VMEM is 64 MiB).
    out_flat = pl.pallas_call(
        _fused_ae_kernel,
        out_shape=jax.ShapeDtypeStruct((B_pad, S * Din), jnp.float32),
        in_specs=[pl.BlockSpec(memory_space=pltpu.MemorySpace.VMEM)] * 18,
        out_specs=pl.BlockSpec(memory_space=pltpu.MemorySpace.VMEM),
        compiler_params=pltpu.CompilerParams(
            vmem_limit_bytes=64 * 1024 * 1024),
    )(x_t,
      packed["enc0_wx"], packed["enc0_wh"], packed["enc0_b"],
      packed["enc1_wx"], packed["enc1_wh"], packed["enc1_b"],
      packed["fce_w"], packed["fce_b"],
      packed["fcd_w"], packed["fcd_b"],
      packed["dec0_wh"], packed["dec0_b"],
      packed["dec1_wx"], packed["dec1_wh"], packed["dec1_b"],
      packed["fco_w"], packed["fco_b"])

    return out_flat.reshape(B_pad, S, Din)[:B]                  # (B, S, Din)


# ----------------------------------------------------------------------------
# Pure-JAX reference (PyTorch semantics) for correctness checking.
# ----------------------------------------------------------------------------
def _reference_forward(params, x):
    H = params["enc_gru"][0]["w_hh"].shape[1]
    B, S, _ = x.shape

    def gru_layer(xs, h0, p):
        w_ih, w_hh = p["w_ih"], p["w_hh"]
        b_ih, b_hh = p["b_ih"], p["b_hh"]

        def step(h, x_t):
            gi = x_t @ w_ih.T + b_ih
            gh = h @ w_hh.T + b_hh
            r = jax.nn.sigmoid(gi[:, 0:H] + gh[:, 0:H])
            z = jax.nn.sigmoid(gi[:, H:2 * H] + gh[:, H:2 * H])
            n = jnp.tanh(gi[:, 2 * H:] + r * gh[:, 2 * H:])
            h_new = (1.0 - z) * n + z * h
            return h_new, h_new

        h_fin, ys = jax.lax.scan(step, h0, xs)
        return ys, h_fin

    xs = jnp.transpose(x.astype(jnp.float32), (1, 0, 2))        # (S, B, Din)
    h0 = jnp.zeros((B, H), jnp.float32)
    ys0, _ = gru_layer(xs, h0, params["enc_gru"][0])
    _, h_enc = gru_layer(ys0, h0, params["enc_gru"][1])
    latent = h_enc @ params["fc_enc"]["w"].T + params["fc_enc"]["b"]
    dec_h = latent @ params["fc_dec"]["w"].T + params["fc_dec"]["b"]
    zeros_in = jnp.zeros((S, B, H), jnp.float32)
    ys_d0, _ = gru_layer(zeros_in, dec_h, params["dec_gru"][0])
    ys_d1, _ = gru_layer(ys_d0, dec_h, params["dec_gru"][1])
    dec_out = ys_d1 @ params["fc_out"]["w"].T + params["fc_out"]["b"]
    return jax.nn.sigmoid(jnp.transpose(dec_out, (1, 0, 2)))    # (B, S, Din)


if __name__ == "__main__":
    B, S = 2, 8
    input_dim, hidden_dim, latent_dim = 16, 32, 8

    key = jax.random.PRNGKey(0)
    pkey, xkey = jax.random.split(key)
    params = init_params(pkey, input_dim, hidden_dim, latent_dim, num_layers=2)
    packed = pack_params(params)                                # packed ONCE
    x = jax.random.normal(xkey, (B, S, input_dim), jnp.float32)

    fwd = jax.jit(functools.partial(gru_autoencoder_forward, packed))
    out = fwd(x)
    jax.block_until_ready(out)

    ref = _reference_forward(params, x)

    assert out.shape == (B, S, input_dim)
    assert bool(jnp.all(jnp.isfinite(out)))
    assert bool(jnp.all((out >= 0.0) & (out <= 1.0)))           # sigmoid range
    max_err = float(jnp.max(jnp.abs(out - ref)))
    assert max_err < 2e-4, f"mismatch vs reference: max_err={max_err}"
    print("KERNEL_OK")
</pallas_src>

<mosaic_0001>
module attributes {stable_mosaic.version = 11 : i64} {
  func.func @_fused_ae_kernel(%arg0: memref<8x8x16xf32, #tpu.memory_space<vmem>>, %arg1: memref<16x128xf32, #tpu.memory_space<vmem>>, %arg2: memref<32x128xf32, #tpu.memory_space<vmem>>, %arg3: memref<1x128xf32, #tpu.memory_space<vmem>>, %arg4: memref<32x128xf32, #tpu.memory_space<vmem>>, %arg5: memref<32x128xf32, #tpu.memory_space<vmem>>, %arg6: memref<1x128xf32, #tpu.memory_space<vmem>>, %arg7: memref<32x8xf32, #tpu.memory_space<vmem>>, %arg8: memref<1x8xf32, #tpu.memory_space<vmem>>, %arg9: memref<8x32xf32, #tpu.memory_space<vmem>>, %arg10: memref<1x32xf32, #tpu.memory_space<vmem>>, %arg11: memref<32x128xf32, #tpu.memory_space<vmem>>, %arg12: memref<1x128xf32, #tpu.memory_space<vmem>>, %arg13: memref<32x128xf32, #tpu.memory_space<vmem>>, %arg14: memref<32x128xf32, #tpu.memory_space<vmem>>, %arg15: memref<1x128xf32, #tpu.memory_space<vmem>>, %arg16: memref<32x16xf32, #tpu.memory_space<vmem>>, %arg17: memref<1x16xf32, #tpu.memory_space<vmem>>, %arg18: memref<8x128xf32, #tpu.memory_space<vmem>>) attributes {dimension_semantics = [], scalar_prefetch = 0 : i64, scratch_operands = 0 : i64, tpu.core_type = #tpu.core_type<tc>} {
    %c0 = arith.constant 0 : index
    %c0_0 = arith.constant 0 : index
    %0 = vector.load %arg2[%c0, %c0_0] : memref<32x128xf32, #tpu.memory_space<vmem>>, vector<32x128xf32>
    %c0_1 = arith.constant 0 : index
    %c0_2 = arith.constant 0 : index
    %1 = vector.load %arg4[%c0_1, %c0_2] : memref<32x128xf32, #tpu.memory_space<vmem>>, vector<32x128xf32>
    %c0_3 = arith.constant 0 : index
    %c0_4 = arith.constant 0 : index
    %2 = vector.load %arg5[%c0_3, %c0_4] : memref<32x128xf32, #tpu.memory_space<vmem>>, vector<32x128xf32>
    %c0_5 = arith.constant 0 : index
    %c0_6 = arith.constant 0 : index
    %3 = vector.load %arg11[%c0_5, %c0_6] : memref<32x128xf32, #tpu.memory_space<vmem>>, vector<32x128xf32>
    %c0_7 = arith.constant 0 : index
    %c0_8 = arith.constant 0 : index
    %4 = vector.load %arg13[%c0_7, %c0_8] : memref<32x128xf32, #tpu.memory_space<vmem>>, vector<32x128xf32>
    %c0_9 = arith.constant 0 : index
    %c0_10 = arith.constant 0 : index
    %5 = vector.load %arg14[%c0_9, %c0_10] : memref<32x128xf32, #tpu.memory_space<vmem>>, vector<32x128xf32>
    %c0_11 = arith.constant 0 : index
    %c0_12 = arith.constant 0 : index
    %6 = vector.load %arg16[%c0_11, %c0_12] : memref<32x16xf32, #tpu.memory_space<vmem>>, vector<32x16xf32>
    %c0_13 = arith.constant 0 : index
    %c0_14 = arith.constant 0 : index
    %7 = vector.load %arg6[%c0_13, %c0_14] : memref<1x128xf32, #tpu.memory_space<vmem>>, vector<1x128xf32>
    %8 = vector.shape_cast %7 : vector<1x128xf32> to vector<1x128xf32>
    %9 = vector.broadcast %8 : vector<1x128xf32> to vector<8x128xf32>
    %c0_15 = arith.constant 0 : index
    %c0_16 = arith.constant 0 : index
    %10 = vector.load %arg12[%c0_15, %c0_16] : memref<1x128xf32, #tpu.memory_space<vmem>>, vector<1x128xf32>
    %11 = vector.shape_cast %10 : vector<1x128xf32> to vector<1x128xf32>
    %12 = vector.broadcast %11 : vector<1x128xf32> to vector<8x128xf32>
    %c0_17 = arith.constant 0 : index
    %c0_18 = arith.constant 0 : index
    %13 = vector.load %arg15[%c0_17, %c0_18] : memref<1x128xf32, #tpu.memory_space<vmem>>, vector<1x128xf32>
    %14 = vector.shape_cast %13 : vector<1x128xf32> to vector<1x128xf32>
    %15 = vector.broadcast %14 : vector<1x128xf32> to vector<8x128xf32>
    %c0_19 = arith.constant 0 : index
    %c0_20 = arith.constant 0 : index
    %16 = vector.load %arg17[%c0_19, %c0_20] : memref<1x16xf32, #tpu.memory_space<vmem>>, vector<1x16xf32>
    %17 = vector.shape_cast %16 : vector<1x16xf32> to vector<1x16xf32>
    %18 = vector.broadcast %17 : vector<1x16xf32> to vector<8x16xf32>
    %c0_21 = arith.constant 0 : index
    %c0_22 = arith.constant 0 : index
    %c0_23 = arith.constant 0 : index
    %19 = vector.load %arg0[%c0_21, %c0_22, %c0_23] : memref<8x8x16xf32, #tpu.memory_space<vmem>>, vector<8x8x16xf32>
    %20 = vector.shape_cast %19 : vector<8x8x16xf32> to vector<64x16xf32>
    %c0_24 = arith.constant 0 : index
    %c0_25 = arith.constant 0 : index
    %21 = vector.load %arg1[%c0_24, %c0_25] : memref<16x128xf32, #tpu.memory_space<vmem>>, vector<16x128xf32>
    %cst = arith.constant dense<0.000000e+00> : vector<64x128xf32>
    %22 = tpu.matmul %20, %21, %cst {dimension_numbers = #tpu.dot_dimension_numbers<[1], [0], [0], [1], [0, 0, 1, 1], [], []>} : vector<64x16xf32>, vector<16x128xf32>, vector<64x128xf32> -> vector<64x128xf32>
    %c0_26 = arith.constant 0 : index
    %c0_27 = arith.constant 0 : index
    %23 = vector.load %arg3[%c0_26, %c0_27] : memref<1x128xf32, #tpu.memory_space<vmem>>, vector<1x128xf32>
    %24 = vector.broadcast %23 : vector<1x128xf32> to vector<64x128xf32>
    %25 = arith.addf %22, %24 : vector<64x128xf32>
    %cst_28 = arith.constant 0.000000e+00 : f32
    %26 = vector.broadcast %cst_28 : f32 to vector<8x32xf32>
    %cst_29 = arith.constant 0.000000e+00 : f32
    %27 = vector.broadcast %cst_29 : f32 to vector<8x32xf32>
    %28 = vector.extract_strided_slice %25 {offsets = [0, 0], sizes = [8, 128], strides = [1, 1]} : vector<64x128xf32> to vector<8x128xf32>
    %cst_30 = arith.constant dense<0.000000e+00> : vector<8x128xf32>
    %29 = tpu.matmul %26, %0, %cst_30 {dimension_numbers = #tpu.dot_dimension_numbers<[1], [0], [0], [1], [0, 0, 1, 1], [], []>} : vector<8x32xf32>, vector<32x128xf32>, vector<8x128xf32> -> vector<8x128xf32>
    %30 = arith.addf %28, %29 : vector<8x128xf32>
    %31 = vector.extract_strided_slice %30 {offsets = [0, 0], sizes = [8, 64], strides = [1, 1]} : vector<8x128xf32> to vector<8x64xf32>
    %32 = arith.negf %31 : vector<8x64xf32>
    %33 = math.exp %32 : vector<8x64xf32>
    %cst_31 = arith.constant 1.000000e+00 : f32
    %34 = vector.broadcast %cst_31 : f32 to vector<8x64xf32>
    %35 = arith.addf %34, %33 : vector<8x64xf32>
    %36 = arith.divf %34, %35 : vector<8x64xf32>
    %37 = vector.extract_strided_slice %36 {offsets = [0, 0], sizes = [8, 32], strides = [1, 1]} : vector<8x64xf32> to vector<8x32xf32>
    %38 = vector.extract_strided_slice %36 {offsets = [0, 32], sizes = [8, 32], strides = [1, 1]} : vector<8x64xf32> to vector<8x32xf32>
    %39 = vector.extract_strided_slice %30 {offsets = [0, 64], sizes = [8, 32], strides = [1, 1]} : vector<8x128xf32> to vector<8x32xf32>
    %40 = vector.extract_strided_slice %30 {offsets = [0, 96], sizes = [8, 32], strides = [1, 1]} : vector<8x128xf32> to vector<8x32xf32>
    %41 = arith.mulf %37, %40 : vector<8x32xf32>
    %42 = arith.addf %39, %41 : vector<8x32xf32>
    %43 = math.tanh %42 : vector<8x32xf32>
    %44 = arith.subf %26, %43 : vector<8x32xf32>
    %45 = arith.mulf %38, %44 : vector<8x32xf32>
    %46 = arith.addf %43, %45 : vector<8x32xf32>
    %cst_32 = arith.constant dense<0.000000e+00> : vector<8x128xf32>
    %47 = tpu.matmul %46, %1, %cst_32 {dimension_numbers = #tpu.dot_dimension_numbers<[1], [0], [0], [1], [0, 0, 1, 1], [], []>} : vector<8x32xf32>, vector<32x128xf32>, vector<8x128xf32> -> vector<8x128xf32>
    %cst_33 = arith.constant dense<0.000000e+00> : vector<8x128xf32>
    %48 = tpu.matmul %27, %2, %cst_33 {dimension_numbers = #tpu.dot_dimension_numbers<[1], [0], [0], [1], [0, 0, 1, 1], [], []>} : vector<8x32xf32>, vector<32x128xf32>, vector<8x128xf32> -> vector<8x128xf32>
    %49 = arith.addf %47, %48 : vector<8x128xf32>
    %50 = arith.addf %49, %9 : vector<8x128xf32>
    %51 = vector.extract_strided_slice %50 {offsets = [0, 0], sizes = [8, 64], strides = [1, 1]} : vector<8x128xf32> to vector<8x64xf32>
    %52 = arith.negf %51 : vector<8x64xf32>
    %53 = math.exp %52 : vector<8x64xf32>
    %cst_34 = arith.constant 1.000000e+00 : f32
    %54 = vector.broadcast %cst_34 : f32 to vector<8x64xf32>
    %55 = arith.addf %54, %53 : vector<8x64xf32>
    %56 = arith.divf %54, %55 : vector<8x64xf32>
    %57 = vector.extract_strided_slice %56 {offsets = [0, 0], sizes = [8, 32], strides = [1, 1]} : vector<8x64xf32> to vector<8x32xf32>
    %58 = vector.extract_strided_slice %56 {offsets = [0, 32], sizes = [8, 32], strides = [1, 1]} : vector<8x64xf32> to vector<8x32xf32>
    %59 = vector.extract_strided_slice %50 {offsets = [0, 64], sizes = [8, 32], strides = [1, 1]} : vector<8x128xf32> to vector<8x32xf32>
    %60 = vector.extract_strided_slice %50 {offsets = [0, 96], sizes = [8, 32], strides = [1, 1]} : vector<8x128xf32> to vector<8x32xf32>
    %61 = arith.mulf %57, %60 : vector<8x32xf32>
    %62 = arith.addf %59, %61 : vector<8x32xf32>
    %63 = math.tanh %62 : vector<8x32xf32>
    %64 = arith.subf %27, %63 : vector<8x32xf32>
    %65 = arith.mulf %58, %64 : vector<8x32xf32>
    %66 = arith.addf %63, %65 : vector<8x32xf32>
    %67 = vector.extract_strided_slice %25 {offsets = [8, 0], sizes = [8, 128], strides = [1, 1]} : vector<64x128xf32> to vector<8x128xf32>
    %cst_35 = arith.constant dense<0.000000e+00> : vector<8x128xf32>
    %68 = tpu.matmul %46, %0, %cst_35 {dimension_numbers = #tpu.dot_dimension_numbers<[1], [0], [0], [1], [0, 0, 1, 1], [], []>} : vector<8x32xf32>, vector<32x128xf32>, vector<8x128xf32> -> vector<8x128xf32>
    %69 = arith.addf %67, %68 : vector<8x128xf32>
    %70 = vector.extract_strided_slice %69 {offsets = [0, 0], sizes = [8, 64], strides = [1, 1]} : vector<8x128xf32> to vector<8x64xf32>
    %71 = arith.negf %70 : vector<8x64xf32>
    %72 = math.exp %71 : vector<8x64xf32>
    %cst_36 = arith.constant 1.000000e+00 : f32
    %73 = vector.broadcast %cst_36 : f32 to vector<8x64xf32>
    %74 = arith.addf %73, %72 : vector<8x64xf32>
    %75 = arith.divf %73, %74 : vector<8x64xf32>
    %76 = vector.extract_strided_slice %75 {offsets = [0, 0], sizes = [8, 32], strides = [1, 1]} : vector<8x64xf32> to vector<8x32xf32>
    %77 = vector.extract_strided_slice %75 {offsets = [0, 32], sizes = [8, 32], strides = [1, 1]} : vector<8x64xf32> to vector<8x32xf32>
    %78 = vector.extract_strided_slice %69 {offsets = [0, 64], sizes = [8, 32], strides = [1, 1]} : vector<8x128xf32> to vector<8x32xf32>
    %79 = vector.extract_strided_slice %69 {offsets = [0, 96], sizes = [8, 32], strides = [1, 1]} : vector<8x128xf32> to vector<8x32xf32>
    %80 = arith.mulf %76, %79 : vector<8x32xf32>
    %81 = arith.addf %78, %80 : vector<8x32xf32>
    %82 = math.tanh %81 : vector<8x32xf32>
    %83 = arith.subf %46, %82 : vector<8x32xf32>
    %84 = arith.mulf %77, %83 : vector<8x32xf32>
    %85 = arith.addf %82, %84 : vector<8x32xf32>
    %cst_37 = arith.constant dense<0.000000e+00> : vector<8x128xf32>
    %86 = tpu.matmul %85, %1, %cst_37 {dimension_numbers = #tpu.dot_dimension_numbers<[1], [0], [0], [1], [0, 0, 1, 1], [], []>} : vector<8x32xf32>, vector<32x128xf32>, vector<8x128xf32> -> vector<8x128xf32>
    %cst_38 = arith.constant dense<0.000000e+00> : vector<8x128xf32>
    %87 = tpu.matmul %66, %2, %cst_38 {dimension_numbers = #tpu.dot_dimension_numbers<[1], [0], [0], [1], [0, 0, 1, 1], [], []>} : vector<8x32xf32>, vector<32x128xf32>, vector<8x128xf32> -> vector<8x128xf32>
    %88 = arith.addf %86, %87 : vector<8x128xf32>
    %89 = arith.addf %88, %9 : vector<8x128xf32>
    %90 = vector.extract_strided_slice %89 {offsets = [0, 0], sizes = [8, 64], strides = [1, 1]} : vector<8x128xf32> to vector<8x64xf32>
    %91 = arith.negf %90 : vector<8x64xf32>
    %92 = math.exp %91 : vector<8x64xf32>
    %cst_39 = arith.constant 1.000000e+00 : f32
    %93 = vector.broadcast %cst_39 : f32 to vector<8x64xf32>
    %94 = arith.addf %93, %92 : vector<8x64xf32>
    %95 = arith.divf %93, %94 : vector<8x64xf32>
    %96 = vector.extract_strided_slice %95 {offsets = [0, 0], sizes = [8, 32], strides = [1, 1]} : vector<8x64xf32> to vector<8x32xf32>
    %97 = vector.extract_strided_slice %95 {offsets = [0, 32], sizes = [8, 32], strides = [1, 1]} : vector<8x64xf32> to vector<8x32xf32>
    %98 = vector.extract_strided_slice %89 {offsets = [0, 64], sizes = [8, 32], strides = [1, 1]} : vector<8x128xf32> to vector<8x32xf32>
    %99 = vector.extract_strided_slice %89 {offsets = [0, 96], sizes = [8, 32], strides = [1, 1]} : vector<8x128xf32> to vector<8x32xf32>
    %100 = arith.mulf %96, %99 : vector<8x32xf32>
    %101 = arith.addf %98, %100 : vector<8x32xf32>
    %102 = math.tanh %101 : vector<8x32xf32>
    %103 = arith.subf %66, %102 : vector<8x32xf32>
    %104 = arith.mulf %97, %103 : vector<8x32xf32>
    %105 = arith.addf %102, %104 : vector<8x32xf32>
    %106 = vector.extract_strided_slice %25 {offsets = [16, 0], sizes = [8, 128], strides = [1, 1]} : vector<64x128xf32> to vector<8x128xf32>
    %cst_40 = arith.constant dense<0.000000e+00> : vector<8x128xf32>
    %107 = tpu.matmul %85, %0, %cst_40 {dimension_numbers = #tpu.dot_dimension_numbers<[1], [0], [0], [1], [0, 0, 1, 1], [], []>} : vector<8x32xf32>, vector<32x128xf32>, vector<8x128xf32> -> vector<8x128xf32>
    %108 = arith.addf %106, %107 : vector<8x128xf32>
    %109 = vector.extract_strided_slice %108 {offsets = [0, 0], sizes = [8, 64], strides = [1, 1]} : vector<8x128xf32> to vector<8x64xf32>
    %110 = arith.negf %109 : vector<8x64xf32>
    %111 = math.exp %110 : vector<8x64xf32>
    %cst_41 = arith.constant 1.000000e+00 : f32
    %112 = vector.broadcast %cst_41 : f32 to vector<8x64xf32>
    %113 = arith.addf %112, %111 : vector<8x64xf32>
    %114 = arith.divf %112, %113 : vector<8x64xf32>
    %115 = vector.extract_strided_slice %114 {offsets = [0, 0], sizes = [8, 32], strides = [1, 1]} : vector<8x64xf32> to vector<8x32xf32>
    %116 = vector.extract_strided_slice %114 {offsets = [0, 32], sizes = [8, 32], strides = [1, 1]} : vector<8x64xf32> to vector<8x32xf32>
    %117 = vector.extract_strided_slice %108 {offsets = [0, 64], sizes = [8, 32], strides = [1, 1]} : vector<8x128xf32> to vector<8x32xf32>
    %118 = vector.extract_strided_slice %108 {offsets = [0, 96], sizes = [8, 32], strides = [1, 1]} : vector<8x128xf32> to vector<8x32xf32>
    %119 = arith.mulf %115, %118 : vector<8x32xf32>
    %120 = arith.addf %117, %119 : vector<8x32xf32>
    %121 = math.tanh %120 : vector<8x32xf32>
    %122 = arith.subf %85, %121 : vector<8x32xf32>
    %123 = arith.mulf %116, %122 : vector<8x32xf32>
    %124 = arith.addf %121, %123 : vector<8x32xf32>
    %cst_42 = arith.constant dense<0.000000e+00> : vector<8x128xf32>
    %125 = tpu.matmul %124, %1, %cst_42 {dimension_numbers = #tpu.dot_dimension_numbers<[1], [0], [0], [1], [0, 0, 1, 1], [], []>} : vector<8x32xf32>, vector<32x128xf32>, vector<8x128xf32> -> vector<8x128xf32>
    %cst_43 = arith.constant dense<0.000000e+00> : vector<8x128xf32>
    %126 = tpu.matmul %105, %2, %cst_43 {dimension_numbers = #tpu.dot_dimension_numbers<[1], [0], [0], [1], [0, 0, 1, 1], [], []>} : vector<8x32xf32>, vector<32x128xf32>, vector<8x128xf32> -> vector<8x128xf32>
    %127 = arith.addf %125, %126 : vector<8x128xf32>
    %128 = arith.addf %127, %9 : vector<8x128xf32>
    %129 = vector.extract_strided_slice %128 {offsets = [0, 0], sizes = [8, 64], strides = [1, 1]} : vector<8x128xf32> to vector<8x64xf32>
    %130 = arith.negf %129 : vector<8x64xf32>
    %131 = math.exp %130 : vector<8x64xf32>
    %cst_44 = arith.constant 1.000000e+00 : f32
    %132 = vector.broadcast %cst_44 : f32 to vector<8x64xf32>
    %133 = arith.addf %132, %131 : vector<8x64xf32>
    %134 = arith.divf %132, %133 : vector<8x64xf32>
    %135 = vector.extract_strided_slice %134 {offsets = [0, 0], sizes = [8, 32], strides = [1, 1]} : vector<8x64xf32> to vector<8x32xf32>
    %136 = vector.extract_strided_slice %134 {offsets = [0, 32], sizes = [8, 32], strides = [1, 1]} : vector<8x64xf32> to vector<8x32xf32>
    %137 = vector.extract_strided_slice %128 {offsets = [0, 64], sizes = [8, 32], strides = [1, 1]} : vector<8x128xf32> to vector<8x32xf32>
    %138 = vector.extract_strided_slice %128 {offsets = [0, 96], sizes = [8, 32], strides = [1, 1]} : vector<8x128xf32> to vector<8x32xf32>
    %139 = arith.mulf %135, %138 : vector<8x32xf32>
    %140 = arith.addf %137, %139 : vector<8x32xf32>
    %141 = math.tanh %140 : vector<8x32xf32>
    %142 = arith.subf %105, %141 : vector<8x32xf32>
    %143 = arith.mulf %136, %142 : vector<8x32xf32>
    %144 = arith.addf %141, %143 : vector<8x32xf32>
    %145 = vector.extract_strided_slice %25 {offsets = [24, 0], sizes = [8, 128], strides = [1, 1]} : vector<64x128xf32> to vector<8x128xf32>
    %cst_45 = arith.constant dense<0.000000e+00> : vector<8x128xf32>
    %146 = tpu.matmul %124, %0, %cst_45 {dimension_numbers = #tpu.dot_dimension_numbers<[1], [0], [0], [1], [0, 0, 1, 1], [], []>} : vector<8x32xf32>, vector<32x128xf32>, vector<8x128xf32> -> vector<8x128xf32>
    %147 = arith.addf %145, %146 : vector<8x128xf32>
    %148 = vector.extract_strided_slice %147 {offsets = [0, 0], sizes = [8, 64], strides = [1, 1]} : vector<8x128xf32> to vector<8x64xf32>
    %149 = arith.negf %148 : vector<8x64xf32>
    %150 = math.exp %149 : vector<8x64xf32>
    %cst_46 = arith.constant 1.000000e+00 : f32
    %151 = vector.broadcast %cst_46 : f32 to vector<8x64xf32>
    %152 = arith.addf %151, %150 : vector<8x64xf32>
    %153 = arith.divf %151, %152 : vector<8x64xf32>
    %154 = vector.extract_strided_slice %153 {offsets = [0, 0], sizes = [8, 32], strides = [1, 1]} : vector<8x64xf32> to vector<8x32xf32>
    %155 = vector.extract_strided_slice %153 {offsets = [0, 32], sizes = [8, 32], strides = [1, 1]} : vector<8x64xf32> to vector<8x32xf32>
    %156 = vector.extract_strided_slice %147 {offsets = [0, 64], sizes = [8, 32], strides = [1, 1]} : vector<8x128xf32> to vector<8x32xf32>
    %157 = vector.extract_strided_slice %147 {offsets = [0, 96], sizes = [8, 32], strides = [1, 1]} : vector<8x128xf32> to vector<8x32xf32>
    %158 = arith.mulf %154, %157 : vector<8x32xf32>
    %159 = arith.addf %156, %158 : vector<8x32xf32>
    %160 = math.tanh %159 : vector<8x32xf32>
    %161 = arith.subf %124, %160 : vector<8x32xf32>
    %162 = arith.mulf %155, %161 : vector<8x32xf32>
    %163 = arith.addf %160, %162 : vector<8x32xf32>
    %cst_47 = arith.constant dense<0.000000e+00> : vector<8x128xf32>
    %164 = tpu.matmul %163, %1, %cst_47 {dimension_numbers = #tpu.dot_dimension_numbers<[1], [0], [0], [1], [0, 0, 1, 1], [], []>} : vector<8x32xf32>, vector<32x128xf32>, vector<8x128xf32> -> vector<8x128xf32>
    %cst_48 = arith.constant dense<0.000000e+00> : vector<8x128xf32>
    %165 = tpu.matmul %144, %2, %cst_48 {dimension_numbers = #tpu.dot_dimension_numbers<[1], [0], [0], [1], [0, 0, 1, 1], [], []>} : vector<8x32xf32>, vector<32x128xf32>, vector<8x128xf32> -> vector<8x128xf32>
    %166 = arith.addf %164, %165 : vector<8x128xf32>
    %167 = arith.addf %166, %9 : vector<8x128xf32>
    %168 = vector.extract_strided_slice %167 {offsets = [0, 0], sizes = [8, 64], strides = [1, 1]} : vector<8x128xf32> to vector<8x64xf32>
    %169 = arith.negf %168 : vector<8x64xf32>
    %170 = math.exp %169 : vector<8x64xf32>
    %cst_49 = arith.constant 1.000000e+00 : f32
    %171 = vector.broadcast %cst_49 : f32 to vector<8x64xf32>
    %172 = arith.addf %171, %170 : vector<8x64xf32>
    %173 = arith.divf %171, %172 : vector<8x64xf32>
    %174 = vector.extract_strided_slice %173 {offsets = [0, 0], sizes = [8, 32], strides = [1, 1]} : vector<8x64xf32> to vector<8x32xf32>
    %175 = vector.extract_strided_slice %173 {offsets = [0, 32], sizes = [8, 32], strides = [1, 1]} : vector<8x64xf32> to vector<8x32xf32>
    %176 = vector.extract_strided_slice %167 {offsets = [0, 64], sizes = [8, 32], strides = [1, 1]} : vector<8x128xf32> to vector<8x32xf32>
    %177 = vector.extract_strided_slice %167 {offsets = [0, 96], sizes = [8, 32], strides = [1, 1]} : vector<8x128xf32> to vector<8x32xf32>
    %178 = arith.mulf %174, %177 : vector<8x32xf32>
    %179 = arith.addf %176, %178 : vector<8x32xf32>
    %180 = math.tanh %179 : vector<8x32xf32>
    %181 = arith.subf %144, %180 : vector<8x32xf32>
    %182 = arith.mulf %175, %181 : vector<8x32xf32>
    %183 = arith.addf %180, %182 : vector<8x32xf32>
    %184 = vector.extract_strided_slice %25 {offsets = [32, 0], sizes = [8, 128], strides = [1, 1]} : vector<64x128xf32> to vector<8x128xf32>
    %cst_50 = arith.constant dense<0.000000e+00> : vector<8x128xf32>
    %185 = tpu.matmul %163, %0, %cst_50 {dimension_numbers = #tpu.dot_dimension_numbers<[1], [0], [0], [1], [0, 0, 1, 1], [], []>} : vector<8x32xf32>, vector<32x128xf32>, vector<8x128xf32> -> vector<8x128xf32>
    %186 = arith.addf %184, %185 : vector<8x128xf32>
    %187 = vector.extract_strided_slice %186 {offsets = [0, 0], sizes = [8, 64], strides = [1, 1]} : vector<8x128xf32> to vector<8x64xf32>
    %188 = arith.negf %187 : vector<8x64xf32>
    %189 = math.exp %188 : vector<8x64xf32>
    %cst_51 = arith.constant 1.000000e+00 : f32
    %190 = vector.broadcast %cst_51 : f32 to vector<8x64xf32>
    %191 = arith.addf %190, %189 : vector<8x64xf32>
    %192 = arith.divf %190, %191 : vector<8x64xf32>
    %193 = vector.extract_strided_slice %192 {offsets = [0, 0], sizes = [8, 32], strides = [1, 1]} : vector<8x64xf32> to vector<8x32xf32>
    %194 = vector.extract_strided_slice %192 {offsets = [0, 32], sizes = [8, 32], strides = [1, 1]} : vector<8x64xf32> to vector<8x32xf32>
    %195 = vector.extract_strided_slice %186 {offsets = [0, 64], sizes = [8, 32], strides = [1, 1]} : vector<8x128xf32> to vector<8x32xf32>
    %196 = vector.extract_strided_slice %186 {offsets = [0, 96], sizes = [8, 32], strides = [1, 1]} : vector<8x128xf32> to vector<8x32xf32>
    %197 = arith.mulf %193, %196 : vector<8x32xf32>
    %198 = arith.addf %195, %197 : vector<8x32xf32>
    %199 = math.tanh %198 : vector<8x32xf32>
    %200 = arith.subf %163, %199 : vector<8x32xf32>
    %201 = arith.mulf %194, %200 : vector<8x32xf32>
    %202 = arith.addf %199, %201 : vector<8x32xf32>
    %cst_52 = arith.constant dense<0.000000e+00> : vector<8x128xf32>
    %203 = tpu.matmul %202, %1, %cst_52 {dimension_numbers = #tpu.dot_dimension_numbers<[1], [0], [0], [1], [0, 0, 1, 1], [], []>} : vector<8x32xf32>, vector<32x128xf32>, vector<8x128xf32> -> vector<8x128xf32>
    %cst_53 = arith.constant dense<0.000000e+00> : vector<8x128xf32>
    %204 = tpu.matmul %183, %2, %cst_53 {dimension_numbers = #tpu.dot_dimension_numbers<[1], [0], [0], [1], [0, 0, 1, 1], [], []>} : vector<8x32xf32>, vector<32x128xf32>, vector<8x128xf32> -> vector<8x128xf32>
    %205 = arith.addf %203, %204 : vector<8x128xf32>
    %206 = arith.addf %205, %9 : vector<8x128xf32>
    %207 = vector.extract_strided_slice %206 {offsets = [0, 0], sizes = [8, 64], strides = [1, 1]} : vector<8x128xf32> to vector<8x64xf32>
    %208 = arith.negf %207 : vector<8x64xf32>
    %209 = math.exp %208 : vector<8x64xf32>
    %cst_54 = arith.constant 1.000000e+00 : f32
    %210 = vector.broadcast %cst_54 : f32 to vector<8x64xf32>
    %211 = arith.addf %210, %209 : vector<8x64xf32>
    %212 = arith.divf %210, %211 : vector<8x64xf32>
    %213 = vector.extract_strided_slice %212 {offsets = [0, 0], sizes = [8, 32], strides = [1, 1]} : vector<8x64xf32> to vector<8x32xf32>
    %214 = vector.extract_strided_slice %212 {offsets = [0, 32], sizes = [8, 32], strides = [1, 1]} : vector<8x64xf32> to vector<8x32xf32>
    %215 = vector.extract_strided_slice %206 {offsets = [0, 64], sizes = [8, 32], strides = [1, 1]} : vector<8x128xf32> to vector<8x32xf32>
    %216 = vector.extract_strided_slice %206 {offsets = [0, 96], sizes = [8, 32], strides = [1, 1]} : vector<8x128xf32> to vector<8x32xf32>
    %217 = arith.mulf %213, %216 : vector<8x32xf32>
    %218 = arith.addf %215, %217 : vector<8x32xf32>
    %219 = math.tanh %218 : vector<8x32xf32>
    %220 = arith.subf %183, %219 : vector<8x32xf32>
    %221 = arith.mulf %214, %220 : vector<8x32xf32>
    %222 = arith.addf %219, %221 : vector<8x32xf32>
    %223 = vector.extract_strided_slice %25 {offsets = [40, 0], sizes = [8, 128], strides = [1, 1]} : vector<64x128xf32> to vector<8x128xf32>
    %cst_55 = arith.constant dense<0.000000e+00> : vector<8x128xf32>
    %224 = tpu.matmul %202, %0, %cst_55 {dimension_numbers = #tpu.dot_dimension_numbers<[1], [0], [0], [1], [0, 0, 1, 1], [], []>} : vector<8x32xf32>, vector<32x128xf32>, vector<8x128xf32> -> vector<8x128xf32>
    %225 = arith.addf %223, %224 : vector<8x128xf32>
    %226 = vector.extract_strided_slice %225 {offsets = [0, 0], sizes = [8, 64], strides = [1, 1]} : vector<8x128xf32> to vector<8x64xf32>
    %227 = arith.negf %226 : vector<8x64xf32>
    %228 = math.exp %227 : vector<8x64xf32>
    %cst_56 = arith.constant 1.000000e+00 : f32
    %229 = vector.broadcast %cst_56 : f32 to vector<8x64xf32>
    %230 = arith.addf %229, %228 : vector<8x64xf32>
    %231 = arith.divf %229, %230 : vector<8x64xf32>
    %232 = vector.extract_strided_slice %231 {offsets = [0, 0], sizes = [8, 32], strides = [1, 1]} : vector<8x64xf32> to vector<8x32xf32>
    %233 = vector.extract_strided_slice %231 {offsets = [0, 32], sizes = [8, 32], strides = [1, 1]} : vector<8x64xf32> to vector<8x32xf32>
    %234 = vector.extract_strided_slice %225 {offsets = [0, 64], sizes = [8, 32], strides = [1, 1]} : vector<8x128xf32> to vector<8x32xf32>
    %235 = vector.extract_strided_slice %225 {offsets = [0, 96], sizes = [8, 32], strides = [1, 1]} : vector<8x128xf32> to vector<8x32xf32>
    %236 = arith.mulf %232, %235 : vector<8x32xf32>
    %237 = arith.addf %234, %236 : vector<8x32xf32>
    %238 = math.tanh %237 : vector<8x32xf32>
    %239 = arith.subf %202, %238 : vector<8x32xf32>
    %240 = arith.mulf %233, %239 : vector<8x32xf32>
    %241 = arith.addf %238, %240 : vector<8x32xf32>
    %cst_57 = arith.constant dense<0.000000e+00> : vector<8x128xf32>
    %242 = tpu.matmul %241, %1, %cst_57 {dimension_numbers = #tpu.dot_dimension_numbers<[1], [0], [0], [1], [0, 0, 1, 1], [], []>} : vector<8x32xf32>, vector<32x128xf32>, vector<8x128xf32> -> vector<8x128xf32>
    %cst_58 = arith.constant dense<0.000000e+00> : vector<8x128xf32>
    %243 = tpu.matmul %222, %2, %cst_58 {dimension_numbers = #tpu.dot_dimension_numbers<[1], [0], [0], [1], [0, 0, 1, 1], [], []>} : vector<8x32xf32>, vector<32x128xf32>, vector<8x128xf32> -> vector<8x128xf32>
    %244 = arith.addf %242, %243 : vector<8x128xf32>
    %245 = arith.addf %244, %9 : vector<8x128xf32>
    %246 = vector.extract_strided_slice %245 {offsets = [0, 0], sizes = [8, 64], strides = [1, 1]} : vector<8x128xf32> to vector<8x64xf32>
    %247 = arith.negf %246 : vector<8x64xf32>
    %248 = math.exp %247 : vector<8x64xf32>
    %cst_59 = arith.constant 1.000000e+00 : f32
    %249 = vector.broadcast %cst_59 : f32 to vector<8x64xf32>
    %250 = arith.addf %249, %248 : vector<8x64xf32>
    %251 = arith.divf %249, %250 : vector<8x64xf32>
    %252 = vector.extract_strided_slice %251 {offsets = [0, 0], sizes = [8, 32], strides = [1, 1]} : vector<8x64xf32> to vector<8x32xf32>
    %253 = vector.extract_strided_slice %251 {offsets = [0, 32], sizes = [8, 32], strides = [1, 1]} : vector<8x64xf32> to vector<8x32xf32>
    %254 = vector.extract_strided_slice %245 {offsets = [0, 64], sizes = [8, 32], strides = [1, 1]} : vector<8x128xf32> to vector<8x32xf32>
    %255 = vector.extract_strided_slice %245 {offsets = [0, 96], sizes = [8, 32], strides = [1, 1]} : vector<8x128xf32> to vector<8x32xf32>
    %256 = arith.mulf %252, %255 : vector<8x32xf32>
    %257 = arith.addf %254, %256 : vector<8x32xf32>
    %258 = math.tanh %257 : vector<8x32xf32>
    %259 = arith.subf %222, %258 : vector<8x32xf32>
    %260 = arith.mulf %253, %259 : vector<8x32xf32>
    %261 = arith.addf %258, %260 : vector<8x32xf32>
    %262 = vector.extract_strided_slice %25 {offsets = [48, 0], sizes = [8, 128], strides = [1, 1]} : vector<64x128xf32> to vector<8x128xf32>
    %cst_60 = arith.constant dense<0.000000e+00> : vector<8x128xf32>
    %263 = tpu.matmul %241, %0, %cst_60 {dimension_numbers = #tpu.dot_dimension_numbers<[1], [0], [0], [1], [0, 0, 1, 1], [], []>} : vector<8x32xf32>, vector<32x128xf32>, vector<8x128xf32> -> vector<8x128xf32>
    %264 = arith.addf %262, %263 : vector<8x128xf32>
    %265 = vector.extract_strided_slice %264 {offsets = [0, 0], sizes = [8, 64], strides = [1, 1]} : vector<8x128xf32> to vector<8x64xf32>
    %266 = arith.negf %265 : vector<8x64xf32>
    %267 = math.exp %266 : vector<8x64xf32>
    %cst_61 = arith.constant 1.000000e+00 : f32
    %268 = vector.broadcast %cst_61 : f32 to vector<8x64xf32>
    %269 = arith.addf %268, %267 : vector<8x64xf32>
    %270 = arith.divf %268, %269 : vector<8x64xf32>
    %271 = vector.extract_strided_slice %270 {offsets = [0, 0], sizes = [8, 32], strides = [1, 1]} : vector<8x64xf32> to vector<8x32xf32>
    %272 = vector.extract_strided_slice %270 {offsets = [0, 32], sizes = [8, 32], strides = [1, 1]} : vector<8x64xf32> to vector<8x32xf32>
    %273 = vector.extract_strided_slice %264 {offsets = [0, 64], sizes = [8, 32], strides = [1, 1]} : vector<8x128xf32> to vector<8x32xf32>
    %274 = vector.extract_strided_slice %264 {offsets = [0, 96], sizes = [8, 32], strides = [1, 1]} : vector<8x128xf32> to vector<8x32xf32>
    %275 = arith.mulf %271, %274 : vector<8x32xf32>
    %276 = arith.addf %273, %275 : vector<8x32xf32>
    %277 = math.tanh %276 : vector<8x32xf32>
    %278 = arith.subf %241, %277 : vector<8x32xf32>
    %279 = arith.mulf %272, %278 : vector<8x32xf32>
    %280 = arith.addf %277, %279 : vector<8x32xf32>
    %cst_62 = arith.constant dense<0.000000e+00> : vector<8x128xf32>
    %281 = tpu.matmul %280, %1, %cst_62 {dimension_numbers = #tpu.dot_dimension_numbers<[1], [0], [0], [1], [0, 0, 1, 1], [], []>} : vector<8x32xf32>, vector<32x128xf32>, vector<8x128xf32> -> vector<8x128xf32>
    %cst_63 = arith.constant dense<0.000000e+00> : vector<8x128xf32>
    %282 = tpu.matmul %261, %2, %cst_63 {dimension_numbers = #tpu.dot_dimension_numbers<[1], [0], [0], [1], [0, 0, 1, 1], [], []>} : vector<8x32xf32>, vector<32x128xf32>, vector<8x128xf32> -> vector<8x128xf32>
    %283 = arith.addf %281, %282 : vector<8x128xf32>
    %284 = arith.addf %283, %9 : vector<8x128xf32>
    %285 = vector.extract_strided_slice %284 {offsets = [0, 0], sizes = [8, 64], strides = [1, 1]} : vector<8x128xf32> to vector<8x64xf32>
    %286 = arith.negf %285 : vector<8x64xf32>
    %287 = math.exp %286 : vector<8x64xf32>
    %cst_64 = arith.constant 1.000000e+00 : f32
    %288 = vector.broadcast %cst_64 : f32 to vector<8x64xf32>
    %289 = arith.addf %288, %287 : vector<8x64xf32>
    %290 = arith.divf %288, %289 : vector<8x64xf32>
    %291 = vector.extract_strided_slice %290 {offsets = [0, 0], sizes = [8, 32], strides = [1, 1]} : vector<8x64xf32> to vector<8x32xf32>
    %292 = vector.extract_strided_slice %290 {offsets = [0, 32], sizes = [8, 32], strides = [1, 1]} : vector<8x64xf32> to vector<8x32xf32>
    %293 = vector.extract_strided_slice %284 {offsets = [0, 64], sizes = [8, 32], strides = [1, 1]} : vector<8x128xf32> to vector<8x32xf32>
    %294 = vector.extract_strided_slice %284 {offsets = [0, 96], sizes = [8, 32], strides = [1, 1]} : vector<8x128xf32> to vector<8x32xf32>
    %295 = arith.mulf %291, %294 : vector<8x32xf32>
    %296 = arith.addf %293, %295 : vector<8x32xf32>
    %297 = math.tanh %296 : vector<8x32xf32>
    %298 = arith.subf %261, %297 : vector<8x32xf32>
    %299 = arith.mulf %292, %298 : vector<8x32xf32>
    %300 = arith.addf %297, %299 : vector<8x32xf32>
    %301 = vector.extract_strided_slice %25 {offsets = [56, 0], sizes = [8, 128], strides = [1, 1]} : vector<64x128xf32> to vector<8x128xf32>
    %cst_65 = arith.constant dense<0.000000e+00> : vector<8x128xf32>
    %302 = tpu.matmul %280, %0, %cst_65 {dimension_numbers = #tpu.dot_dimension_numbers<[1], [0], [0], [1], [0, 0, 1, 1], [], []>} : vector<8x32xf32>, vector<32x128xf32>, vector<8x128xf32> -> vector<8x128xf32>
    %303 = arith.addf %301, %302 : vector<8x128xf32>
    %304 = vector.extract_strided_slice %303 {offsets = [0, 0], sizes = [8, 64], strides = [1, 1]} : vector<8x128xf32> to vector<8x64xf32>
    %305 = arith.negf %304 : vector<8x64xf32>
    %306 = math.exp %305 : vector<8x64xf32>
    %cst_66 = arith.constant 1.000000e+00 : f32
    %307 = vector.broadcast %cst_66 : f32 to vector<8x64xf32>
    %308 = arith.addf %307, %306 : vector<8x64xf32>
    %309 = arith.divf %307, %308 : vector<8x64xf32>
    %310 = vector.extract_strided_slice %309 {offsets = [0, 0], sizes = [8, 32], strides = [1, 1]} : vector<8x64xf32> to vector<8x32xf32>
    %311 = vector.extract_strided_slice %309 {offsets = [0, 32], sizes = [8, 32], strides = [1, 1]} : vector<8x64xf32> to vector<8x32xf32>
    %312 = vector.extract_strided_slice %303 {offsets = [0, 64], sizes = [8, 32], strides = [1, 1]} : vector<8x128xf32> to vector<8x32xf32>
    %313 = vector.extract_strided_slice %303 {offsets = [0, 96], sizes = [8, 32], strides = [1, 1]} : vector<8x128xf32> to vector<8x32xf32>
    %314 = arith.mulf %310, %313 : vector<8x32xf32>
    %315 = arith.addf %312, %314 : vector<8x32xf32>
    %316 = math.tanh %315 : vector<8x32xf32>
    %317 = arith.subf %280, %316 : vector<8x32xf32>
    %318 = arith.mulf %311, %317 : vector<8x32xf32>
    %319 = arith.addf %316, %318 : vector<8x32xf32>
    %cst_67 = arith.constant dense<0.000000e+00> : vector<8x128xf32>
    %320 = tpu.matmul %319, %1, %cst_67 {dimension_numbers = #tpu.dot_dimension_numbers<[1], [0], [0], [1], [0, 0, 1, 1], [], []>} : vector<8x32xf32>, vector<32x128xf32>, vector<8x128xf32> -> vector<8x128xf32>
    %cst_68 = arith.constant dense<0.000000e+00> : vector<8x128xf32>
    %321 = tpu.matmul %300, %2, %cst_68 {dimension_numbers = #tpu.dot_dimension_numbers<[1], [0], [0], [1], [0, 0, 1, 1], [], []>} : vector<8x32xf32>, vector<32x128xf32>, vector<8x128xf32> -> vector<8x128xf32>
    %322 = arith.addf %320, %321 : vector<8x128xf32>
    %323 = arith.addf %322, %9 : vector<8x128xf32>
    %324 = vector.extract_strided_slice %323 {offsets = [0, 0], sizes = [8, 64], strides = [1, 1]} : vector<8x128xf32> to vector<8x64xf32>
    %325 = arith.negf %324 : vector<8x64xf32>
    %326 = math.exp %325 : vector<8x64xf32>
    %cst_69 = arith.constant 1.000000e+00 : f32
    %327 = vector.broadcast %cst_69 : f32 to vector<8x64xf32>
    %328 = arith.addf %327, %326 : vector<8x64xf32>
    %329 = arith.divf %327, %328 : vector<8x64xf32>
    %330 = vector.extract_strided_slice %329 {offsets = [0, 0], sizes = [8, 32], strides = [1, 1]} : vector<8x64xf32> to vector<8x32xf32>
    %331 = vector.extract_strided_slice %329 {offsets = [0, 32], sizes = [8, 32], strides = [1, 1]} : vector<8x64xf32> to vector<8x32xf32>
    %332 = vector.extract_strided_slice %323 {offsets = [0, 64], sizes = [8, 32], strides = [1, 1]} : vector<8x128xf32> to vector<8x32xf32>
    %333 = vector.extract_strided_slice %323 {offsets = [0, 96], sizes = [8, 32], strides = [1, 1]} : vector<8x128xf32> to vector<8x32xf32>
    %334 = arith.mulf %330, %333 : vector<8x32xf32>
    %335 = arith.addf %332, %334 : vector<8x32xf32>
    %336 = math.tanh %335 : vector<8x32xf32>
    %337 = arith.subf %300, %336 : vector<8x32xf32>
    %338 = arith.mulf %331, %337 : vector<8x32xf32>
    %339 = arith.addf %336, %338 : vector<8x32xf32>
    %c0_70 = arith.constant 0 : index
    %c0_71 = arith.constant 0 : index
    %340 = vector.load %arg7[%c0_70, %c0_71] : memref<32x8xf32, #tpu.memory_space<vmem>>, vector<32x8xf32>
    %cst_72 = arith.constant dense<0.000000e+00> : vector<8x8xf32>
    %341 = tpu.matmul %339, %340, %cst_72 {dimension_numbers = #tpu.dot_dimension_numbers<[1], [0], [0], [1], [0, 0, 1, 1], [], []>} : vector<8x32xf32>, vector<32x8xf32>, vector<8x8xf32> -> vector<8x8xf32>
    %c0_73 = arith.constant 0 : index
    %c0_74 = arith.constant 0 : index
    %342 = vector.load %arg8[%c0_73, %c0_74] : memref<1x8xf32, #tpu.memory_space<vmem>>, vector<1x8xf32>
    %343 = vector.broadcast %342 : vector<1x8xf32> to vector<8x8xf32>
    %344 = arith.addf %341, %343 : vector<8x8xf32>
    %c0_75 = arith.constant 0 : index
    %c0_76 = arith.constant 0 : index
    %345 = vector.load %arg9[%c0_75, %c0_76] : memref<8x32xf32, #tpu.memory_space<vmem>>, vector<8x32xf32>
    %cst_77 = arith.constant dense<0.000000e+00> : vector<8x32xf32>
    %346 = tpu.matmul %344, %345, %cst_77 {dimension_numbers = #tpu.dot_dimension_numbers<[1], [0], [0], [1], [0, 0, 1, 1], [], []>} : vector<8x8xf32>, vector<8x32xf32>, vector<8x32xf32> -> vector<8x32xf32>
    %c0_78 = arith.constant 0 : index
    %c0_79 = arith.constant 0 : index
    %347 = vector.load %arg10[%c0_78, %c0_79] : memref<1x32xf32, #tpu.memory_space<vmem>>, vector<1x32xf32>
    %348 = vector.broadcast %347 : vector<1x32xf32> to vector<8x32xf32>
    %349 = arith.addf %346, %348 : vector<8x32xf32>
    %cst_80 = arith.constant dense<0.000000e+00> : vector<8x128xf32>
    %350 = tpu.matmul %349, %3, %cst_80 {dimension_numbers = #tpu.dot_dimension_numbers<[1], [0], [0], [1], [0, 0, 1, 1], [], []>} : vector<8x32xf32>, vector<32x128xf32>, vector<8x128xf32> -> vector<8x128xf32>
    %351 = arith.addf %350, %12 : vector<8x128xf32>
    %352 = vector.extract_strided_slice %351 {offsets = [0, 0], sizes = [8, 64], strides = [1, 1]} : vector<8x128xf32> to vector<8x64xf32>
    %353 = arith.negf %352 : vector<8x64xf32>
    %354 = math.exp %353 : vector<8x64xf32>
    %cst_81 = arith.constant 1.000000e+00 : f32
    %355 = vector.broadcast %cst_81 : f32 to vector<8x64xf32>
    %356 = arith.addf %355, %354 : vector<8x64xf32>
    %357 = arith.divf %355, %356 : vector<8x64xf32>
    %358 = vector.extract_strided_slice %357 {offsets = [0, 0], sizes = [8, 32], strides = [1, 1]} : vector<8x64xf32> to vector<8x32xf32>
    %359 = vector.extract_strided_slice %357 {offsets = [0, 32], sizes = [8, 32], strides = [1, 1]} : vector<8x64xf32> to vector<8x32xf32>
    %360 = vector.extract_strided_slice %351 {offsets = [0, 64], sizes = [8, 32], strides = [1, 1]} : vector<8x128xf32> to vector<8x32xf32>
    %361 = vector.extract_strided_slice %351 {offsets = [0, 96], sizes = [8, 32], strides = [1, 1]} : vector<8x128xf32> to vector<8x32xf32>
    %362 = arith.mulf %358, %361 : vector<8x32xf32>
    %363 = arith.addf %360, %362 : vector<8x32xf32>
    %364 = math.tanh %363 : vector<8x32xf32>
    %365 = arith.subf %349, %364 : vector<8x32xf32>
    %366 = arith.mulf %359, %365 : vector<8x32xf32>
    %367 = arith.addf %364, %366 : vector<8x32xf32>
    %cst_82 = arith.constant dense<0.000000e+00> : vector<8x128xf32>
    %368 = tpu.matmul %367, %4, %cst_82 {dimension_numbers = #tpu.dot_dimension_numbers<[1], [0], [0], [1], [0, 0, 1, 1], [], []>} : vector<8x32xf32>, vector<32x128xf32>, vector<8x128xf32> -> vector<8x128xf32>
    %cst_83 = arith.constant dense<0.000000e+00> : vector<8x128xf32>
    %369 = tpu.matmul %349, %5, %cst_83 {dimension_numbers = #tpu.dot_dimension_numbers<[1], [0], [0], [1], [0, 0, 1, 1], [], []>} : vector<8x32xf32>, vector<32x128xf32>, vector<8x128xf32> -> vector<8x128xf32>
    %370 = arith.addf %368, %369 : vector<8x128xf32>
    %371 = arith.addf %370, %15 : vector<8x128xf32>
    %372 = vector.extract_strided_slice %371 {offsets = [0, 0], sizes = [8, 64], strides = [1, 1]} : vector<8x128xf32> to vector<8x64xf32>
    %373 = arith.negf %372 : vector<8x64xf32>
    %374 = math.exp %373 : vector<8x64xf32>
    %cst_84 = arith.constant 1.000000e+00 : f32
    %375 = vector.broadcast %cst_84 : f32 to vector<8x64xf32>
    %376 = arith.addf %375, %374 : vector<8x64xf32>
    %377 = arith.divf %375, %376 : vector<8x64xf32>
    %378 = vector.extract_strided_slice %377 {offsets = [0, 0], sizes = [8, 32], strides = [1, 1]} : vector<8x64xf32> to vector<8x32xf32>
    %379 = vector.extract_strided_slice %377 {offsets = [0, 32], sizes = [8, 32], strides = [1, 1]} : vector<8x64xf32> to vector<8x32xf32>
    %380 = vector.extract_strided_slice %371 {offsets = [0, 64], sizes = [8, 32], strides = [1, 1]} : vector<8x128xf32> to vector<8x32xf32>
    %381 = vector.extract_strided_slice %371 {offsets = [0, 96], sizes = [8, 32], strides = [1, 1]} : vector<8x128xf32> to vector<8x32xf32>
    %382 = arith.mulf %378, %381 : vector<8x32xf32>
    %383 = arith.addf %380, %382 : vector<8x32xf32>
    %384 = math.tanh %383 : vector<8x32xf32>
    %385 = arith.subf %349, %384 : vector<8x32xf32>
    %386 = arith.mulf %379, %385 : vector<8x32xf32>
    %387 = arith.addf %384, %386 : vector<8x32xf32>
    %cst_85 = arith.constant dense<0.000000e+00> : vector<8x16xf32>
    %388 = tpu.matmul %387, %6, %cst_85 {dimension_numbers = #tpu.dot_dimension_numbers<[1], [0], [0], [1], [0, 0, 1, 1], [], []>} : vector<8x32xf32>, vector<32x16xf32>, vector<8x16xf32> -> vector<8x16xf32>
    %389 = arith.addf %388, %18 : vector<8x16xf32>
    %cst_86 = arith.constant dense<0.000000e+00> : vector<8x128xf32>
    %390 = tpu.matmul %367, %3, %cst_86 {dimension_numbers = #tpu.dot_dimension_numbers<[1], [0], [0], [1], [0, 0, 1, 1], [], []>} : vector<8x32xf32>, vector<32x128xf32>, vector<8x128xf32> -> vector<8x128xf32>
    %391 = arith.addf %390, %12 : vector<8x128xf32>
    %392 = vector.extract_strided_slice %391 {offsets = [0, 0], sizes = [8, 64], strides = [1, 1]} : vector<8x128xf32> to vector<8x64xf32>
    %393 = arith.negf %392 : vector<8x64xf32>
    %394 = math.exp %393 : vector<8x64xf32>
    %cst_87 = arith.constant 1.000000e+00 : f32
    %395 = vector.broadcast %cst_87 : f32 to vector<8x64xf32>
    %396 = arith.addf %395, %394 : vector<8x64xf32>
    %397 = arith.divf %395, %396 : vector<8x64xf32>
    %398 = vector.extract_strided_slice %397 {offsets = [0, 0], sizes = [8, 32], strides = [1, 1]} : vector<8x64xf32> to vector<8x32xf32>
    %399 = vector.extract_strided_slice %397 {offsets = [0, 32], sizes = [8, 32], strides = [1, 1]} : vector<8x64xf32> to vector<8x32xf32>
    %400 = vector.extract_strided_slice %391 {offsets = [0, 64], sizes = [8, 32], strides = [1, 1]} : vector<8x128xf32> to vector<8x32xf32>
    %401 = vector.extract_strided_slice %391 {offsets = [0, 96], sizes = [8, 32], strides = [1, 1]} : vector<8x128xf32> to vector<8x32xf32>
    %402 = arith.mulf %398, %401 : vector<8x32xf32>
    %403 = arith.addf %400, %402 : vector<8x32xf32>
    %404 = math.tanh %403 : vector<8x32xf32>
    %405 = arith.subf %367, %404 : vector<8x32xf32>
    %406 = arith.mulf %399, %405 : vector<8x32xf32>
    %407 = arith.addf %404, %406 : vector<8x32xf32>
    %cst_88 = arith.constant dense<0.000000e+00> : vector<8x128xf32>
    %408 = tpu.matmul %407, %4, %cst_88 {dimension_numbers = #tpu.dot_dimension_numbers<[1], [0], [0], [1], [0, 0, 1, 1], [], []>} : vector<8x32xf32>, vector<32x128xf32>, vector<8x128xf32> -> vector<8x128xf32>
    %cst_89 = arith.constant dense<0.000000e+00> : vector<8x128xf32>
    %409 = tpu.matmul %387, %5, %cst_89 {dimension_numbers = #tpu.dot_dimension_numbers<[1], [0], [0], [1], [0, 0, 1, 1], [], []>} : vector<8x32xf32>, vector<32x128xf32>, vector<8x128xf32> -> vector<8x128xf32>
    %410 = arith.addf %408, %409 : vector<8x128xf32>
    %411 = arith.addf %410, %15 : vector<8x128xf32>
    %412 = vector.extract_strided_slice %411 {offsets = [0, 0], sizes = [8, 64], strides = [1, 1]} : vector<8x128xf32> to vector<8x64xf32>
    %413 = arith.negf %412 : vector<8x64xf32>
    %414 = math.exp %413 : vector<8x64xf32>
    %cst_90 = arith.constant 1.000000e+00 : f32
    %415 = vector.broadcast %cst_90 : f32 to vector<8x64xf32>
    %416 = arith.addf %415, %414 : vector<8x64xf32>
    %417 = arith.divf %415, %416 : vector<8x64xf32>
    %418 = vector.extract_strided_slice %417 {offsets = [0, 0], sizes = [8, 32], strides = [1, 1]} : vector<8x64xf32> to vector<8x32xf32>
    %419 = vector.extract_strided_slice %417 {offsets = [0, 32], sizes = [8, 32], strides = [1, 1]} : vector<8x64xf32> to vector<8x32xf32>
    %420 = vector.extract_strided_slice %411 {offsets = [0, 64], sizes = [8, 32], strides = [1, 1]} : vector<8x128xf32> to vector<8x32xf32>
    %421 = vector.extract_strided_slice %411 {offsets = [0, 96], sizes = [8, 32], strides = [1, 1]} : vector<8x128xf32> to vector<8x32xf32>
    %422 = arith.mulf %418, %421 : vector<8x32xf32>
    %423 = arith.addf %420, %422 : vector<8x32xf32>
    %424 = math.tanh %423 : vector<8x32xf32>
    %425 = arith.subf %387, %424 : vector<8x32xf32>
    %426 = arith.mulf %419, %425 : vector<8x32xf32>
    %427 = arith.addf %424, %426 : vector<8x32xf32>
    %cst_91 = arith.constant dense<0.000000e+00> : vector<8x16xf32>
    %428 = tpu.matmul %427, %6, %cst_91 {dimension_numbers = #tpu.dot_dimension_numbers<[1], [0], [0], [1], [0, 0, 1, 1], [], []>} : vector<8x32xf32>, vector<32x16xf32>, vector<8x16xf32> -> vector<8x16xf32>
    %429 = arith.addf %428, %18 : vector<8x16xf32>
    %cst_92 = arith.constant dense<0.000000e+00> : vector<8x128xf32>
    %430 = tpu.matmul %407, %3, %cst_92 {dimension_numbers = #tpu.dot_dimension_numbers<[1], [0], [0], [1], [0, 0, 1, 1], [], []>} : vector<8x32xf32>, vector<32x128xf32>, vector<8x128xf32> -> vector<8x128xf32>
    %431 = arith.addf %430, %12 : vector<8x128xf32>
    %432 = vector.extract_strided_slice %431 {offsets = [0, 0], sizes = [8, 64], strides = [1, 1]} : vector<8x128xf32> to vector<8x64xf32>
    %433 = arith.negf %432 : vector<8x64xf32>
    %434 = math.exp %433 : vector<8x64xf32>
    %cst_93 = arith.constant 1.000000e+00 : f32
    %435 = vector.broadcast %cst_93 : f32 to vector<8x64xf32>
    %436 = arith.addf %435, %434 : vector<8x64xf32>
    %437 = arith.divf %435, %436 : vector<8x64xf32>
    %438 = vector.extract_strided_slice %437 {offsets = [0, 0], sizes = [8, 32], strides = [1, 1]} : vector<8x64xf32> to vector<8x32xf32>
    %439 = vector.extract_strided_slice %437 {offsets = [0, 32], sizes = [8, 32], strides = [1, 1]} : vector<8x64xf32> to vector<8x32xf32>
    %440 = vector.extract_strided_slice %431 {offsets = [0, 64], sizes = [8, 32], strides = [1, 1]} : vector<8x128xf32> to vector<8x32xf32>
    %441 = vector.extract_strided_slice %431 {offsets = [0, 96], sizes = [8, 32], strides = [1, 1]} : vector<8x128xf32> to vector<8x32xf32>
    %442 = arith.mulf %438, %441 : vector<8x32xf32>
    %443 = arith.addf %440, %442 : vector<8x32xf32>
    %444 = math.tanh %443 : vector<8x32xf32>
    %445 = arith.subf %407, %444 : vector<8x32xf32>
    %446 = arith.mulf %439, %445 : vector<8x32xf32>
    %447 = arith.addf %444, %446 : vector<8x32xf32>
    %cst_94 = arith.constant dense<0.000000e+00> : vector<8x128xf32>
    %448 = tpu.matmul %447, %4, %cst_94 {dimension_numbers = #tpu.dot_dimension_numbers<[1], [0], [0], [1], [0, 0, 1, 1], [], []>} : vector<8x32xf32>, vector<32x128xf32>, vector<8x128xf32> -> vector<8x128xf32>
    %cst_95 = arith.constant dense<0.000000e+00> : vector<8x128xf32>
    %449 = tpu.matmul %427, %5, %cst_95 {dimension_numbers = #tpu.dot_dimension_numbers<[1], [0], [0], [1], [0, 0, 1, 1], [], []>} : vector<8x32xf32>, vector<32x128xf32>, vector<8x128xf32> -> vector<8x128xf32>
    %450 = arith.addf %448, %449 : vector<8x128xf32>
    %451 = arith.addf %450, %15 : vector<8x128xf32>
    %452 = vector.extract_strided_slice %451 {offsets = [0, 0], sizes = [8, 64], strides = [1, 1]} : vector<8x128xf32> to vector<8x64xf32>
    %453 = arith.negf %452 : vector<8x64xf32>
    %454 = math.exp %453 : vector<8x64xf32>
    %cst_96 = arith.constant 1.000000e+00 : f32
    %455 = vector.broadcast %cst_96 : f32 to vector<8x64xf32>
    %456 = arith.addf %455, %454 : vector<8x64xf32>
    %457 = arith.divf %455, %456 : vector<8x64xf32>
    %458 = vector.extract_strided_slice %457 {offsets = [0, 0], sizes = [8, 32], strides = [1, 1]} : vector<8x64xf32> to vector<8x32xf32>
    %459 = vector.extract_strided_slice %457 {offsets = [0, 32], sizes = [8, 32], strides = [1, 1]} : vector<8x64xf32> to vector<8x32xf32>
    %460 = vector.extract_strided_slice %451 {offsets = [0, 64], sizes = [8, 32], strides = [1, 1]} : vector<8x128xf32> to vector<8x32xf32>
    %461 = vector.extract_strided_slice %451 {offsets = [0, 96], sizes = [8, 32], strides = [1, 1]} : vector<8x128xf32> to vector<8x32xf32>
    %462 = arith.mulf %458, %461 : vector<8x32xf32>
    %463 = arith.addf %460, %462 : vector<8x32xf32>
    %464 = math.tanh %463 : vector<8x32xf32>
    %465 = arith.subf %427, %464 : vector<8x32xf32>
    %466 = arith.mulf %459, %465 : vector<8x32xf32>
    %467 = arith.addf %464, %466 : vector<8x32xf32>
    %cst_97 = arith.constant dense<0.000000e+00> : vector<8x16xf32>
    %468 = tpu.matmul %467, %6, %cst_97 {dimension_numbers = #tpu.dot_dimension_numbers<[1], [0], [0], [1], [0, 0, 1, 1], [], []>} : vector<8x32xf32>, vector<32x16xf32>, vector<8x16xf32> -> vector<8x16xf32>
    %469 = arith.addf %468, %18 : vector<8x16xf32>
    %cst_98 = arith.constant dense<0.000000e+00> : vector<8x128xf32>
    %470 = tpu.matmul %447, %3, %cst_98 {dimension_numbers = #tpu.dot_dimension_numbers<[1], [0], [0], [1], [0, 0, 1, 1], [], []>} : vector<8x32xf32>, vector<32x128xf32>, vector<8x128xf32> -> vector<8x128xf32>
    %471 = arith.addf %470, %12 : vector<8x128xf32>
    %472 = vector.extract_strided_slice %471 {offsets = [0, 0], sizes = [8, 64], strides = [1, 1]} : vector<8x128xf32> to vector<8x64xf32>
    %473 = arith.negf %472 : vector<8x64xf32>
    %474 = math.exp %473 : vector<8x64xf32>
    %cst_99 = arith.constant 1.000000e+00 : f32
    %475 = vector.broadcast %cst_99 : f32 to vector<8x64xf32>
    %476 = arith.addf %475, %474 : vector<8x64xf32>
    %477 = arith.divf %475, %476 : vector<8x64xf32>
    %478 = vector.extract_strided_slice %477 {offsets = [0, 0], sizes = [8, 32], strides = [1, 1]} : vector<8x64xf32> to vector<8x32xf32>
    %479 = vector.extract_strided_slice %477 {offsets = [0, 32], sizes = [8, 32], strides = [1, 1]} : vector<8x64xf32> to vector<8x32xf32>
    %480 = vector.extract_strided_slice %471 {offsets = [0, 64], sizes = [8, 32], strides = [1, 1]} : vector<8x128xf32> to vector<8x32xf32>
    %481 = vector.extract_strided_slice %471 {offsets = [0, 96], sizes = [8, 32], strides = [1, 1]} : vector<8x128xf32> to vector<8x32xf32>
    %482 = arith.mulf %478, %481 : vector<8x32xf32>
    %483 = arith.addf %480, %482 : vector<8x32xf32>
    %484 = math.tanh %483 : vector<8x32xf32>
    %485 = arith.subf %447, %484 : vector<8x32xf32>
    %486 = arith.mulf %479, %485 : vector<8x32xf32>
    %487 = arith.addf %484, %486 : vector<8x32xf32>
    %cst_100 = arith.constant dense<0.000000e+00> : vector<8x128xf32>
    %488 = tpu.matmul %487, %4, %cst_100 {dimension_numbers = #tpu.dot_dimension_numbers<[1], [0], [0], [1], [0, 0, 1, 1], [], []>} : vector<8x32xf32>, vector<32x128xf32>, vector<8x128xf32> -> vector<8x128xf32>
    %cst_101 = arith.constant dense<0.000000e+00> : vector<8x128xf32>
    %489 = tpu.matmul %467, %5, %cst_101 {dimension_numbers = #tpu.dot_dimension_numbers<[1], [0], [0], [1], [0, 0, 1, 1], [], []>} : vector<8x32xf32>, vector<32x128xf32>, vector<8x128xf32> -> vector<8x128xf32>
    %490 = arith.addf %488, %489 : vector<8x128xf32>
    %491 = arith.addf %490, %15 : vector<8x128xf32>
    %492 = vector.extract_strided_slice %491 {offsets = [0, 0], sizes = [8, 64], strides = [1, 1]} : vector<8x128xf32> to vector<8x64xf32>
    %493 = arith.negf %492 : vector<8x64xf32>
    %494 = math.exp %493 : vector<8x64xf32>
    %cst_102 = arith.constant 1.000000e+00 : f32
    %495 = vector.broadcast %cst_102 : f32 to vector<8x64xf32>
    %496 = arith.addf %495, %494 : vector<8x64xf32>
    %497 = arith.divf %495, %496 : vector<8x64xf32>
    %498 = vector.extract_strided_slice %497 {offsets = [0, 0], sizes = [8, 32], strides = [1, 1]} : vector<8x64xf32> to vector<8x32xf32>
    %499 = vector.extract_strided_slice %497 {offsets = [0, 32], sizes = [8, 32], strides = [1, 1]} : vector<8x64xf32> to vector<8x32xf32>
    %500 = vector.extract_strided_slice %491 {offsets = [0, 64], sizes = [8, 32], strides = [1, 1]} : vector<8x128xf32> to vector<8x32xf32>
    %501 = vector.extract_strided_slice %491 {offsets = [0, 96], sizes = [8, 32], strides = [1, 1]} : vector<8x128xf32> to vector<8x32xf32>
    %502 = arith.mulf %498, %501 : vector<8x32xf32>
    %503 = arith.addf %500, %502 : vector<8x32xf32>
    %504 = math.tanh %503 : vector<8x32xf32>
    %505 = arith.subf %467, %504 : vector<8x32xf32>
    %506 = arith.mulf %499, %505 : vector<8x32xf32>
    %507 = arith.addf %504, %506 : vector<8x32xf32>
    %cst_103 = arith.constant dense<0.000000e+00> : vector<8x16xf32>
    %508 = tpu.matmul %507, %6, %cst_103 {dimension_numbers = #tpu.dot_dimension_numbers<[1], [0], [0], [1], [0, 0, 1, 1], [], []>} : vector<8x32xf32>, vector<32x16xf32>, vector<8x16xf32> -> vector<8x16xf32>
    %509 = arith.addf %508, %18 : vector<8x16xf32>
    %cst_104 = arith.constant dense<0.000000e+00> : vector<8x128xf32>
    %510 = tpu.matmul %487, %3, %cst_104 {dimension_numbers = #tpu.dot_dimension_numbers<[1], [0], [0], [1], [0, 0, 1, 1], [], []>} : vector<8x32xf32>, vector<32x128xf32>, vector<8x128xf32> -> vector<8x128xf32>
    %511 = arith.addf %510, %12 : vector<8x128xf32>
    %512 = vector.extract_strided_slice %511 {offsets = [0, 0], sizes = [8, 64], strides = [1, 1]} : vector<8x128xf32> to vector<8x64xf32>
    %513 = arith.negf %512 : vector<8x64xf32>
    %514 = math.exp %513 : vector<8x64xf32>
    %cst_105 = arith.constant 1.000000e+00 : f32
    %515 = vector.broadcast %cst_105 : f32 to vector<8x64xf32>
    %516 = arith.addf %515, %514 : vector<8x64xf32>
    %517 = arith.divf %515, %516 : vector<8x64xf32>
    %518 = vector.extract_strided_slice %517 {offsets = [0, 0], sizes = [8, 32], strides = [1, 1]} : vector<8x64xf32> to vector<8x32xf32>
    %519 = vector.extract_strided_slice %517 {offsets = [0, 32], sizes = [8, 32], strides = [1, 1]} : vector<8x64xf32> to vector<8x32xf32>
    %520 = vector.extract_strided_slice %511 {offsets = [0, 64], sizes = [8, 32], strides = [1, 1]} : vector<8x128xf32> to vector<8x32xf32>
    %521 = vector.extract_strided_slice %511 {offsets = [0, 96], sizes = [8, 32], strides = [1, 1]} : vector<8x128xf32> to vector<8x32xf32>
    %522 = arith.mulf %518, %521 : vector<8x32xf32>
    %523 = arith.addf %520, %522 : vector<8x32xf32>
    %524 = math.tanh %523 : vector<8x32xf32>
    %525 = arith.subf %487, %524 : vector<8x32xf32>
    %526 = arith.mulf %519, %525 : vector<8x32xf32>
    %527 = arith.addf %524, %526 : vector<8x32xf32>
    %cst_106 = arith.constant dense<0.000000e+00> : vector<8x128xf32>
    %528 = tpu.matmul %527, %4, %cst_106 {dimension_numbers = #tpu.dot_dimension_numbers<[1], [0], [0], [1], [0, 0, 1, 1], [], []>} : vector<8x32xf32>, vector<32x128xf32>, vector<8x128xf32> -> vector<8x128xf32>
    %cst_107 = arith.constant dense<0.000000e+00> : vector<8x128xf32>
    %529 = tpu.matmul %507, %5, %cst_107 {dimension_numbers = #tpu.dot_dimension_numbers<[1], [0], [0], [1], [0, 0, 1, 1], [], []>} : vector<8x32xf32>, vector<32x128xf32>, vector<8x128xf32> -> vector<8x128xf32>
    %530 = arith.addf %528, %529 : vector<8x128xf32>
    %531 = arith.addf %530, %15 : vector<8x128xf32>
    %532 = vector.extract_strided_slice %531 {offsets = [0, 0], sizes = [8, 64], strides = [1, 1]} : vector<8x128xf32> to vector<8x64xf32>
    %533 = arith.negf %532 : vector<8x64xf32>
    %534 = math.exp %533 : vector<8x64xf32>
    %cst_108 = arith.constant 1.000000e+00 : f32
    %535 = vector.broadcast %cst_108 : f32 to vector<8x64xf32>
    %536 = arith.addf %535, %534 : vector<8x64xf32>
    %537 = arith.divf %535, %536 : vector<8x64xf32>
    %538 = vector.extract_strided_slice %537 {offsets = [0, 0], sizes = [8, 32], strides = [1, 1]} : vector<8x64xf32> to vector<8x32xf32>
    %539 = vector.extract_strided_slice %537 {offsets = [0, 32], sizes = [8, 32], strides = [1, 1]} : vector<8x64xf32> to vector<8x32xf32>
    %540 = vector.extract_strided_slice %531 {offsets = [0, 64], sizes = [8, 32], strides = [1, 1]} : vector<8x128xf32> to vector<8x32xf32>
    %541 = vector.extract_strided_slice %531 {offsets = [0, 96], sizes = [8, 32], strides = [1, 1]} : vector<8x128xf32> to vector<8x32xf32>
    %542 = arith.mulf %538, %541 : vector<8x32xf32>
    %543 = arith.addf %540, %542 : vector<8x32xf32>
    %544 = math.tanh %543 : vector<8x32xf32>
    %545 = arith.subf %507, %544 : vector<8x32xf32>
    %546 = arith.mulf %539, %545 : vector<8x32xf32>
    %547 = arith.addf %544, %546 : vector<8x32xf32>
    %cst_109 = arith.constant dense<0.000000e+00> : vector<8x16xf32>
    %548 = tpu.matmul %547, %6, %cst_109 {dimension_numbers = #tpu.dot_dimension_numbers<[1], [0], [0], [1], [0, 0, 1, 1], [], []>} : vector<8x32xf32>, vector<32x16xf32>, vector<8x16xf32> -> vector<8x16xf32>
    %549 = arith.addf %548, %18 : vector<8x16xf32>
    %cst_110 = arith.constant dense<0.000000e+00> : vector<8x128xf32>
    %550 = tpu.matmul %527, %3, %cst_110 {dimension_numbers = #tpu.dot_dimension_numbers<[1], [0], [0], [1], [0, 0, 1, 1], [], []>} : vector<8x32xf32>, vector<32x128xf32>, vector<8x128xf32> -> vector<8x128xf32>
    %551 = arith.addf %550, %12 : vector<8x128xf32>
    %552 = vector.extract_strided_slice %551 {offsets = [0, 0], sizes = [8, 64], strides = [1, 1]} : vector<8x128xf32> to vector<8x64xf32>
    %553 = arith.negf %552 : vector<8x64xf32>
    %554 = math.exp %553 : vector<8x64xf32>
    %cst_111 = arith.constant 1.000000e+00 : f32
    %555 = vector.broadcast %cst_111 : f32 to vector<8x64xf32>
    %556 = arith.addf %555, %554 : vector<8x64xf32>
    %557 = arith.divf %555, %556 : vector<8x64xf32>
    %558 = vector.extract_strided_slice %557 {offsets = [0, 0], sizes = [8, 32], strides = [1, 1]} : vector<8x64xf32> to vector<8x32xf32>
    %559 = vector.extract_strided_slice %557 {offsets = [0, 32], sizes = [8, 32], strides = [1, 1]} : vector<8x64xf32> to vector<8x32xf32>
    %560 = vector.extract_strided_slice %551 {offsets = [0, 64], sizes = [8, 32], strides = [1, 1]} : vector<8x128xf32> to vector<8x32xf32>
    %561 = vector.extract_strided_slice %551 {offsets = [0, 96], sizes = [8, 32], strides = [1, 1]} : vector<8x128xf32> to vector<8x32xf32>
    %562 = arith.mulf %558, %561 : vector<8x32xf32>
    %563 = arith.addf %560, %562 : vector<8x32xf32>
    %564 = math.tanh %563 : vector<8x32xf32>
    %565 = arith.subf %527, %564 : vector<8x32xf32>
    %566 = arith.mulf %559, %565 : vector<8x32xf32>
    %567 = arith.addf %564, %566 : vector<8x32xf32>
    %cst_112 = arith.constant dense<0.000000e+00> : vector<8x128xf32>
    %568 = tpu.matmul %567, %4, %cst_112 {dimension_numbers = #tpu.dot_dimension_numbers<[1], [0], [0], [1], [0, 0, 1, 1], [], []>} : vector<8x32xf32>, vector<32x128xf32>, vector<8x128xf32> -> vector<8x128xf32>
    %cst_113 = arith.constant dense<0.000000e+00> : vector<8x128xf32>
    %569 = tpu.matmul %547, %5, %cst_113 {dimension_numbers = #tpu.dot_dimension_numbers<[1], [0], [0], [1], [0, 0, 1, 1], [], []>} : vector<8x32xf32>, vector<32x128xf32>, vector<8x128xf32> -> vector<8x128xf32>
    %570 = arith.addf %568, %569 : vector<8x128xf32>
    %571 = arith.addf %570, %15 : vector<8x128xf32>
    %572 = vector.extract_strided_slice %571 {offsets = [0, 0], sizes = [8, 64], strides = [1, 1]} : vector<8x128xf32> to vector<8x64xf32>
    %573 = arith.negf %572 : vector<8x64xf32>
    %574 = math.exp %573 : vector<8x64xf32>
    %cst_114 = arith.constant 1.000000e+00 : f32
    %575 = vector.broadcast %cst_114 : f32 to vector<8x64xf32>
    %576 = arith.addf %575, %574 : vector<8x64xf32>
    %577 = arith.divf %575, %576 : vector<8x64xf32>
    %578 = vector.extract_strided_slice %577 {offsets = [0, 0], sizes = [8, 32], strides = [1, 1]} : vector<8x64xf32> to vector<8x32xf32>
    %579 = vector.extract_strided_slice %577 {offsets = [0, 32], sizes = [8, 32], strides = [1, 1]} : vector<8x64xf32> to vector<8x32xf32>
    %580 = vector.extract_strided_slice %571 {offsets = [0, 64], sizes = [8, 32], strides = [1, 1]} : vector<8x128xf32> to vector<8x32xf32>
    %581 = vector.extract_strided_slice %571 {offsets = [0, 96], sizes = [8, 32], strides = [1, 1]} : vector<8x128xf32> to vector<8x32xf32>
    %582 = arith.mulf %578, %581 : vector<8x32xf32>
    %583 = arith.addf %580, %582 : vector<8x32xf32>
    %584 = math.tanh %583 : vector<8x32xf32>
    %585 = arith.subf %547, %584 : vector<8x32xf32>
    %586 = arith.mulf %579, %585 : vector<8x32xf32>
    %587 = arith.addf %584, %586 : vector<8x32xf32>
    %cst_115 = arith.constant dense<0.000000e+00> : vector<8x16xf32>
    %588 = tpu.matmul %587, %6, %cst_115 {dimension_numbers = #tpu.dot_dimension_numbers<[1], [0], [0], [1], [0, 0, 1, 1], [], []>} : vector<8x32xf32>, vector<32x16xf32>, vector<8x16xf32> -> vector<8x16xf32>
    %589 = arith.addf %588, %18 : vector<8x16xf32>
    %cst_116 = arith.constant dense<0.000000e+00> : vector<8x128xf32>
    %590 = tpu.matmul %567, %3, %cst_116 {dimension_numbers = #tpu.dot_dimension_numbers<[1], [0], [0], [1], [0, 0, 1, 1], [], []>} : vector<8x32xf32>, vector<32x128xf32>, vector<8x128xf32> -> vector<8x128xf32>
    %591 = arith.addf %590, %12 : vector<8x128xf32>
    %592 = vector.extract_strided_slice %591 {offsets = [0, 0], sizes = [8, 64], strides = [1, 1]} : vector<8x128xf32> to vector<8x64xf32>
    %593 = arith.negf %592 : vector<8x64xf32>
    %594 = math.exp %593 : vector<8x64xf32>
    %cst_117 = arith.constant 1.000000e+00 : f32
    %595 = vector.broadcast %cst_117 : f32 to vector<8x64xf32>
    %596 = arith.addf %595, %594 : vector<8x64xf32>
    %597 = arith.divf %595, %596 : vector<8x64xf32>
    %598 = vector.extract_strided_slice %597 {offsets = [0, 0], sizes = [8, 32], strides = [1, 1]} : vector<8x64xf32> to vector<8x32xf32>
    %599 = vector.extract_strided_slice %597 {offsets = [0, 32], sizes = [8, 32], strides = [1, 1]} : vector<8x64xf32> to vector<8x32xf32>
    %600 = vector.extract_strided_slice %591 {offsets = [0, 64], sizes = [8, 32], strides = [1, 1]} : vector<8x128xf32> to vector<8x32xf32>
    %601 = vector.extract_strided_slice %591 {offsets = [0, 96], sizes = [8, 32], strides = [1, 1]} : vector<8x128xf32> to vector<8x32xf32>
    %602 = arith.mulf %598, %601 : vector<8x32xf32>
    %603 = arith.addf %600, %602 : vector<8x32xf32>
    %604 = math.tanh %603 : vector<8x32xf32>
    %605 = arith.subf %567, %604 : vector<8x32xf32>
    %606 = arith.mulf %599, %605 : vector<8x32xf32>
    %607 = arith.addf %604, %606 : vector<8x32xf32>
    %cst_118 = arith.constant dense<0.000000e+00> : vector<8x128xf32>
    %608 = tpu.matmul %607, %4, %cst_118 {dimension_numbers = #tpu.dot_dimension_numbers<[1], [0], [0], [1], [0, 0, 1, 1], [], []>} : vector<8x32xf32>, vector<32x128xf32>, vector<8x128xf32> -> vector<8x128xf32>
    %cst_119 = arith.constant dense<0.000000e+00> : vector<8x128xf32>
    %609 = tpu.matmul %587, %5, %cst_119 {dimension_numbers = #tpu.dot_dimension_numbers<[1], [0], [0], [1], [0, 0, 1, 1], [], []>} : vector<8x32xf32>, vector<32x128xf32>, vector<8x128xf32> -> vector<8x128xf32>
    %610 = arith.addf %608, %609 : vector<8x128xf32>
    %611 = arith.addf %610, %15 : vector<8x128xf32>
    %612 = vector.extract_strided_slice %611 {offsets = [0, 0], sizes = [8, 64], strides = [1, 1]} : vector<8x128xf32> to vector<8x64xf32>
    %613 = arith.negf %612 : vector<8x64xf32>
    %614 = math.exp %613 : vector<8x64xf32>
    %cst_120 = arith.constant 1.000000e+00 : f32
    %615 = vector.broadcast %cst_120 : f32 to vector<8x64xf32>
    %616 = arith.addf %615, %614 : vector<8x64xf32>
    %617 = arith.divf %615, %616 : vector<8x64xf32>
    %618 = vector.extract_strided_slice %617 {offsets = [0, 0], sizes = [8, 32], strides = [1, 1]} : vector<8x64xf32> to vector<8x32xf32>
    %619 = vector.extract_strided_slice %617 {offsets = [0, 32], sizes = [8, 32], strides = [1, 1]} : vector<8x64xf32> to vector<8x32xf32>
    %620 = vector.extract_strided_slice %611 {offsets = [0, 64], sizes = [8, 32], strides = [1, 1]} : vector<8x128xf32> to vector<8x32xf32>
    %621 = vector.extract_strided_slice %611 {offsets = [0, 96], sizes = [8, 32], strides = [1, 1]} : vector<8x128xf32> to vector<8x32xf32>
    %622 = arith.mulf %618, %621 : vector<8x32xf32>
    %623 = arith.addf %620, %622 : vector<8x32xf32>
    %624 = math.tanh %623 : vector<8x32xf32>
    %625 = arith.subf %587, %624 : vector<8x32xf32>
    %626 = arith.mulf %619, %625 : vector<8x32xf32>
    %627 = arith.addf %624, %626 : vector<8x32xf32>
    %cst_121 = arith.constant dense<0.000000e+00> : vector<8x16xf32>
    %628 = tpu.matmul %627, %6, %cst_121 {dimension_numbers = #tpu.dot_dimension_numbers<[1], [0], [0], [1], [0, 0, 1, 1], [], []>} : vector<8x32xf32>, vector<32x16xf32>, vector<8x16xf32> -> vector<8x16xf32>
    %629 = arith.addf %628, %18 : vector<8x16xf32>
    %cst_122 = arith.constant dense<0.000000e+00> : vector<8x128xf32>
    %630 = tpu.matmul %607, %3, %cst_122 {dimension_numbers = #tpu.dot_dimension_numbers<[1], [0], [0], [1], [0, 0, 1, 1], [], []>} : vector<8x32xf32>, vector<32x128xf32>, vector<8x128xf32> -> vector<8x128xf32>
    %631 = arith.addf %630, %12 : vector<8x128xf32>
    %632 = vector.extract_strided_slice %631 {offsets = [0, 0], sizes = [8, 64], strides = [1, 1]} : vector<8x128xf32> to vector<8x64xf32>
    %633 = arith.negf %632 : vector<8x64xf32>
    %634 = math.exp %633 : vector<8x64xf32>
    %cst_123 = arith.constant 1.000000e+00 : f32
    %635 = vector.broadcast %cst_123 : f32 to vector<8x64xf32>
    %636 = arith.addf %635, %634 : vector<8x64xf32>
    %637 = arith.divf %635, %636 : vector<8x64xf32>
    %638 = vector.extract_strided_slice %637 {offsets = [0, 0], sizes = [8, 32], strides = [1, 1]} : vector<8x64xf32> to vector<8x32xf32>
    %639 = vector.extract_strided_slice %637 {offsets = [0, 32], sizes = [8, 32], strides = [1, 1]} : vector<8x64xf32> to vector<8x32xf32>
    %640 = vector.extract_strided_slice %631 {offsets = [0, 64], sizes = [8, 32], strides = [1, 1]} : vector<8x128xf32> to vector<8x32xf32>
    %641 = vector.extract_strided_slice %631 {offsets = [0, 96], sizes = [8, 32], strides = [1, 1]} : vector<8x128xf32> to vector<8x32xf32>
    %642 = arith.mulf %638, %641 : vector<8x32xf32>
    %643 = arith.addf %640, %642 : vector<8x32xf32>
    %644 = math.tanh %643 : vector<8x32xf32>
    %645 = arith.subf %607, %644 : vector<8x32xf32>
    %646 = arith.mulf %639, %645 : vector<8x32xf32>
    %647 = arith.addf %644, %646 : vector<8x32xf32>
    %cst_124 = arith.constant dense<0.000000e+00> : vector<8x128xf32>
    %648 = tpu.matmul %647, %4, %cst_124 {dimension_numbers = #tpu.dot_dimension_numbers<[1], [0], [0], [1], [0, 0, 1, 1], [], []>} : vector<8x32xf32>, vector<32x128xf32>, vector<8x128xf32> -> vector<8x128xf32>
    %cst_125 = arith.constant dense<0.000000e+00> : vector<8x128xf32>
    %649 = tpu.matmul %627, %5, %cst_125 {dimension_numbers = #tpu.dot_dimension_numbers<[1], [0], [0], [1], [0, 0, 1, 1], [], []>} : vector<8x32xf32>, vector<32x128xf32>, vector<8x128xf32> -> vector<8x128xf32>
    %650 = arith.addf %648, %649 : vector<8x128xf32>
    %651 = arith.addf %650, %15 : vector<8x128xf32>
    %652 = vector.extract_strided_slice %651 {offsets = [0, 0], sizes = [8, 64], strides = [1, 1]} : vector<8x128xf32> to vector<8x64xf32>
    %653 = arith.negf %652 : vector<8x64xf32>
    %654 = math.exp %653 : vector<8x64xf32>
    %cst_126 = arith.constant 1.000000e+00 : f32
    %655 = vector.broadcast %cst_126 : f32 to vector<8x64xf32>
    %656 = arith.addf %655, %654 : vector<8x64xf32>
    %657 = arith.divf %655, %656 : vector<8x64xf32>
    %658 = vector.extract_strided_slice %657 {offsets = [0, 0], sizes = [8, 32], strides = [1, 1]} : vector<8x64xf32> to vector<8x32xf32>
    %659 = vector.extract_strided_slice %657 {offsets = [0, 32], sizes = [8, 32], strides = [1, 1]} : vector<8x64xf32> to vector<8x32xf32>
    %660 = vector.extract_strided_slice %651 {offsets = [0, 64], sizes = [8, 32], strides = [1, 1]} : vector<8x128xf32> to vector<8x32xf32>
    %661 = vector.extract_strided_slice %651 {offsets = [0, 96], sizes = [8, 32], strides = [1, 1]} : vector<8x128xf32> to vector<8x32xf32>
    %662 = arith.mulf %658, %661 : vector<8x32xf32>
    %663 = arith.addf %660, %662 : vector<8x32xf32>
    %664 = math.tanh %663 : vector<8x32xf32>
    %665 = arith.subf %627, %664 : vector<8x32xf32>
    %666 = arith.mulf %659, %665 : vector<8x32xf32>
    %667 = arith.addf %664, %666 : vector<8x32xf32>
    %cst_127 = arith.constant dense<0.000000e+00> : vector<8x16xf32>
    %668 = tpu.matmul %667, %6, %cst_127 {dimension_numbers = #tpu.dot_dimension_numbers<[1], [0], [0], [1], [0, 0, 1, 1], [], []>} : vector<8x32xf32>, vector<32x16xf32>, vector<8x16xf32> -> vector<8x16xf32>
    %669 = arith.addf %668, %18 : vector<8x16xf32>
    %670 = tpu.concatenate %389, %429, %469, %509, %549, %589, %629, %669 in 1 : vector<8x16xf32>, vector<8x16xf32>, vector<8x16xf32>, vector<8x16xf32>, vector<8x16xf32>, vector<8x16xf32>, vector<8x16xf32>, vector<8x16xf32> -> vector<8x128xf32>
    %671 = arith.negf %670 : vector<8x128xf32>
    %672 = math.exp %671 : vector<8x128xf32>
    %cst_128 = arith.constant 1.000000e+00 : f32
    %673 = vector.broadcast %cst_128 : f32 to vector<8x128xf32>
    %674 = arith.addf %673, %672 : vector<8x128xf32>
    %675 = arith.divf %673, %674 : vector<8x128xf32>
    %c0_129 = arith.constant 0 : index
    %c0_130 = arith.constant 0 : index
    %676 = vector.load %arg18[%c0_129, %c0_130] : memref<8x128xf32, #tpu.memory_space<vmem>>, vector<8x128xf32>
    tpu.vector_store %arg18[%c0_129, %c0_130], %675 {strides = array<i32>} : memref<8x128xf32, #tpu.memory_space<vmem>>, vector<8x128xf32>,
    return
  }
}

</mosaic_0001>

<bundles_post_ra>
// kernel: gru_autoencoder_forward.1
= control target key start
LH: loop header
LB: loop body
LE: loop exit
PB: predicated region body
PF: predicated region fallthrough
CT: control target
= control target key end

     0   :  { %s8501_s0 = inlined_call_operand.vmem [shape: f32[8,8,16], index: 0, kind: input, shape index: {}]   ;;  %s8502_s1 = inlined_call_operand.hbm [shape: f32[16,128], index: 1, kind: input, shape index: {}]   ;;  %s8503_s2 = inlined_call_operand.hbm [shape: f32[32,128], index: 2, kind: input, shape index: {}]   ;;  %s8504_s3 = inlined_call_operand.hbm [shape: f32[1,128], index: 3, kind: input, shape index: {}]   ;;  %s8505_s4 = inlined_call_operand.hbm [shape: f32[32,128], index: 4, kind: input, shape index: {}]   ;;  %s8506_s5 = inlined_call_operand.hbm [shape: f32[32,128], index: 5, kind: input, shape index: {}]   ;;  %s8507_s6 = inlined_call_operand.hbm [shape: f32[1,128], index: 6, kind: input, shape index: {}]   ;;  %s8508_s7 = inlined_call_operand.hbm [shape: f32[32,8], index: 7, kind: input, shape index: {}]   ;;  %s8509_s8 = inlined_call_operand.hbm [shape: f32[1,8], index: 8, kind: input, shape index: {}]   ;;  %s8510_s9 = inlined_call_operand.hbm [shape: f32[8,32], index: 9, kind: input, shape index: {}]   ;;  %s8511_s10 = inlined_call_operand.hbm [shape: f32[1,32], index: 10, kind: input, shape index: {}]   ;;  %s8512_s11 = inlined_call_operand.vmem [shape: f32[32,128], index: 11, kind: input, shape index: {}]   ;;  %s8513_s12 = inlined_call_operand.vmem [shape: f32[1,128], index: 12, kind: input, shape index: {}]   ;;  %s8514_s13 = inlined_call_operand.vmem [shape: f32[32,128], index: 13, kind: input, shape index: {}]   ;;  %s8515_s14 = inlined_call_operand.vmem [shape: f32[32,128], index: 14, kind: input, shape index: {}]   ;;  %s8516_s15 = inlined_call_operand.vmem [shape: f32[1,128], index: 15, kind: input, shape index: {}]   ;;  %s8517_s16 = inlined_call_operand.vmem [shape: f32[32,16], index: 16, kind: input, shape index: {}]   ;;  %s8518_s17 = inlined_call_operand.vmem [shape: f32[1,16], index: 17, kind: input, shape index: {}]   ;;  %s8519_s18 = inlined_call_operand.vmem [shape: f32[8,128], index: 18, kind: output, shape index: {}]  }
   0x1   :  { %8521 = sst [smem:[#allocation24_spill]] %s8501_s0 }
   0x2   :  { %8522 = sst [smem:[#allocation25_spill]] %s8502_s1 }
   0x3   :  { %8523 = sst [smem:[#allocation26_spill]] %s8503_s2 }
   0x4   :  { %23 = vsyncpa [#allocation3], 0 }
   0x5   :  { %24 = vsyncpa [#allocation5], 0 }
   0x6   :  { %25 = vsyncpa [#allocation8], 0 }
   0x7   :  { %26 = vsyncpa [#allocation11], 0 }
   0x8   :  { %27 = vsyncpa [#allocation14], 0 }
   0x9   :  { %28 = vsyncpa [#allocation17], 0  ;;  %s7133_s27 = smov [#allocation4]   ;;  %s7134_s29 = smov [#allocation7]  }
   0xa   :  { %s48_s28 = sshll.u32 %s7133_s27, 4  ;;  %s70_s30 = sshll.u32 %s7134_s29, 4  ;;  %s49_s28 = int_to_ptr.vmem [resolvable:$true] %s48_s28  ;;  %s71_s30 = int_to_ptr.vmem [resolvable:$true] %s70_s30 }
   0xb   :  { %s6929_s0 = scalar_lea.vmem %s49_s28, 512  ;;  %p6934_p1 = scmp.lt.s32.totalorder %s49_s28, %s49_s28 }
   0xc   :  { %p6930_p0 = scmp.ne.s32.totalorder %s49_s28, %s6929_s0  ;;  %p6935_p2 = scmp.lt.s32.totalorder %s6929_s0, %s6929_s0 }
   0xe   :  { %p6936_p3 = por %p6935_p2, %p6934_p1 }
  0x10   :  { %p6937_p4 = pnand %p6936_p3, %p6930_p0 }
  0x12   :  { %6940 = shalt.err (!%p6937_p4)
}
  0x13   :  { %s7135_s19 = smov 128   ;;  %s7136_s1 = smov 8  }
  0x14   :  { %s8524_s22 = sld [smem:[#allocation26_spill]]  ;;  %s6949_s2 = scalar_lea.vmem %s71_s30, 512 }
  0x15   :  { %p6950_p5 = scmp.ne.s32.totalorder %s71_s30, %s6949_s2  ;;  %p6954_p6 = scmp.lt.s32.totalorder %s71_s30, %s71_s30 }
  0x16   :  { %p6955_p7 = scmp.lt.s32.totalorder %s6949_s2, %s6949_s2 }
  0x18   :  { %p6956_p8 = por %p6955_p7, %p6954_p6 }
  0x1a   :  { %54 = dma.hbm_to_vmem [thread:$0]  %s8524_s22, 512, %s49_s28, [#allocation5], %s7135_s19, %s7135_s19, %s7136_s1  }
  0x1b   :  { %p6957_p9 = pnand %p6956_p8, %p6950_p5 }
  0x1d   :  { %6960 = shalt.err (!%p6957_p9)
}
  0x1e   :  { %76 = dma.hbm_to_vmem [thread:$0]  %s8505_s4, 512, %s71_s30, [#allocation8], %s7135_s19, %s7135_s19, %s7136_s1  }
  0x1f   :  { %s7137_s25 = smov [#allocation10]   ;;  %s7138_s27 = smov [#allocation13]  }
  0x20   :  { %s95_s26 = sshll.u32 %s7137_s25, 4  ;;  %s117_s29 = sshll.u32 %s7138_s27, 4  ;;  %s96_s26 = int_to_ptr.vmem [resolvable:$true] %s95_s26  ;;  %s118_s29 = int_to_ptr.vmem [resolvable:$true] %s117_s29 }
  0x21   :  { %s6969_s28 = scalar_lea.vmem %s96_s26, 16  ;;  %s6973_s0 = scalar_lea.vmem %s96_s26, 32 }
  0x22   :  { %p6970_p10 = scmp.ne.s32.totalorder %s96_s26, %s6969_s28  ;;  %p6974_p11 = scmp.lt.s32.totalorder %s96_s26, %s96_s26 }
  0x23   :  { %p6975_p12 = scmp.lt.s32.totalorder %s6973_s0, %s6969_s28 }
  0x25   :  { %p6976_p13 = por %p6975_p12, %p6974_p11 }
  0x27   :  { %p6977_p0 = pnand %p6976_p13, %p6970_p10 }
  0x29   :  { %6980 = shalt.err (!%p6977_p0)
}
  0x2a   :  { %98 = dma.hbm_to_vmem [thread:$0]  %s8507_s6, 16, %s96_s26, [#allocation11]  }
  0x2b   :  { %s6989_s22 = scalar_lea.vmem %s118_s29, 16  ;;  %s6993_s4 = scalar_lea.vmem %s118_s29, 32 }
  0x2c   :  { %p6990_p1 = scmp.ne.s32.totalorder %s118_s29, %s6989_s22  ;;  %p6994_p2 = scmp.lt.s32.totalorder %s118_s29, %s118_s29 }
  0x2d   :  { %p6995_p3 = scmp.lt.s32.totalorder %s6993_s4, %s6989_s22 }
  0x2f   :  { %p6996_p4 = por %p6995_p3, %p6994_p2 }
  0x31   :  { %p6997_p5 = pnand %p6996_p4, %p6990_p1 }
  0x33   :  { %7000 = shalt.err (!%p6997_p5)
}
  0x34   :  { %120 = dma.hbm_to_vmem [thread:$0]  %s8509_s8, 16, %s118_s29, [#allocation14]  }
  0x35   :  { %s7139_s23 = smov [#allocation2]   ;;  %s7140_s25 = smov [#allocation6]  }
  0x36   :  { %s36_s24 = sshll.u32 %s7139_s23, 4  ;;  %s61_s27 = sshll.u32 %s7140_s25, 4  ;;  %s37_s24 = int_to_ptr.vmem [resolvable:$true] %s36_s24  ;;  %s62_s27 = int_to_ptr.vmem [resolvable:$true] %s61_s27 }
  0x37   :  { %s7009_s28 = scalar_lea.vmem %s37_s24, 256  ;;  %p7014_p7 = scmp.lt.s32.totalorder %s37_s24, %s37_s24 }
  0x38   :  { %p7010_p6 = scmp.ne.s32.totalorder %s37_s24, %s7009_s28  ;;  %p7015_p8 = scmp.lt.s32.totalorder %s7009_s28, %s7009_s28 }
  0x3a   :  { %p7016_p9 = por %p7015_p8, %p7014_p7 }
  0x3c   :  { %p7017_p10 = pnand %p7016_p9, %p7010_p6 }
  0x3e   :  { %7020 = shalt.err (!%p7017_p10)
}
  0x3f   :  { %s8525_s0 = sld [smem:[#allocation25_spill]]  ;;  %s7029_s8 = scalar_lea.vmem %s62_s27, 16 }
  0x40   :  { %p7030_p11 = scmp.ne.s32.totalorder %s62_s27, %s7029_s8  ;;  %s7033_s29 = scalar_lea.vmem %s62_s27, 32 }
  0x41   :  { %p7034_p12 = scmp.lt.s32.totalorder %s62_s27, %s62_s27  ;;  %p7035_p13 = scmp.lt.s32.totalorder %s7033_s29, %s7029_s8 }
  0x43   :  { %p7036_p0 = por %p7035_p13, %p7034_p12 }
  0x45   :  { %42 = dma.hbm_to_vmem [thread:$0]  %s8525_s0, 256, %s37_s24, [#allocation3], %s7135_s19, %s7135_s19, %s7136_s1  }
  0x46   :  { %p7037_p1 = pnand %p7036_p0, %p7030_p11 }
  0x48   :  { %7040 = shalt.err (!%p7037_p1)
}
  0x49   :  { %64 = dma.hbm_to_vmem [thread:$0]  %s8504_s3, 16, %s62_s27, [#allocation5]  }
  0x4a   :  { %s7141_s22 = smov [#allocation9]   ;;  %s7142_s30 = smov [#allocation12]  }
  0x4b   :  { %s82_s4 = sshll.u32 %s7141_s22, 4  ;;  %s104_s2 = sshll.u32 %s7142_s30, 4  ;;  %s83_s4 = int_to_ptr.vmem [resolvable:$true] %s82_s4  ;;  %s105_s2 = int_to_ptr.vmem [resolvable:$true] %s104_s2 }
  0x4c   :  { %s7049_s23 = scalar_lea.vmem %s83_s4, 512  ;;  %p7054_p3 = scmp.lt.s32.totalorder %s83_s4, %s83_s4 }
  0x4d   :  { %p7050_p2 = scmp.ne.s32.totalorder %s83_s4, %s7049_s23  ;;  %p7055_p4 = scmp.lt.s32.totalorder %s7049_s23, %s7049_s23 }
  0x4f   :  { %p7056_p5 = por %p7055_p4, %p7054_p3 }
  0x51   :  { %p7057_p6 = pnand %p7056_p5, %p7050_p2 }
  0x53   :  { %7060 = shalt.err (!%p7057_p6)
}
  0x54   :  { %88 = dma.hbm_to_vmem [thread:$0]  %s8506_s5, 512, %s83_s4, [#allocation8], %s7135_s19, %s7135_s19, %s7136_s1  }
  0x55   :  { %s7069_s3 = scalar_lea.vmem %s105_s2, 512  ;;  %p7074_p8 = scmp.lt.s32.totalorder %s105_s2, %s105_s2 }
  0x56   :  { %p7070_p7 = scmp.ne.s32.totalorder %s105_s2, %s7069_s3  ;;  %p7075_p9 = scmp.lt.s32.totalorder %s7069_s3, %s7069_s3 }
  0x58   :  { %p7076_p10 = por %p7075_p9, %p7074_p8 }
  0x5a   :  { %p7077_p11 = pnand %p7076_p10, %p7070_p7 }
  0x5c   :  { %7080 = shalt.err (!%p7077_p11)
}
  0x5d   :  { %110 = dma.hbm_to_vmem [thread:$0]  %s8508_s7, 512, %s105_s2, [#allocation11], %s7135_s19, %s7135_s19, %s7136_s1  }
  0x5e   :  { %s7143_s6 = smov [#allocation15]   ;;  %s7144_s0 = smov [#allocation16]  }
  0x5f   :  { %s127_s26 = sshll.u32 %s7143_s6, 4  ;;  %s137_s8 = sshll.u32 %s7144_s0, 4  ;;  %s128_s26 = int_to_ptr.vmem [resolvable:$true] %s127_s26  ;;  %s138_s8 = int_to_ptr.vmem [resolvable:$true] %s137_s8 }
  0x60   :  { %s7089_s5 = scalar_lea.vmem %s128_s26, 128  ;;  %p7094_p13 = scmp.lt.s32.totalorder %s128_s26, %s128_s26 }
  0x61   :  { %p7090_p12 = scmp.ne.s32.totalorder %s128_s26, %s7089_s5  ;;  %p7095_p0 = scmp.lt.s32.totalorder %s7089_s5, %s7089_s5 }
  0x63   :  { %p7096_p1 = por %p7095_p0, %p7094_p13 }
  0x65   :  { %p7097_p2 = pnand %p7096_p1, %p7090_p12 }
  0x67   :  { %7100 = shalt.err (!%p7097_p2)
}
  0x68   :  { %130 = dma.hbm_to_vmem [thread:$0]  %s8510_s9, 128, %s128_s26, [#allocation14]  }
  0x69   :  { %s7109_s21 = scalar_lea.vmem %s138_s8, 16  ;;  %s7113_s7 = scalar_lea.vmem %s138_s8, 32 }
  0x6a   :  { %p7110_p3 = scmp.ne.s32.totalorder %s138_s8, %s7109_s21  ;;  %p7114_p4 = scmp.lt.s32.totalorder %s138_s8, %s138_s8 }
  0x6b   :  { %p7115_p5 = scmp.lt.s32.totalorder %s7113_s7, %s7109_s21 }
  0x6d   :  { %p7116_p6 = por %p7115_p5, %p7114_p4 }
  0x6f   :  { %p7117_p7 = pnand %p7116_p6, %p7110_p3 }
  0x71   :  { %7120 = shalt.err (!%p7117_p7)
}
  0x72   :  { %140 = dma.hbm_to_vmem [thread:$0]  %s8511_s10, 16, %s138_s8, [#allocation17]  }
  0x73   :  { %7121 = dma.done.wait [#allocation3], 256  }
  0x74   :  { %7122 = vsyncadd [#allocation3], 4294967040 }
  0x75   :  { %7123 = dma.done.wait [#allocation5], 528  }
  0x76   :  { %7124 = vsyncadd [#allocation5], 4294966768 }
  0x77   :  { %7125 = dma.done.wait [#allocation8], 1024  }
  0x78   :  { %7126 = vsyncadd [#allocation8], 4294966272 }
  0x79   :  { %7127 = dma.done.wait [#allocation11], 528  }
  0x7a   :  { %7128 = vsyncadd [#allocation11], 4294966768 }
  0x7b   :  { %7129 = dma.done.wait [#allocation14], 144  }
  0x7c   :  { %7130 = vsyncadd [#allocation14], 4294967152 }
  0x7d   :  { %7131 = dma.done.wait [#allocation17], 16  }
  0x7e   :  { %7132 = vsyncadd [#allocation17], 4294967280  ;;  %v7145_v0 = vmov 0.0   ;;  %vm7146_vm0 = vmmov 0   ;;  %v250_v1 = vld [vmem:[#allocation2 + $0x8] sm:$0xff]  ;;  %v249_v3 = vld [vmem:[#allocation2] sm:$0xff] }
  0x7f   :  { %6040 = vmatprep.subr.mxu1 %v7145_v0  ;;  %6048 = vmatprep.mubr.msk.f32.mxu1 %vm7146_vm0, %v7145_v0  ;;  %v7297_v2 = vld [vmem:[#allocation4 + $0x18] sm:$0xff]  ;;  %v7300_v4 = vld [vmem:[#allocation4 + $0x10] sm:$0xff]  ;;  %s8526_s22 = sld [smem:[#allocation24_spill]]  ;;  %vm258_vm1 = vcmask 130048   ;;  %v7310_v7 = vld [vmem:[#allocation4 + $0x8] sm:$0xff]  ;;  %s7147_s2 = smov 32  }
  0x80   :  { %6024 = vmatprep.subr.mxu0 %v250_v1  ;;  %6041 = vmatpush3.msra.mxu1 %v7297_v2  ;;  %v7315_v8 = vld [vmem:[#allocation4] sm:$0xff]  ;;  %s7148_s23 = smov 64   ;;  %s7149_s24 = smov 96   ;;  %v7345_v30 = vld [vmem:[#allocation9 + $0x10] sm:$0xff]  ;;  %v7356_v33 = vld [vmem:[#allocation9 + $0x8] sm:$0xff]  ;;  %vm388_vm2 = vcmask 261120  }
  0x81   :  { %6025 = vmatpush3.msra.mxu0 %v250_v1  ;;  %6042 = vmatprep.subr.mxu1 %v7145_v0  ;;  %v7327_v10 = vld [vmem:[#allocation6] ss:$0 sm:$0xff]  ;;  %v7347_v31 = vld [vmem:[#allocation7 + $0x10] sm:$0xff]  ;;  %v7365_v35 = vld [vmem:[#allocation9] sm:$0xff]  ;;  %vm2705_vm3 = vcmask 64512   ;;  %s7150_s30 = smov 16  }
  0x82   :  { %6026 = vmatprep.subr.mxu0 %v249_v3  ;;  %6043 = vmatpush3.msra.mxu1 %v7300_v4  ;;  %v7333_v26 = vld [vmem:[#allocation7 + $0x18] sm:$0xff]  ;;  %v7367_v36 = vld [vmem:[#allocation7 + $0x8] sm:$0xff]  ;;  %v7385_v41 = vld [vmem:[#allocation7] sm:$0xff]  ;;  %s7151_s25 = smov 48   ;;  %s7152_s3 = smov 80   ;;  %vm5596_vm4 = vcmask 392192  }
  0x83   :  { %6027 = vmatpush3.msra.mxu0 %v249_v3  ;;  %6044 = vmatprep.subr.mxu1 %v7145_v0  ;;  %v7338_v28 = vld [vmem:[#allocation9 + $0x18] sm:$0xff]  ;;  %v7443_v54 = vld [vmem:[#allocation10] ss:$0 sm:$0xff]  ;;  %vm5598_vm5 = vcmask 523264   ;;  %vm5600_vm6 = vcmask 654336   ;;  %vm5602_vm7 = vcmask 785408  }
  0x84   :  { %6045 = vmatpush3.msra.mxu1 %v7310_v7  ;;  %6062 = vmatprep.subr.mxu0 %v7145_v0  ;;  %vm5604_vm8 = vcmask 916480  }
  0x85   :  { %v241_v5 = vld [vmem:[%s8526_s22] sm:$0xff]  ;;  %v242_v6 = vld [vmem:[%s8526_s22 + $0x8] sm:$0xff]  ;;  %6046 = vmatprep.subr.mxu1 %v7145_v0  ;;  %v243_v27 = vld [vmem:[%s8526_s22 + $0x10] sm:$0xff] }
  0x86   :  { %6028 = vmatprep.mubr.msk.f32.mxu0 %vm258_vm1, %v241_v5  ;;  %6047 = vmatpush3.msra.mxu1 %v7315_v8  ;;  %v244_v29 = vld [vmem:[%s8526_s22 + $0x18] sm:$0xff]  ;;  %v245_v32 = vld [vmem:[%s8526_s22 + $0x20] sm:$0xff]  ;;  %v246_v34 = vld [vmem:[%s8526_s22 + $0x28] sm:$0xff] }
  0x87   :  { %6029 = vmatmul.mubr.msk.f32.vlgmr.msra.gmra.mxu0 %vm258_vm1, %v242_v6  ;;  %6049 = vmatmul.mubr.f32.vlgmr.msra.gmra.mxu1 %v7145_v0  ;;  %v247_v37 = vld [vmem:[%s8526_s22 + $0x30] sm:$0xff]  ;;  %v248_v38 = vld [vmem:[%s8526_s22 + $0x38] sm:$0xff] }
  0x88   :  { %6051 = vmatprep.subr.mxu1 %v7145_v0  ;;  %6059 = vmatprep.mubr.msk.f32.mxu1 %vm7146_vm0, %v7145_v0 }
  0x89   :  { %6063 = vmatpush3.msra.mxu0 %v7333_v26  ;;  %6031 = vmatprep.mubr.msk.f32.mxu0 %vm258_vm1, %v243_v27 }
  0x8a   :  { %6052 = vmatpush3.msra.mxu1 %v7338_v28  ;;  %6064 = vmatprep.subr.mxu0 %v7145_v0 }
  0x8b   :  { %6032 = vmatmul.mubr.msk.f32.gmra.mxu0 %vm258_vm1, %v244_v29  ;;  %6053 = vmatprep.subr.mxu1 %v7145_v0 }
  0x8c   :  { %6054 = vmatpush3.msra.mxu1 %v7345_v30  ;;  %6065 = vmatpush3.msra.mxu0 %v7347_v31 }
  0x8d   :  { %6055 = vmatprep.subr.mxu1 %v7145_v0  ;;  %6034 = vmatprep.mubr.msk.f32.mxu0 %vm258_vm1, %v245_v32 }
  0x8e   :  { %6056 = vmatpush3.msra.mxu1 %v7356_v33  ;;  %6066 = vmatprep.subr.mxu0 %v7145_v0 }
  0x8f   :  { %6035 = vmatmul.mubr.msk.f32.gmra.mxu0 %vm258_vm1, %v246_v34  ;;  %6057 = vmatprep.subr.mxu1 %v7145_v0 }
  0x90   :  { %6058 = vmatpush3.msra.mxu1 %v7365_v35  ;;  %6067 = vmatpush3.msra.mxu0 %v7367_v36 }
  0x91   :  { %6073 = vmatprep.subr.mxu1 %v7145_v0  ;;  %6037 = vmatprep.mubr.msk.f32.mxu0 %vm258_vm1, %v247_v37 }
  0x92   :  { %6060 = vmatmul.mubr.f32.vlgmr.msra.gmra.mxu1 %v7145_v0  ;;  %6068 = vmatprep.subr.mxu0 %v7145_v0 }
  0x93   :  { %6038 = vmatmul.mubr.msk.f32.gmra.mxu0 %vm258_vm1, %v248_v38  ;;  %6074 = vmatpush3.msra.mxu1 %v7297_v2 }
  0x94   :  { %6075 = vmatprep.subr.mxu1 %v7145_v0  ;;  %6069 = vmatpush3.msra.mxu0 %v7385_v41 }
  0x95   :  { %6076 = vmatpush3.msra.mxu1 %v7300_v4  ;;  %6070 = vmatprep.mubr.msk.f32.mxu0 %vm7146_vm0, %v7145_v0 }
  0x96   :  { %6077 = vmatprep.subr.mxu1 %v7145_v0  ;;  %6081 = vmatprep.mubr.msk.f32.mxu1 %vm7146_vm0, %v7145_v0 }
  0x97   :  { %6078 = vmatpush3.msra.mxu1 %v7310_v7  ;;  %6084 = vmatprep.subr.mxu0 %v7145_v0 }
  0x98   :  { %6079 = vmatprep.subr.mxu1 %v7145_v0 }
  0x99   :  { %6080 = vmatpush3.msra.mxu1 %v7315_v8 }
  0x9a   :  { %6095 = vmatprep.subr.mxu1 %v7145_v0 }
 0x147   :  { %v7325_v9 = vpop.f32.mrf.mxu0  ;;  %v458_v13 = vpop.f32.mrf.mxu1 }
 0x148   :  { %v355_v53 = vadd.f32 %v7325_v9, %v7327_v10 }
 0x149   :  { %v349_v11 = vpop.f32.mrf.mxu0  ;;  %v6050_v15 = vpop.f32.mrf.mxu1 }
 0x14a   :  { %v350_v12 = vadd.f32 %v7327_v10, %v349_v11 }
 0x14b   :  { %v7429_v47 = vpop.f32.mrf.mxu0 }
 0x14c   :  { %v462_v14 = vadd.f32 %v458_v13, %v350_v12 }
 0x14d   :  { %v7431_v48 = vpop.f32.mrf.mxu0 }
 0x14e   :  { %470 = vrot.lane.b32.xlu0 %v462_v14, %s7147_s2  ;;  %v5636_v16 = vmul.f32 -1.442695, %v462_v14 }
 0x14f   :  { %v7433_v49 = vpop.f32.mrf.mxu0 }
 0x150   :  { %6693 = vpow2.f32 %v5636_v16 }
 0x151   :  { %v7435_v50 = vpop.f32.mrf.mxu0 }
 0x152   :  { %v557_v44 = vpop.f32.mrf.mxu1 }
 0x153   :  { %v7437_v51 = vpop.f32.mrf.mxu0 }
 0x154   :  { %v6061_v45 = vpop.f32.mrf.mxu1 }
 0x155   :  { %v7439_v52 = vpop.f32.mrf.mxu0 }
 0x15d   :  { %v6694_v17 = vpop.eup %6693 }
 0x15e   :  { %v466_v18 = vadd.f32 1.0, %v6694_v17 }
 0x160   :  { %6695 = vrcp.f32 %v466_v18 }
 0x16d   :  { %v6696_v19 = vpop.eup %6695 }
 0x1c0   :  { %v471_v20 = vpop.permute.xlu0 %470 }
 0x1c1   :  { %v473_v21 = vmul.f32 %v6696_v19, %v471_v20 }
 0x1c3   :  { %475 = vrot.lane.b32.xlu0 %v473_v21, %s7148_s23 }
 0x235   :  { %v476_v22 = vpop.permute.xlu0 %475 }
 0x236   :  { %v478_v23 = vadd.f32 %v476_v22, %v462_v14 }
 0x238   :  { %6697 = vtanh.f32 %v478_v23 }
 0x245   :  { %v6698_v24 = vpop.eup %6697 }
 0x246   :  { %v480_v25 = vsub.f32 0.0, %v6698_v24 }
 0x248   :  { %482 = vrot.lane.b32.xlu1 %v480_v25, %s7149_s24 }
 0x2ba   :  { %v483_v39 = vpop.permute.xlu1 %482 }
 0x2bb   :  { %v485_v40 = vmul.f32 %v6696_v19, %v483_v39 }
 0x2bd   :  { %487 = vrot.lane.b32.xlu1 %v485_v40, %s7147_s2 }
 0x32f   :  { %v488_v42 = vpop.permute.xlu1 %487 }
 0x330   :  { %v7403_v43 = vadd.f32 %v6698_v24, %v488_v42 }
 0x332   :  { %562 = vrot.lane.b32.xlu0 %v7403_v43, %s7148_s23 }
 0x3a4   :  { %v563_v46 = vpop.permute.xlu0 %562 }
 0x3a5   :  { %6071 = vmatmul.mubr.msk.f32.vlgmr.msra.gmra.mxu0 %vm388_vm2, %v563_v46  ;;  %6082 = vmatmul.mubr.msk.f32.vlgmr.msra.gmra.mxu1 %vm388_vm2, %v563_v46 }
 0x3a6   :  { %6096 = vmatpush3.msra.mxu1 %v7333_v26  ;;  %6085 = vmatpush3.msra.mxu0 %v7338_v28 }
 0x3a7   :  { %6097 = vmatprep.subr.mxu1 %v7145_v0  ;;  %6086 = vmatprep.subr.mxu0 %v7145_v0 }
 0x3a8   :  { %6098 = vmatpush3.msra.mxu1 %v7347_v31  ;;  %6087 = vmatpush3.msra.mxu0 %v7345_v30 }
 0x3a9   :  { %6099 = vmatprep.subr.mxu1 %v7145_v0  ;;  %6088 = vmatprep.subr.mxu0 %v7145_v0 }
 0x3aa   :  { %6100 = vmatpush3.msra.mxu1 %v7367_v36  ;;  %6089 = vmatpush3.msra.mxu0 %v7356_v33 }
 0x3ab   :  { %6101 = vmatprep.subr.mxu1 %v7145_v0  ;;  %6090 = vmatprep.subr.mxu0 %v7145_v0 }
 0x3ac   :  { %6102 = vmatpush3.msra.mxu1 %v7385_v41  ;;  %6103 = vmatprep.mubr.msk.f32.mxu1 %vm7146_vm0, %v7145_v0 }
 0x3ad   :  { %6091 = vmatpush3.msra.mxu0 %v7365_v35  ;;  %6092 = vmatprep.mubr.msk.f32.mxu0 %vm7146_vm0, %v7145_v0 }
 0x3ae   :  { %6106 = vmatprep.subr.mxu0 %v7145_v0  ;;  %6117 = vmatprep.subr.mxu1 %v7145_v0 }
 0x465   :  { %v632_v55 = vpop.f32.mrf.mxu0  ;;  %v731_v56 = vpop.f32.mrf.mxu1 }
 0x466   :  { %v633_v57 = vadd.f32 %v632_v55, %v557_v44  ;;  %v735_v58 = vadd.f32 %v731_v56, %v355_v53  ;;  %v360_v55 = vadd.f32 %v7327_v10, %v7431_v48 }
 0x467   :  { %v6072_v59 = vpop.f32.mrf.mxu0  ;;  %v6083_v60 = vpop.f32.mrf.mxu1 }
 0x468   :  { %v636_v61 = vadd.f32 %v7443_v54, %v633_v57  ;;  %743 = vrot.lane.b32.xlu0 %v735_v58, %s7147_s2  ;;  %v5640_v62 = vmul.f32 -1.442695, %v735_v58 }
 0x46a   :  { %644 = vrot.lane.b32.xlu1 %v636_v61, %s7147_s2  ;;  %v5638_v63 = vmul.f32 -1.442695, %v636_v61  ;;  %6699 = vpow2.f32 %v5640_v62 }
 0x46c   :  { %6701 = vpow2.f32 %v5638_v63 }
 0x477   :  { %v6700_v1 = vpop.eup %6699 }
 0x478   :  { %v739_v5 = vadd.f32 1.0, %v6700_v1 }
 0x479   :  { %v6702_v3 = vpop.eup %6701 }
 0x47a   :  { %v640_v6 = vadd.f32 1.0, %v6702_v3  ;;  %6703 = vrcp.f32 %v739_v5 }
 0x47c   :  { %6705 = vrcp.f32 %v640_v6 }
 0x487   :  { %v6704_v9 = vpop.eup %6703 }
 0x489   :  { %v6706_v13 = vpop.eup %6705 }
 0x4da   :  { %v744_v11 = vpop.permute.xlu0 %743 }
 0x4db   :  { %v746_v12 = vmul.f32 %v6704_v9, %v744_v11 }
 0x4dc   :  { %v645_v14 = vpop.permute.xlu1 %644 }
 0x4dd   :  { %v647_v15 = vmul.f32 %v6706_v13, %v645_v14  ;;  %748 = vrot.lane.b32.xlu0 %v746_v12, %s7148_s23 }
 0x4df   :  { %649 = vrot.lane.b32.xlu1 %v647_v15, %s7148_s23 }
 0x54f   :  { %v749_v16 = vpop.permute.xlu0 %748 }
 0x550   :  { %v751_v17 = vadd.f32 %v749_v16, %v735_v58 }
 0x551   :  { %v650_v18 = vpop.permute.xlu1 %649 }
 0x552   :  { %6707 = vtanh.f32 %v751_v17  ;;  %v652_v19 = vadd.f32 %v650_v18, %v636_v61 }
 0x554   :  { %6709 = vtanh.f32 %v652_v19 }
 0x55f   :  { %v6708_v20 = vpop.eup %6707 }
 0x560   :  { %v753_v21 = vsub.f32 %v7403_v43, %v6708_v20 }
 0x561   :  { %v6710_v22 = vpop.eup %6709 }
 0x562   :  { %755 = vrot.lane.b32.xlu0 %v753_v21, %s7149_s24  ;;  %v654_v23 = vsub.f32 0.0, %v6710_v22 }
 0x564   :  { %656 = vrot.lane.b32.xlu1 %v654_v23, %s7149_s24 }
 0x5d4   :  { %v756_v24 = vpop.permute.xlu0 %755 }
 0x5d5   :  { %v758_v25 = vmul.f32 %v6704_v9, %v756_v24 }
 0x5d6   :  { %v657_v27 = vpop.permute.xlu1 %656 }
 0x5d7   :  { %v659_v29 = vmul.f32 %v6706_v13, %v657_v27  ;;  %760 = vrot.lane.b32.xlu0 %v758_v25, %s7147_s2 }
 0x5d9   :  { %661 = vrot.lane.b32.xlu1 %v659_v29, %s7147_s2 }
 0x649   :  { %v761_v32 = vpop.permute.xlu0 %760 }
 0x64a   :  { %v7455_v34 = vadd.f32 %v6708_v20, %v761_v32 }
 0x64b   :  { %v662_v37 = vpop.permute.xlu1 %661 }
 0x64c   :  { %v7457_v38 = vadd.f32 %v6710_v22, %v662_v37  ;;  %840 = vrot.lane.b32.xlu0 %v7455_v34, %s7148_s23 }
 0x64e   :  { %765 = vrot.lane.b32.xlu1 %v7457_v38, %s7148_s23 }
 0x6be   :  { %v841_v39 = vpop.permute.xlu0 %840 }
 0x6bf   :  { %6104 = vmatmul.mubr.msk.f32.vlgmr.msra.gmra.mxu1 %vm388_vm2, %v841_v39 }
 0x6c0   :  { %v766_v40 = vpop.permute.xlu1 %765  ;;  %6118 = vmatpush3.msra.mxu1 %v7338_v28  ;;  %6125 = vmatprep.mubr.msk.f32.mxu1 %vm7146_vm0, %v7145_v0 }
 0x6c1   :  { %6093 = vmatmul.mubr.msk.f32.vlgmr.msra.gmra.mxu0 %vm388_vm2, %v766_v40  ;;  %6119 = vmatprep.subr.mxu1 %v7145_v0  ;;  %v365_v40 = vadd.f32 %v7429_v47, %v7327_v10 }
 0x6c2   :  { %6107 = vmatpush3.msra.mxu0 %v7297_v2  ;;  %6114 = vmatprep.mubr.msk.f32.mxu0 %vm7146_vm0, %v7145_v0 }
 0x6c3   :  { %6108 = vmatprep.subr.mxu0 %v7145_v0  ;;  %6120 = vmatpush3.msra.mxu1 %v7345_v30 }
 0x6c4   :  { %6109 = vmatpush3.msra.mxu0 %v7300_v4  ;;  %6121 = vmatprep.subr.mxu1 %v7145_v0 }
 0x6c5   :  { %6110 = vmatprep.subr.mxu0 %v7145_v0  ;;  %6122 = vmatpush3.msra.mxu1 %v7356_v33 }
 0x6c6   :  { %6111 = vmatpush3.msra.mxu0 %v7310_v7  ;;  %6123 = vmatprep.subr.mxu1 %v7145_v0 }
 0x6c7   :  { %6112 = vmatprep.subr.mxu0 %v7145_v0  ;;  %6124 = vmatpush3.msra.mxu1 %v7365_v35 }
 0x6c8   :  { %6113 = vmatpush3.msra.mxu0 %v7315_v8  ;;  %6139 = vmatprep.subr.mxu1 %v7145_v0 }
 0x6c9   :  { %6115 = vmatmul.mubr.msk.f32.vlgmr.msra.gmra.mxu0 %vm388_vm2, %v841_v39  ;;  %6128 = vmatprep.subr.mxu0 %v7145_v0 }
 0x6ca   :  { %6129 = vmatpush3.msra.mxu0 %v7333_v26  ;;  %6136 = vmatprep.mubr.msk.f32.mxu0 %vm7146_vm0, %v7145_v0 }
 0x6cb   :  { %6130 = vmatprep.subr.mxu0 %v7145_v0 }
 0x6cc   :  { %6131 = vmatpush3.msra.mxu0 %v7347_v31 }
 0x6cd   :  { %6132 = vmatprep.subr.mxu0 %v7145_v0 }
 0x6ce   :  { %6133 = vmatpush3.msra.mxu0 %v7367_v36 }
 0x6cf   :  { %6134 = vmatprep.subr.mxu0 %v7145_v0 }
 0x6d0   :  { %6135 = vmatpush3.msra.mxu0 %v7385_v41 }
 0x6d1   :  { %6150 = vmatprep.subr.mxu0 %v7145_v0 }
 0x77f   :  { %v910_v42 = vpop.f32.mrf.mxu1 }
 0x781   :  { %v835_v43 = vpop.f32.mrf.mxu0  ;;  %v6105_v44 = vpop.f32.mrf.mxu1 }
 0x782   :  { %v911_v45 = vadd.f32 %v910_v42, %v835_v43 }
 0x783   :  { %v6094_v46 = vpop.f32.mrf.mxu0 }
 0x784   :  { %v914_v53 = vadd.f32 %v7443_v54, %v911_v45 }
 0x786   :  { %922 = vrot.lane.b32.xlu1 %v914_v53, %s7147_s2  ;;  %v5643_v59 = vmul.f32 -1.442695, %v914_v53 }
 0x788   :  { %6711 = vpow2.f32 %v5643_v59 }
 0x789   :  { %v1009_v56 = vpop.f32.mrf.mxu0 }
 0x78a   :  { %v1013_v57 = vadd.f32 %v1009_v56, %v360_v55 }
 0x78b   :  { %v6116_v58 = vpop.f32.mrf.mxu0 }
 0x78c   :  { %1021 = vrot.lane.b32.xlu0 %v1013_v57, %s7147_s2  ;;  %v5645_v60 = vmul.f32 -1.442695, %v1013_v57 }
 0x78e   :  { %6713 = vpow2.f32 %v5645_v60 }
 0x795   :  { %v6712_v61 = vpop.eup %6711 }
 0x796   :  { %v918_v62 = vadd.f32 1.0, %v6712_v61 }
 0x798   :  { %6715 = vrcp.f32 %v918_v62 }
 0x79b   :  { %v6714_v63 = vpop.eup %6713 }
 0x79c   :  { %v1017_v1 = vadd.f32 1.0, %v6714_v63 }
 0x79e   :  { %6717 = vrcp.f32 %v1017_v1 }
 0x7a5   :  { %v6716_v3 = vpop.eup %6715 }
 0x7ab   :  { %v6718_v48 = vpop.eup %6717 }
 0x7f8   :  { %v923_v5 = vpop.permute.xlu1 %922 }
 0x7f9   :  { %v925_v6 = vmul.f32 %v6716_v3, %v923_v5 }
 0x7fb   :  { %927 = vrot.lane.b32.xlu1 %v925_v6, %s7148_s23 }
 0x7fe   :  { %v1022_v9 = vpop.permute.xlu0 %1021 }
 0x7ff   :  { %v1024_v11 = vmul.f32 %v6718_v48, %v1022_v9 }
 0x801   :  { %1026 = vrot.lane.b32.xlu0 %v1024_v11, %s7148_s23 }
 0x86d   :  { %v928_v12 = vpop.permute.xlu1 %927 }
 0x86e   :  { %v930_v13 = vadd.f32 %v928_v12, %v914_v53 }
 0x870   :  { %6719 = vtanh.f32 %v930_v13 }
 0x873   :  { %v1027_v14 = vpop.permute.xlu0 %1026 }
 0x874   :  { %v1029_v15 = vadd.f32 %v1027_v14, %v1013_v57 }
 0x876   :  { %6721 = vtanh.f32 %v1029_v15 }
 0x87d   :  { %v6720_v16 = vpop.eup %6719 }
 0x87e   :  { %v932_v17 = vsub.f32 %v7457_v38, %v6720_v16 }
 0x880   :  { %934 = vrot.lane.b32.xlu1 %v932_v17, %s7149_s24 }
 0x883   :  { %v6722_v18 = vpop.eup %6721 }
 0x884   :  { %v1031_v19 = vsub.f32 %v7455_v34, %v6722_v18 }
 0x886   :  { %1033 = vrot.lane.b32.xlu0 %v1031_v19, %s7149_s24 }
 0x8f2   :  { %v935_v20 = vpop.permute.xlu1 %934 }
 0x8f3   :  { %v937_v21 = vmul.f32 %v6716_v3, %v935_v20 }
 0x8f5   :  { %939 = vrot.lane.b32.xlu1 %v937_v21, %s7147_s2 }
 0x8f8   :  { %v1034_v22 = vpop.permute.xlu0 %1033 }
 0x8f9   :  { %v1036_v23 = vmul.f32 %v6718_v48, %v1034_v22 }
 0x8fb   :  { %1038 = vrot.lane.b32.xlu0 %v1036_v23, %s7147_s2 }
 0x967   :  { %v940_v24 = vpop.permute.xlu1 %939 }
 0x968   :  { %v7509_v25 = vadd.f32 %v6720_v16, %v940_v24 }
 0x96a   :  { %1043 = vrot.lane.b32.xlu1 %v7509_v25, %s7148_s23 }
 0x96d   :  { %v1039_v27 = vpop.permute.xlu0 %1038 }
 0x96e   :  { %v7513_v29 = vadd.f32 %v6722_v18, %v1039_v27 }
 0x970   :  { %1118 = vrot.lane.b32.xlu0 %v7513_v29, %s7148_s23 }
 0x9dc   :  { %v1044_v32 = vpop.permute.xlu1 %1043 }
 0x9dd   :  { %6126 = vmatmul.mubr.msk.f32.vlgmr.msra.gmra.mxu1 %vm388_vm2, %v1044_v32 }
 0x9de   :  { %6140 = vmatpush3.msra.mxu1 %v7297_v2  ;;  %6147 = vmatprep.mubr.msk.f32.mxu1 %vm7146_vm0, %v7145_v0 }
 0x9df   :  { %6141 = vmatprep.subr.mxu1 %v7145_v0 }
 0x9e0   :  { %6142 = vmatpush3.msra.mxu1 %v7300_v4 }
 0x9e1   :  { %6143 = vmatprep.subr.mxu1 %v7145_v0 }
 0x9e2   :  { %v1119_v34 = vpop.permute.xlu0 %1118  ;;  %6144 = vmatpush3.msra.mxu1 %v7310_v7 }
 0x9e3   :  { %6137 = vmatmul.mubr.msk.f32.vlgmr.msra.gmra.mxu0 %vm388_vm2, %v1119_v34  ;;  %6145 = vmatprep.subr.mxu1 %v7145_v0 }
 0x9e4   :  { %6146 = vmatpush3.msra.mxu1 %v7315_v8  ;;  %6151 = vmatpush3.msra.mxu0 %v7338_v28 }
 0x9e5   :  { %6148 = vmatmul.mubr.msk.f32.vlgmr.msra.gmra.mxu1 %vm388_vm2, %v1119_v34  ;;  %6161 = vmatprep.subr.mxu1 %v7145_v0 }
 0x9e6   :  { %6152 = vmatprep.subr.mxu0 %v7145_v0  ;;  %6162 = vmatpush3.msra.mxu1 %v7333_v26 }
 0x9e7   :  { %6153 = vmatpush3.msra.mxu0 %v7345_v30  ;;  %6163 = vmatprep.subr.mxu1 %v7145_v0 }
 0x9e8   :  { %6154 = vmatprep.subr.mxu0 %v7145_v0  ;;  %6164 = vmatpush3.msra.mxu1 %v7347_v31 }
 0x9e9   :  { %6155 = vmatpush3.msra.mxu0 %v7356_v33  ;;  %6165 = vmatprep.subr.mxu1 %v7145_v0 }
 0x9ea   :  { %6156 = vmatprep.subr.mxu0 %v7145_v0  ;;  %6166 = vmatpush3.msra.mxu1 %v7367_v36 }
 0x9eb   :  { %6157 = vmatpush3.msra.mxu0 %v7365_v35  ;;  %6167 = vmatprep.subr.mxu1 %v7145_v0 }
 0x9ec   :  { %6158 = vmatprep.mubr.msk.f32.mxu0 %vm7146_vm0, %v7145_v0  ;;  %6168 = vmatpush3.msra.mxu1 %v7385_v41 }
 0x9ed   :  { %6169 = vmatprep.mubr.msk.f32.mxu1 %vm7146_vm0, %v7145_v0  ;;  %6172 = vmatprep.subr.mxu0 %v7145_v0 }
 0x9ee   :  { %6183 = vmatprep.subr.mxu1 %v7145_v0 }
 0xa9d   :  { %v1113_v37 = vpop.f32.mrf.mxu1 }
 0xa9f   :  { %v6127_v38 = vpop.f32.mrf.mxu1 }
 0xaa0   :  { %v370_v38 = vadd.f32 %v7327_v10, %v7435_v50 }
 0xaa3   :  { %v1188_v39 = vpop.f32.mrf.mxu0 }
 0xaa4   :  { %v1189_v42 = vadd.f32 %v1188_v39, %v1113_v37 }
 0xaa5   :  { %v6138_v43 = vpop.f32.mrf.mxu0  ;;  %v1287_v44 = vpop.f32.mrf.mxu1 }
 0xaa6   :  { %v1192_v45 = vadd.f32 %v7443_v54, %v1189_v42  ;;  %v1291_v46 = vadd.f32 %v1287_v44, %v365_v40 }
 0xaa7   :  { %v6149_v53 = vpop.f32.mrf.mxu1 }
 0xaa8   :  { %1200 = vrot.lane.b32.xlu1 %v1192_v45, %s7147_s2  ;;  %1299 = vrot.lane.b32.xlu0 %v1291_v46, %s7147_s2  ;;  %v5648_v55 = vmul.f32 -1.442695, %v1192_v45  ;;  %v5650_v56 = vmul.f32 -1.442695, %v1291_v46 }
 0xaaa   :  { %6723 = vpow2.f32 %v5648_v55 }
 0xaab   :  { %6725 = vpow2.f32 %v5650_v56 }
 0xab7   :  { %v6724_v57 = vpop.eup %6723 }
 0xab8   :  { %v6726_v58 = vpop.eup %6725  ;;  %v1196_v59 = vadd.f32 1.0, %v6724_v57 }
 0xab9   :  { %v1295_v60 = vadd.f32 1.0, %v6726_v58 }
 0xaba   :  { %6727 = vrcp.f32 %v1196_v59 }
 0xabb   :  { %6729 = vrcp.f32 %v1295_v60 }
 0xac7   :  { %v6728_v47 = vpop.eup %6727 }
 0xac8   :  { %v6730_v61 = vpop.eup %6729 }
 0xb1a   :  { %v1201_v62 = vpop.permute.xlu1 %1200  ;;  %v1300_v63 = vpop.permute.xlu0 %1299 }
 0xb1b   :  { %v1203_v1 = vmul.f32 %v6728_v47, %v1201_v62  ;;  %v1302_v3 = vmul.f32 %v6730_v61, %v1300_v63 }
 0xb1d   :  { %1205 = vrot.lane.b32.xlu1 %v1203_v1, %s7148_s23  ;;  %1304 = vrot.lane.b32.xlu0 %v1302_v3, %s7148_s23 }
 0xb8f   :  { %v1206_v5 = vpop.permute.xlu1 %1205  ;;  %v1305_v6 = vpop.permute.xlu0 %1304 }
 0xb90   :  { %v1208_v48 = vadd.f32 %v1206_v5, %v1192_v45  ;;  %v1307_v9 = vadd.f32 %v1305_v6, %v1291_v46 }
 0xb92   :  { %6731 = vtanh.f32 %v1208_v48 }
 0xb93   :  { %6733 = vtanh.f32 %v1307_v9 }
 0xb9f   :  { %v6732_v11 = vpop.eup %6731 }
 0xba0   :  { %v6734_v12 = vpop.eup %6733  ;;  %v1210_v13 = vsub.f32 %v7509_v25, %v6732_v11 }
 0xba1   :  { %v1309_v14 = vsub.f32 %v7513_v29, %v6734_v12 }
 0xba2   :  { %1212 = vrot.lane.b32.xlu1 %v1210_v13, %s7149_s24 }
 0xba3   :  { %1311 = vrot.lane.b32.xlu0 %v1309_v14, %s7149_s24 }
 0xc14   :  { %v1213_v15 = vpop.permute.xlu1 %1212 }
 0xc15   :  { %v1215_v16 = vmul.f32 %v6728_v47, %v1213_v15  ;;  %v1312_v17 = vpop.permute.xlu0 %1311 }
 0xc16   :  { %v1314_v18 = vmul.f32 %v6730_v61, %v1312_v17 }
 0xc17   :  { %1217 = vrot.lane.b32.xlu1 %v1215_v16, %s7147_s2 }
 0xc18   :  { %1316 = vrot.lane.b32.xlu0 %v1314_v18, %s7147_s2 }
 0xc89   :  { %v1218_v19 = vpop.permute.xlu1 %1217 }
 0xc8a   :  { %v7563_v20 = vadd.f32 %v6732_v11, %v1218_v19  ;;  %v1317_v21 = vpop.permute.xlu0 %1316  ;;  %v375_v19 = vadd.f32 %v7433_v49, %v7327_v10 }
 0xc8b   :  { %v7565_v22 = vadd.f32 %v6734_v12, %v1317_v21 }
 0xc8c   :  { %1321 = vrot.lane.b32.xlu1 %v7563_v20, %s7148_s23 }
 0xc8d   :  { %1396 = vrot.lane.b32.xlu0 %v7565_v22, %s7148_s23 }
 0xcfe   :  { %v1322_v23 = vpop.permute.xlu1 %1321 }
 0xcff   :  { %v1397_v24 = vpop.permute.xlu0 %1396  ;;  %6159 = vmatmul.mubr.msk.f32.vlgmr.msra.gmra.mxu0 %vm388_vm2, %v1322_v23 }
 0xd00   :  { %6170 = vmatmul.mubr.msk.f32.vlgmr.msra.gmra.mxu1 %vm388_vm2, %v1397_v24  ;;  %6173 = vmatpush3.msra.mxu0 %v7297_v2 }
 0xd01   :  { %6174 = vmatprep.subr.mxu0 %v7145_v0  ;;  %6180 = vmatprep.mubr.msk.f32.mxu0 %vm7146_vm0, %v7145_v0 }
 0xd02   :  { %6175 = vmatpush3.msra.mxu0 %v7300_v4  ;;  %6184 = vmatpush3.msra.mxu1 %v7338_v28 }
 0xd03   :  { %6176 = vmatprep.subr.mxu0 %v7145_v0  ;;  %6185 = vmatprep.subr.mxu1 %v7145_v0 }
 0xd04   :  { %6177 = vmatpush3.msra.mxu0 %v7310_v7  ;;  %6186 = vmatpush3.msra.mxu1 %v7345_v30 }
 0xd05   :  { %6178 = vmatprep.subr.mxu0 %v7145_v0  ;;  %6187 = vmatprep.subr.mxu1 %v7145_v0 }
 0xd06   :  { %6179 = vmatpush3.msra.mxu0 %v7315_v8  ;;  %6188 = vmatpush3.msra.mxu1 %v7356_v33 }
 0xd07   :  { %6181 = vmatmul.mubr.msk.f32.vlgmr.msra.gmra.mxu0 %vm388_vm2, %v1397_v24  ;;  %6189 = vmatprep.subr.mxu1 %v7145_v0 }
 0xd08   :  { %6194 = vmatprep.subr.mxu0 %v7145_v0  ;;  %6190 = vmatpush3.msra.mxu1 %v7365_v35 }
 0xd09   :  { %6195 = vmatpush3.msra.mxu0 %v7333_v26  ;;  %6191 = vmatprep.mubr.msk.f32.mxu1 %vm7146_vm0, %v7145_v0 }
 0xd0a   :  { %6196 = vmatprep.subr.mxu0 %v7145_v0  ;;  %6205 = vmatprep.subr.mxu1 %v7145_v0 }
 0xd0b   :  { %6197 = vmatpush3.msra.mxu0 %v7347_v31  ;;  %6202 = vmatprep.mubr.msk.f32.mxu0 %vm7146_vm0, %v7145_v0 }
 0xd0c   :  { %6198 = vmatprep.subr.mxu0 %v7145_v0 }
 0xd0d   :  { %6199 = vmatpush3.msra.mxu0 %v7367_v36 }
 0xd0e   :  { %6200 = vmatprep.subr.mxu0 %v7145_v0 }
 0xd0f   :  { %6201 = vmatpush3.msra.mxu0 %v7385_v41 }
 0xd10   :  { %6216 = vmatprep.subr.mxu0 %v7145_v0 }
 0xdbf   :  { %v1391_v25 = vpop.f32.mrf.mxu0 }
 0xdc0   :  { %v1466_v27 = vpop.f32.mrf.mxu1 }
 0xdc1   :  { %v1467_v29 = vadd.f32 %v1466_v27, %v1391_v25  ;;  %v6160_v32 = vpop.f32.mrf.mxu0 }
 0xdc2   :  { %v6171_v34 = vpop.f32.mrf.mxu1 }
 0xdc3   :  { %v1470_v37 = vadd.f32 %v7443_v54, %v1467_v29 }
 0xdc5   :  { %1478 = vrot.lane.b32.xlu1 %v1470_v37, %s7147_s2  ;;  %v5653_v43 = vmul.f32 -1.442695, %v1470_v37 }
 0xdc7   :  { %v1565_v39 = vpop.f32.mrf.mxu0  ;;  %6735 = vpow2.f32 %v5653_v43 }
 0xdc8   :  { %v1569_v40 = vadd.f32 %v1565_v39, %v370_v38 }
 0xdc9   :  { %v6182_v42 = vpop.f32.mrf.mxu0 }
 0xdca   :  { %1577 = vrot.lane.b32.xlu0 %v1569_v40, %s7147_s2  ;;  %v5655_v44 = vmul.f32 -1.442695, %v1569_v40 }
 0xdcc   :  { %6737 = vpow2.f32 %v5655_v44 }
 0xdd4   :  { %v6736_v45 = vpop.eup %6735 }
 0xdd5   :  { %v1474_v46 = vadd.f32 1.0, %v6736_v45 }
 0xdd7   :  { %6739 = vrcp.f32 %v1474_v46 }
 0xdd9   :  { %v6738_v53 = vpop.eup %6737 }
 0xdda   :  { %v1573_v55 = vadd.f32 1.0, %v6738_v53 }
 0xddc   :  { %6741 = vrcp.f32 %v1573_v55 }
 0xde4   :  { %v6740_v56 = vpop.eup %6739 }
 0xde9   :  { %v6742_v50 = vpop.eup %6741 }
 0xe37   :  { %v1479_v57 = vpop.permute.xlu1 %1478 }
 0xe38   :  { %v1481_v58 = vmul.f32 %v6740_v56, %v1479_v57 }
 0xe3a   :  { %1483 = vrot.lane.b32.xlu1 %v1481_v58, %s7148_s23 }
 0xe3c   :  { %v1578_v59 = vpop.permute.xlu0 %1577 }
 0xe3d   :  { %v1580_v60 = vmul.f32 %v6742_v50, %v1578_v59 }
 0xe3f   :  { %1582 = vrot.lane.b32.xlu0 %v1580_v60, %s7148_s23 }
 0xeac   :  { %v1484_v47 = vpop.permute.xlu1 %1483 }
 0xead   :  { %v1486_v61 = vadd.f32 %v1484_v47, %v1470_v37 }
 0xeaf   :  { %6743 = vtanh.f32 %v1486_v61 }
 0xeb1   :  { %v1583_v62 = vpop.permute.xlu0 %1582 }
 0xeb2   :  { %v1585_v63 = vadd.f32 %v1583_v62, %v1569_v40 }
 0xeb4   :  { %6745 = vtanh.f32 %v1585_v63 }
 0xebc   :  { %v6744_v1 = vpop.eup %6743 }
 0xebd   :  { %v1488_v3 = vsub.f32 %v7563_v20, %v6744_v1 }
 0xebf   :  { %1490 = vrot.lane.b32.xlu1 %v1488_v3, %s7149_s24 }
 0xec1   :  { %v6746_v5 = vpop.eup %6745 }
 0xec2   :  { %v1587_v6 = vsub.f32 %v7565_v22, %v6746_v5 }
 0xec4   :  { %1589 = vrot.lane.b32.xlu0 %v1587_v6, %s7149_s24  ;;  %v7687_v6 = vld [vmem:[#allocation4 + $0x10] sm:$0xff] }
 0xf31   :  { %v1491_v48 = vpop.permute.xlu1 %1490 }
 0xf32   :  { %v1493_v9 = vmul.f32 %v6740_v56, %v1491_v48  ;;  %v7693_v48 = vld [vmem:[#allocation4 + $0x8] sm:$0xff] }
 0xf34   :  { %1495 = vrot.lane.b32.xlu1 %v1493_v9, %s7147_s2  ;;  %v7699_v9 = vld [vmem:[#allocation4] sm:$0xff] }
 0xf36   :  { %v1590_v11 = vpop.permute.xlu0 %1589 }
 0xf37   :  { %v1592_v12 = vmul.f32 %v6742_v50, %v1590_v11  ;;  %v7722_v11 = vld [vmem:[#allocation6] ss:$0 sm:$0xff] }
 0xf39   :  { %1594 = vrot.lane.b32.xlu0 %v1592_v12, %s7147_s2 }
 0xfa6   :  { %v1496_v13 = vpop.permute.xlu1 %1495 }
 0xfa7   :  { %v7617_v14 = vadd.f32 %v6744_v1, %v1496_v13 }
 0xfa9   :  { %1599 = vrot.lane.b32.xlu1 %v7617_v14, %s7148_s23 }
 0xfab   :  { %v1595_v15 = vpop.permute.xlu0 %1594 }
 0xfac   :  { %v7621_v16 = vadd.f32 %v6746_v5, %v1595_v15  ;;  %v7681_v5 = vld [vmem:[#allocation4 + $0x18] sm:$0xff] }
 0xfae   :  { %1674 = vrot.lane.b32.xlu0 %v7621_v16, %s7148_s23 }
0x101b   :  { %v1600_v17 = vpop.permute.xlu1 %1599 }
0x101c   :  { %6192 = vmatmul.mubr.msk.f32.vlgmr.msra.gmra.mxu1 %vm388_vm2, %v1600_v17 }
0x101d   :  { %6206 = vmatpush3.msra.mxu1 %v7297_v2  ;;  %6213 = vmatprep.mubr.msk.f32.mxu1 %vm7146_vm0, %v7145_v0 }
0x101e   :  { %6207 = vmatprep.subr.mxu1 %v7145_v0 }
0x101f   :  { %6208 = vmatpush3.msra.mxu1 %v7300_v4 }
0x1020   :  { %6209 = vmatprep.subr.mxu1 %v7145_v0  ;;  %v1675_v18 = vpop.permute.xlu0 %1674 }
0x1021   :  { %6210 = vmatpush3.msra.mxu1 %v7310_v7  ;;  %6203 = vmatmul.mubr.msk.f32.vlgmr.msra.gmra.mxu0 %vm388_vm2, %v1675_v18 }
0x1022   :  { %6211 = vmatprep.subr.mxu1 %v7145_v0  ;;  %6217 = vmatpush3.msra.mxu0 %v7338_v28 }
0x1023   :  { %6212 = vmatpush3.msra.mxu1 %v7315_v8  ;;  %6218 = vmatprep.subr.mxu0 %v7145_v0 }
0x1024   :  { %6214 = vmatmul.mubr.msk.f32.vlgmr.msra.gmra.mxu1 %vm388_vm2, %v1675_v18  ;;  %6227 = vmatprep.subr.mxu1 %v7145_v0 }
0x1025   :  { %6228 = vmatpush3.msra.mxu1 %v7333_v26  ;;  %6219 = vmatpush3.msra.mxu0 %v7345_v30 }
0x1026   :  { %6229 = vmatprep.subr.mxu1 %v7145_v0  ;;  %6220 = vmatprep.subr.mxu0 %v7145_v0 }
0x1027   :  { %6230 = vmatpush3.msra.mxu1 %v7347_v31  ;;  %6221 = vmatpush3.msra.mxu0 %v7356_v33 }
0x1028   :  { %6231 = vmatprep.subr.mxu1 %v7145_v0  ;;  %6222 = vmatprep.subr.mxu0 %v7145_v0 }
0x1029   :  { %6232 = vmatpush3.msra.mxu1 %v7367_v36  ;;  %6223 = vmatpush3.msra.mxu0 %v7365_v35 }
0x102a   :  { %6233 = vmatprep.subr.mxu1 %v7145_v0  ;;  %6224 = vmatprep.mubr.msk.f32.mxu0 %vm7146_vm0, %v7145_v0 }
0x102b   :  { %6234 = vmatpush3.msra.mxu1 %v7385_v41  ;;  %6235 = vmatprep.mubr.msk.f32.mxu1 %vm7146_vm0, %v7145_v0 }
0x102c   :  { %6238 = vmatprep.subr.mxu0 %v7145_v0  ;;  %6249 = vmatprep.subr.mxu1 %v7145_v0 }
0x10dc   :  { %v1669_v2 = vpop.f32.mrf.mxu1 }
0x10de   :  { %v6193_v4 = vpop.f32.mrf.mxu1 }
0x10e1   :  { %v1744_v7 = vpop.f32.mrf.mxu0 }
0x10e2   :  { %v1745_v8 = vadd.f32 %v1744_v7, %v1669_v2 }
0x10e3   :  { %v6204_v20 = vpop.f32.mrf.mxu0 }
0x10e4   :  { %v1748_v21 = vadd.f32 %v7443_v54, %v1745_v8  ;;  %v1843_v22 = vpop.f32.mrf.mxu1 }
0x10e5   :  { %v1847_v23 = vadd.f32 %v1843_v22, %v375_v19 }
0x10e6   :  { %v6215_v24 = vpop.f32.mrf.mxu1  ;;  %1756 = vrot.lane.b32.xlu1 %v1748_v21, %s7147_s2  ;;  %v5658_v25 = vmul.f32 -1.442695, %v1748_v21 }
0x10e7   :  { %1855 = vrot.lane.b32.xlu0 %v1847_v23, %s7147_s2  ;;  %v5660_v27 = vmul.f32 -1.442695, %v1847_v23 }
0x10e8   :  { %6747 = vpow2.f32 %v5658_v25 }
0x10e9   :  { %6749 = vpow2.f32 %v5660_v27 }
0x10f5   :  { %v6748_v29 = vpop.eup %6747 }
0x10f6   :  { %v6750_v32 = vpop.eup %6749  ;;  %v1752_v34 = vadd.f32 1.0, %v6748_v29 }
0x10f7   :  { %v1851_v37 = vadd.f32 1.0, %v6750_v32 }
0x10f8   :  { %6751 = vrcp.f32 %v1752_v34 }
0x10f9   :  { %6753 = vrcp.f32 %v1851_v37 }
0x1105   :  { %v6752_v10 = vpop.eup %6751 }
0x1106   :  { %v6754_v38 = vpop.eup %6753 }
0x1158   :  { %v1757_v49 = vpop.permute.xlu1 %1756 }
0x1159   :  { %v1759_v39 = vmul.f32 %v6752_v10, %v1757_v49  ;;  %v1856_v40 = vpop.permute.xlu0 %1855 }
0x115a   :  { %v1858_v42 = vmul.f32 %v6754_v38, %v1856_v40 }
0x115b   :  { %1761 = vrot.lane.b32.xlu1 %v1759_v39, %s7148_s23 }
0x115c   :  { %1860 = vrot.lane.b32.xlu0 %v1858_v42, %s7148_s23 }
0x11cd   :  { %v1762_v43 = vpop.permute.xlu1 %1761 }
0x11ce   :  { %v1764_v44 = vadd.f32 %v1762_v43, %v1748_v21  ;;  %v1861_v45 = vpop.permute.xlu0 %1860 }
0x11cf   :  { %v1863_v46 = vadd.f32 %v1861_v45, %v1847_v23  ;;  %v6895_v45 = vld [vmem:[#allocation7 + $0x18] sm:$0xff] }
0x11d0   :  { %6755 = vtanh.f32 %v1764_v44  ;;  %v6894_v44 = vld [vmem:[#allocation9 + $0x18] sm:$0xff] }
0x11d1   :  { %6757 = vtanh.f32 %v1863_v46  ;;  %v6896_v46 = vld [vmem:[#allocation9 + $0x10] sm:$0xff] }
0x11dd   :  { %v6756_v53 = vpop.eup %6755 }
0x11de   :  { %v6758_v55 = vpop.eup %6757  ;;  %v1766_v56 = vsub.f32 %v7617_v14, %v6756_v53 }
0x11df   :  { %v1865_v57 = vsub.f32 %v7621_v16, %v6758_v55 }
0x11e0   :  { %1768 = vrot.lane.b32.xlu1 %v1766_v56, %s7149_s24  ;;  %v6899_v56 = vld [vmem:[#allocation7 + $0x8] sm:$0xff] }
0x11e1   :  { %1867 = vrot.lane.b32.xlu0 %v1865_v57, %s7149_s24  ;;  %v6900_v57 = vld [vmem:[#allocation9] sm:$0xff] }
0x1252   :  { %v1769_v58 = vpop.permute.xlu1 %1768 }
0x1253   :  { %v1771_v50 = vmul.f32 %v6752_v10, %v1769_v58  ;;  %v1868_v59 = vpop.permute.xlu0 %1867  ;;  %v6901_v58 = vld [vmem:[#allocation7] sm:$0xff] }
0x1254   :  { %v1870_v60 = vmul.f32 %v6754_v38, %v1868_v59 }
0x1255   :  { %1773 = vrot.lane.b32.xlu1 %v1771_v50, %s7147_s2 }
0x1256   :  { %1872 = vrot.lane.b32.xlu0 %v1870_v60, %s7147_s2 }
0x12c7   :  { %v1774_v47 = vpop.permute.xlu1 %1773 }
0x12c8   :  { %v7671_v61 = vadd.f32 %v6756_v53, %v1774_v47  ;;  %v1873_v62 = vpop.permute.xlu0 %1872  ;;  %v6897_v53 = vld [vmem:[#allocation7 + $0x10] sm:$0xff] }
0x12c9   :  { %v7673_v63 = vadd.f32 %v6758_v55, %v1873_v62  ;;  %v6898_v55 = vld [vmem:[#allocation9 + $0x8] sm:$0xff] }
0x12ca   :  { %1877 = vrot.lane.b32.xlu1 %v7671_v61, %s7148_s23 }
0x12cb   :  { %1952 = vrot.lane.b32.xlu0 %v7673_v63, %s7148_s23 }
0x133c   :  { %v1878_v1 = vpop.permute.xlu1 %1877 }
0x133d   :  { %v1953_v3 = vpop.permute.xlu0 %1952  ;;  %6225 = vmatmul.mubr.msk.f32.vlgmr.msra.gmra.mxu0 %vm388_vm2, %v1878_v1 }
0x133e   :  { %6236 = vmatmul.mubr.msk.f32.vlgmr.msra.gmra.mxu1 %vm388_vm2, %v1953_v3  ;;  %6239 = vmatpush3.msra.mxu0 %v7681_v5 }
0x133f   :  { %6240 = vmatprep.subr.mxu0 %v7145_v0  ;;  %6246 = vmatprep.mubr.msk.f32.mxu0 %vm7146_vm0, %v7145_v0 }
0x1340   :  { %6241 = vmatpush3.msra.mxu0 %v7687_v6  ;;  %6250 = vmatpush3.msra.mxu1 %v7338_v28 }
0x1341   :  { %6242 = vmatprep.subr.mxu0 %v7145_v0  ;;  %6251 = vmatprep.subr.mxu1 %v7145_v0 }
0x1342   :  { %6243 = vmatpush3.msra.mxu0 %v7693_v48  ;;  %6252 = vmatpush3.msra.mxu1 %v7345_v30 }
0x1343   :  { %6244 = vmatprep.subr.mxu0 %v7145_v0  ;;  %6253 = vmatprep.subr.mxu1 %v7145_v0 }
0x1344   :  { %6245 = vmatpush3.msra.mxu0 %v7699_v9  ;;  %6254 = vmatpush3.msra.mxu1 %v7356_v33 }
0x1345   :  { %6247 = vmatmul.mubr.msk.f32.vlgmr.msra.gmra.mxu0 %vm388_vm2, %v1953_v3  ;;  %6255 = vmatprep.subr.mxu1 %v7145_v0 }
0x1346   :  { %6260 = vmatprep.subr.mxu0 %v7145_v0  ;;  %6256 = vmatpush3.msra.mxu1 %v7365_v35 }
0x1347   :  { %6261 = vmatpush3.msra.mxu0 %v7333_v26  ;;  %6257 = vmatprep.mubr.msk.f32.mxu1 %vm7146_vm0, %v7145_v0 }
0x1348   :  { %6262 = vmatprep.subr.mxu0 %v7145_v0  ;;  %6271 = vmatprep.subr.mxu1 %v7145_v0 }
0x1349   :  { %6263 = vmatpush3.msra.mxu0 %v7347_v31  ;;  %6268 = vmatprep.mubr.msk.f32.mxu0 %vm7146_vm0, %v7145_v0 }
0x134a   :  { %6264 = vmatprep.subr.mxu0 %v7145_v0 }
0x134b   :  { %6265 = vmatpush3.msra.mxu0 %v7367_v36  ;;  %v380_v36 = vadd.f32 %v7722_v11, %v7439_v52 }
0x134c   :  { %6266 = vmatprep.subr.mxu0 %v7145_v0 }
0x134d   :  { %6267 = vmatpush3.msra.mxu0 %v7385_v41 }
0x134e   :  { %6282 = vmatprep.subr.mxu0 %v7145_v0 }
0x13fd   :  { %v1947_v26 = vpop.f32.mrf.mxu0 }
0x13fe   :  { %v2022_v28 = vpop.f32.mrf.mxu1 }
0x13ff   :  { %v2023_v30 = vadd.f32 %v2022_v28, %v1947_v26  ;;  %v6226_v33 = vpop.f32.mrf.mxu0 }
0x1400   :  { %v6237_v35 = vpop.f32.mrf.mxu1 }
0x1401   :  { %v2026_v31 = vadd.f32 %v7443_v54, %v2023_v30 }
0x1403   :  { %2034 = vrot.lane.b32.xlu1 %v2026_v31, %s7147_s2  ;;  %v5663_v41 = vmul.f32 -1.442695, %v2026_v31 }
0x1405   :  { %v2121_v12 = vpop.f32.mrf.mxu0  ;;  %6759 = vpow2.f32 %v5663_v41 }
0x1406   :  { %v2125_v13 = vadd.f32 %v2121_v12, %v380_v36 }
0x1407   :  { %v6248_v14 = vpop.f32.mrf.mxu0 }
0x1408   :  { %2133 = vrot.lane.b32.xlu0 %v2125_v13, %s7147_s2  ;;  %v5665_v15 = vmul.f32 -1.442695, %v2125_v13 }
0x140a   :  { %6761 = vpow2.f32 %v5665_v15 }
0x1412   :  { %v6760_v16 = vpop.eup %6759 }
0x1413   :  { %v2030_v17 = vadd.f32 1.0, %v6760_v16 }
0x1415   :  { %6763 = vrcp.f32 %v2030_v17 }
0x1417   :  { %v6762_v18 = vpop.eup %6761 }
0x1418   :  { %v2129_v54 = vadd.f32 1.0, %v6762_v18 }
0x141a   :  { %6765 = vrcp.f32 %v2129_v54 }
0x1422   :  { %v6764_v2 = vpop.eup %6763 }
0x1427   :  { %v6766_v52 = vpop.eup %6765 }
0x1475   :  { %v2035_v4 = vpop.permute.xlu1 %2034 }
0x1476   :  { %v2037_v7 = vmul.f32 %v6764_v2, %v2035_v4 }
0x1478   :  { %2039 = vrot.lane.b32.xlu1 %v2037_v7, %s7148_s23 }
0x147a   :  { %v2134_v8 = vpop.permute.xlu0 %2133 }
0x147b   :  { %v2136_v19 = vmul.f32 %v6766_v52, %v2134_v8 }
0x147d   :  { %2138 = vrot.lane.b32.xlu0 %v2136_v19, %s7148_s23 }
0x14ea   :  { %v2040_v20 = vpop.permute.xlu1 %2039 }
0x14eb   :  { %v2042_v21 = vadd.f32 %v2040_v20, %v2026_v31 }
0x14ed   :  { %6767 = vtanh.f32 %v2042_v21 }
0x14ef   :  { %v2139_v22 = vpop.permute.xlu0 %2138 }
0x14f0   :  { %v2141_v23 = vadd.f32 %v2139_v22, %v2125_v13 }
0x14f2   :  { %6769 = vtanh.f32 %v2141_v23 }
0x14fa   :  { %v6768_v24 = vpop.eup %6767 }
0x14fb   :  { %v2044_v25 = vsub.f32 %v7671_v61, %v6768_v24  ;;  %v385_v61 = vadd.f32 %v7722_v11, %v7437_v51 }
0x14fd   :  { %2046 = vrot.lane.b32.xlu1 %v2044_v25, %s7149_s24 }
0x14ff   :  { %v6770_v27 = vpop.eup %6769 }
0x1500   :  { %v2143_v29 = vsub.f32 %v7673_v63, %v6770_v27  ;;  %v6902_v63 = vld [vmem:[#allocation10] ss:$0 sm:$0xff] }
0x1502   :  { %2145 = vrot.lane.b32.xlu0 %v2143_v29, %s7149_s24 }
0x156f   :  { %v2047_v32 = vpop.permute.xlu1 %2046 }
0x1570   :  { %v2049_v34 = vmul.f32 %v6764_v2, %v2047_v32 }
0x1572   :  { %2051 = vrot.lane.b32.xlu1 %v2049_v34, %s7147_s2 }
0x1574   :  { %v2146_v37 = vpop.permute.xlu0 %2145 }
0x1575   :  { %v2148_v10 = vmul.f32 %v6766_v52, %v2146_v37 }
0x1577   :  { %2150 = vrot.lane.b32.xlu0 %v2148_v10, %s7147_s2 }
0x15e4   :  { %v2052_v49 = vpop.permute.xlu1 %2051 }
0x15e5   :  { %v7735_v38 = vadd.f32 %v6768_v24, %v2052_v49 }
0x15e7   :  { %2155 = vrot.lane.b32.xlu1 %v7735_v38, %s7148_s23 }
0x15e9   :  { %v2151_v39 = vpop.permute.xlu0 %2150 }
0x15ea   :  { %v7739_v40 = vadd.f32 %v6770_v27, %v2151_v39 }
0x15ec   :  { %2230 = vrot.lane.b32.xlu0 %v7739_v40, %s7148_s23 }
0x1659   :  { %v2156_v42 = vpop.permute.xlu1 %2155 }
0x165a   :  { %6258 = vmatmul.mubr.msk.f32.vlgmr.msra.gmra.mxu1 %vm388_vm2, %v2156_v42 }
0x165b   :  { %6272 = vmatpush3.msra.mxu1 %v7681_v5  ;;  %6279 = vmatprep.mubr.msk.f32.mxu1 %vm7146_vm0, %v7145_v0 }
0x165c   :  { %6273 = vmatprep.subr.mxu1 %v7145_v0 }
0x165d   :  { %6274 = vmatpush3.msra.mxu1 %v7687_v6 }
0x165e   :  { %6275 = vmatprep.subr.mxu1 %v7145_v0  ;;  %v2231_v43 = vpop.permute.xlu0 %2230 }
0x165f   :  { %6276 = vmatpush3.msra.mxu1 %v7693_v48  ;;  %6269 = vmatmul.mubr.msk.f32.vlgmr.msra.gmra.mxu0 %vm388_vm2, %v2231_v43 }
0x1660   :  { %6277 = vmatprep.subr.mxu1 %v7145_v0  ;;  %6283 = vmatpush3.msra.mxu0 %v6894_v44 }
0x1661   :  { %6278 = vmatpush3.msra.mxu1 %v7699_v9  ;;  %6284 = vmatprep.subr.mxu0 %v7145_v0 }
0x1662   :  { %6280 = vmatmul.mubr.msk.f32.vlgmr.msra.gmra.mxu1 %vm388_vm2, %v2231_v43  ;;  %6293 = vmatprep.subr.mxu1 %v7145_v0 }
0x1663   :  { %6294 = vmatpush3.msra.mxu1 %v6895_v45  ;;  %6285 = vmatpush3.msra.mxu0 %v6896_v46  ;;  %v2614_v46 = vld [vmem:[#allocation12 + $0x18] sm:$0xff] }
0x1664   :  { %6295 = vmatprep.subr.mxu1 %v7145_v0  ;;  %6286 = vmatprep.subr.mxu0 %v7145_v0 }
0x1665   :  { %6296 = vmatpush3.msra.mxu1 %v6897_v53  ;;  %6287 = vmatpush3.msra.mxu0 %v6898_v55  ;;  %v2613_v53 = vld [vmem:[#allocation12 + $0x10] sm:$0xff]  ;;  %v2612_v55 = vld [vmem:[#allocation12 + $0x8] sm:$0xff] }
0x1666   :  { %6297 = vmatprep.subr.mxu1 %v7145_v0  ;;  %6288 = vmatprep.subr.mxu0 %v7145_v0 }
0x1667   :  { %6298 = vmatpush3.msra.mxu1 %v6899_v56  ;;  %6289 = vmatpush3.msra.mxu0 %v6900_v57  ;;  %v2611_v56 = vld [vmem:[#allocation12] sm:$0xff] }
0x1668   :  { %6299 = vmatprep.subr.mxu1 %v7145_v0  ;;  %6290 = vmatprep.mubr.msk.f32.mxu0 %vm7146_vm0, %v7145_v0 }
0x1669   :  { %6300 = vmatpush3.msra.mxu1 %v6901_v58  ;;  %6301 = vmatprep.mubr.msk.f32.mxu1 %vm7146_vm0, %v7145_v0 }
0x166a   :  { %6304 = vmatprep.subr.mxu0 %v7145_v0  ;;  %6315 = vmatprep.subr.mxu1 %v7145_v0 }
0x171a   :  { %v2225_v50 = vpop.f32.mrf.mxu1 }
0x171c   :  { %v6259_v59 = vpop.f32.mrf.mxu1 }
0x171f   :  { %v2300_v60 = vpop.f32.mrf.mxu0 }
0x1720   :  { %v2301_v47 = vadd.f32 %v2300_v60, %v2225_v50  ;;  %v2697_v50 = vld [vmem:[#allocation15] sm:$0xff] }
0x1721   :  { %v6270_v62 = vpop.f32.mrf.mxu0 }
0x1722   :  { %v2304_v1 = vadd.f32 %v6902_v63, %v2301_v47  ;;  %v2399_v3 = vpop.f32.mrf.mxu1  ;;  %v7811_v62 = vld [vmem:[%s8512_s11 + $0x10] sm:$0xff] }
0x1723   :  { %v2403_v5 = vadd.f32 %v2399_v3, %v385_v61  ;;  %v7804_v61 = vld [vmem:[%s8512_s11 + $0x18] sm:$0xff] }
0x1724   :  { %v6281_v6 = vpop.f32.mrf.mxu1  ;;  %2312 = vrot.lane.b32.xlu1 %v2304_v1, %s7147_s2  ;;  %v5668_v48 = vmul.f32 -1.442695, %v2304_v1 }
0x1725   :  { %2411 = vrot.lane.b32.xlu0 %v2403_v5, %s7147_s2  ;;  %v5670_v9 = vmul.f32 -1.442695, %v2403_v5 }
0x1726   :  { %6771 = vpow2.f32 %v5668_v48  ;;  %v7823_v48 = vld [vmem:[%s8515_s14 + $0x10] sm:$0xff] }
0x1727   :  { %6773 = vpow2.f32 %v5670_v9  ;;  %v7834_v9 = vld [vmem:[%s8512_s11 + $0x8] sm:$0xff] }
0x1733   :  { %v6772_v26 = vpop.eup %6771 }
0x1734   :  { %v6774_v28 = vpop.eup %6773  ;;  %v2308_v30 = vadd.f32 1.0, %v6772_v26  ;;  %v7839_v26 = vld [vmem:[%s8515_s14 + $0x8] sm:$0xff] }
0x1735   :  { %v2407_v33 = vadd.f32 1.0, %v6774_v28  ;;  %v7848_v28 = vld [vmem:[%s8512_s11] sm:$0xff] }
0x1736   :  { %6775 = vrcp.f32 %v2308_v30  ;;  %v7853_v30 = vld [vmem:[%s8515_s14] sm:$0xff] }
0x1737   :  { %6777 = vrcp.f32 %v2407_v33  ;;  %v5676_v33 = vld [vmem:[#allocation16] ss:$0 sm:$0xff] }
0x1743   :  { %v6776_v51 = vpop.eup %6775 }
0x1744   :  { %v6778_v31 = vpop.eup %6777 }
0x1796   :  { %v2313_v35 = vpop.permute.xlu1 %2312 }
0x1797   :  { %v2315_v11 = vmul.f32 %v6776_v51, %v2313_v35  ;;  %v2412_v36 = vpop.permute.xlu0 %2411 }
0x1798   :  { %v2414_v12 = vmul.f32 %v6778_v31, %v2412_v36 }
0x1799   :  { %2317 = vrot.lane.b32.xlu1 %v2315_v11, %s7148_s23  ;;  %v7872_v11 = vld [vmem:[%s8513_s12] ss:$0 sm:$0xff] }
0x179a   :  { %2416 = vrot.lane.b32.xlu0 %v2414_v12, %s7148_s23 }
0x180b   :  { %v2318_v13 = vpop.permute.xlu1 %2317 }
0x180c   :  { %v2320_v14 = vadd.f32 %v2318_v13, %v2304_v1  ;;  %v2417_v41 = vpop.permute.xlu0 %2416 }
0x180d   :  { %v2419_v15 = vadd.f32 %v2417_v41, %v2403_v5  ;;  %v7818_v5 = vld [vmem:[%s8515_s14 + $0x18] sm:$0xff] }
0x180e   :  { %6779 = vtanh.f32 %v2320_v14 }
0x180f   :  { %6781 = vtanh.f32 %v2419_v15 }
0x181b   :  { %v6780_v16 = vpop.eup %6779 }
0x181c   :  { %v6782_v17 = vpop.eup %6781  ;;  %v2322_v18 = vsub.f32 %v7735_v38, %v6780_v16 }
0x181d   :  { %v2421_v54 = vsub.f32 %v7739_v40, %v6782_v17 }
0x181e   :  { %2324 = vrot.lane.b32.xlu1 %v2322_v18, %s7149_s24 }
0x181f   :  { %2423 = vrot.lane.b32.xlu0 %v2421_v54, %s7149_s24 }
0x1890   :  { %v2325_v2 = vpop.permute.xlu1 %2324 }
0x1891   :  { %v2327_v4 = vmul.f32 %v6776_v51, %v2325_v2  ;;  %v2424_v7 = vpop.permute.xlu0 %2423 }
0x1892   :  { %v2426_v52 = vmul.f32 %v6778_v31, %v2424_v7 }
0x1893   :  { %2329 = vrot.lane.b32.xlu1 %v2327_v4, %s7147_s2 }
0x1894   :  { %2428 = vrot.lane.b32.xlu0 %v2426_v52, %s7147_s2 }
0x1905   :  { %v2330_v8 = vpop.permute.xlu1 %2329 }
0x1906   :  { %v2332_v19 = vadd.f32 %v6780_v16, %v2330_v8  ;;  %v2429_v20 = vpop.permute.xlu0 %2428 }
0x1907   :  { %v2431_v21 = vadd.f32 %v6782_v17, %v2429_v20  ;;  %v7885_v20 = vld [vmem:[%s8514_s13 + $0x18] sm:$0xff] }
0x1908   :  { %2433 = vrot.lane.b32.xlu1 %v2332_v19, %s7148_s23 }
0x1909   :  { %2508 = vrot.lane.b32.xlu0 %v2431_v21, %s7148_s23  ;;  %v7890_v21 = vld [vmem:[%s8514_s13 + $0x10] sm:$0xff] }
0x197a   :  { %v2434_v22 = vpop.permute.xlu1 %2433 }
0x197b   :  { %v2509_v23 = vpop.permute.xlu0 %2508  ;;  %6291 = vmatmul.mubr.msk.f32.vlgmr.msra.gmra.mxu0 %vm388_vm2, %v2434_v22  ;;  %v7897_v22 = vld [vmem:[%s8514_s13 + $0x8] sm:$0xff] }
0x197c   :  { %6302 = vmatmul.mubr.msk.f32.vlgmr.msra.gmra.mxu1 %vm388_vm2, %v2509_v23  ;;  %6312 = vmatprep.mubr.msk.f32.mxu0 %vm7146_vm0, %v7145_v0  ;;  %v7904_v23 = vld [vmem:[%s8514_s13] sm:$0xff] }
0x197d   :  { %6317 = vmatprep.mubr.msk.f32.mxu1 %vm7146_vm0, %v7145_v0  ;;  %6305 = vmatpush3.msra.mxu0 %v2614_v46 }
0x197e   :  { %6306 = vmatprep.subr.mxu0 %v7145_v0  ;;  %6316 = vmatpush3.msra.mxu1 %v2697_v50 }
0x197f   :  { %6307 = vmatpush3.msra.mxu0 %v2613_v53  ;;  %6331 = vmatprep.subr.mxu1 %v7145_v0 }
0x1980   :  { %6308 = vmatprep.subr.mxu0 %v7145_v0 }
0x1981   :  { %6309 = vmatpush3.msra.mxu0 %v2612_v55 }
0x1982   :  { %6310 = vmatprep.subr.mxu0 %v7145_v0 }
0x1983   :  { %6311 = vmatpush3.msra.mxu0 %v2611_v56 }
0x1984   :  { %6320 = vmatprep.subr.mxu0 %v7145_v0 }
0x1a3b   :  { %v2503_v24 = vpop.f32.mrf.mxu0 }
0x1a3c   :  { %v2578_v25 = vpop.f32.mrf.mxu1 }
0x1a3d   :  { %v2579_v27 = vadd.f32 %v2578_v25, %v2503_v24  ;;  %v6292_v29 = vpop.f32.mrf.mxu0 }
0x1a3e   :  { %v6303_v32 = vpop.f32.mrf.mxu1 }
0x1a3f   :  { %v2582_v34 = vadd.f32 %v6902_v63, %v2579_v27  ;;  %v5674_v63 = vld [vmem:[#allocation13] ss:$0 sm:$0xff] }
0x1a41   :  { %2590 = vrot.lane.b32.xlu1 %v2582_v34, %s7147_s2  ;;  %v5673_v37 = vmul.f32 -1.442695, %v2582_v34 }
0x1a43   :  { %6783 = vpow2.f32 %v5673_v37 }
0x1a50   :  { %v6784_v10 = vpop.eup %6783 }
0x1a51   :  { %v2586_v49 = vadd.f32 1.0, %v6784_v10 }
0x1a53   :  { %6785 = vrcp.f32 %v2586_v49 }
0x1a60   :  { %v6786_v38 = vpop.eup %6785 }
0x1ab3   :  { %v2591_v39 = vpop.permute.xlu1 %2590 }
0x1ab4   :  { %v2593_v40 = vmul.f32 %v6786_v38, %v2591_v39 }
0x1ab6   :  { %2595 = vrot.lane.b32.xlu0 %v2593_v40, %s7148_s23 }
0x1b28   :  { %v2596_v42 = vpop.permute.xlu0 %2595 }
0x1b29   :  { %v2598_v43 = vadd.f32 %v2596_v42, %v2582_v34  ;;  %v7937_v34 = vld [vmem:[%s8516_s15] ss:$0 sm:$0xff] }
0x1b2b   :  { %6787 = vtanh.f32 %v2598_v43 }
0x1b38   :  { %v6788_v44 = vpop.eup %6787 }
0x1b39   :  { %v2600_v45 = vsub.f32 %v2332_v19, %v6788_v44 }
0x1b3b   :  { %2602 = vrot.lane.b32.xlu1 %v2600_v45, %s7149_s24 }
0x1bad   :  { %v2603_v57 = vpop.permute.xlu1 %2602 }
0x1bae   :  { %v2605_v58 = vmul.f32 %v6786_v38, %v2603_v57 }
0x1bb0   :  { %2607 = vrot.lane.b32.xlu0 %v2605_v58, %s7147_s2 }
0x1c22   :  { %v2608_v59 = vpop.permute.xlu0 %2607 }
0x1c23   :  { %v2610_v60 = vadd.f32 %v6788_v44, %v2608_v59 }
0x1c25   :  { %2623 = vrot.lane.b32.xlu1 %v2610_v60, %s7148_s23 }
0x1c97   :  { %v2624_v47 = vpop.permute.xlu1 %2623 }
0x1c98   :  { %6313 = vmatmul.mubr.msk.f32.vlgmr.msra.gmra.mxu0 %vm388_vm2, %v2624_v47 }
0x1c99   :  { %6328 = vmatprep.mubr.msk.f32.mxu0 %vm7146_vm0, %v7145_v0  ;;  %6321 = vmatpush3.msra.mxu0 %v7804_v61 }
0x1c9a   :  { %6322 = vmatprep.subr.mxu0 %v7145_v0 }
0x1c9b   :  { %6323 = vmatpush3.msra.mxu0 %v7811_v62 }
0x1c9c   :  { %6324 = vmatprep.subr.mxu0 %v7145_v0 }
0x1c9d   :  { %6325 = vmatpush3.msra.mxu0 %v7834_v9 }
0x1c9e   :  { %6326 = vmatprep.subr.mxu0 %v7145_v0 }
0x1c9f   :  { %6327 = vmatpush3.msra.mxu0 %v7848_v28 }
0x1ca0   :  { %6342 = vmatprep.subr.mxu0 %v7145_v0 }
0x1d58   :  { %v2693_v1 = vpop.f32.mrf.mxu0 }
0x1d59   :  { %v2694_v3 = vadd.f32 %v5674_v63, %v2693_v1 }
0x1d5a   :  { %v6314_v6 = vpop.f32.mrf.mxu0 }
0x1d5b   :  { %6318 = vmatmul.mubr.msk.f32.vlgmr.msra.gmra.mxu1 %vm2705_vm3, %v2694_v3 }
0x1d5c   :  { %6332 = vmatpush3.msra.mxu1 %v7818_v5  ;;  %6339 = vmatprep.mubr.msk.f32.mxu1 %vm7146_vm0, %v7145_v0 }
0x1d5d   :  { %6333 = vmatprep.subr.mxu1 %v7145_v0 }
0x1d5e   :  { %6334 = vmatpush3.msra.mxu1 %v7823_v48 }
0x1d5f   :  { %6335 = vmatprep.subr.mxu1 %v7145_v0 }
0x1d60   :  { %6336 = vmatpush3.msra.mxu1 %v7839_v26 }
0x1d61   :  { %6337 = vmatprep.subr.mxu1 %v7145_v0 }
0x1d62   :  { %6338 = vmatpush3.msra.mxu1 %v7853_v30 }
0x1d63   :  { %6353 = vmatprep.subr.mxu1 %v7145_v0 }
0x1e1b   :  { %v2775_v51 = vpop.f32.mrf.mxu1 }
0x1e1c   :  { %v7859_v35 = vadd.f32 %v5676_v33, %v2775_v51 }
0x1e1d   :  { %v6319_v31 = vpop.f32.mrf.mxu1 }
0x1e1e   :  { %6329 = vmatmul.mubr.msk.f32.vlgmr.msra.gmra.mxu0 %vm388_vm2, %v7859_v35  ;;  %6340 = vmatmul.mubr.msk.f32.vlgmr.msra.gmra.mxu1 %vm388_vm2, %v7859_v35 }
0x1e1f   :  { %6350 = vmatprep.mubr.msk.f32.mxu0 %vm7146_vm0, %v7145_v0  ;;  %6361 = vmatprep.mubr.msk.f32.mxu1 %vm7146_vm0, %v7145_v0 }
0x1e20   :  { %6343 = vmatpush3.msra.mxu0 %v7885_v20 }
0x1e21   :  { %6344 = vmatprep.subr.mxu0 %v7145_v0 }
0x1e22   :  { %6345 = vmatpush3.msra.mxu0 %v7890_v21 }
0x1e23   :  { %6346 = vmatprep.subr.mxu0 %v7145_v0 }
0x1e24   :  { %6347 = vmatpush3.msra.mxu0 %v7897_v22 }
0x1e25   :  { %6348 = vmatprep.subr.mxu0 %v7145_v0 }
0x1e26   :  { %6349 = vmatpush3.msra.mxu0 %v7904_v23 }
0x1e27   :  { %6364 = vmatprep.subr.mxu0 %v7145_v0 }
0x1ede   :  { %v2848_v36 = vpop.f32.mrf.mxu0  ;;  %v7874_v12 = vpop.f32.mrf.mxu1 }
0x1edf   :  { %v2849_v13 = vadd.f32 %v7872_v11, %v2848_v36 }
0x1ee0   :  { %v6330_v14 = vpop.f32.mrf.mxu0  ;;  %v6341_v41 = vpop.f32.mrf.mxu1 }
0x1ee1   :  { %2859 = vrot.lane.b32.xlu0 %v2849_v13, %s7147_s2  ;;  %v5679_v15 = vmul.f32 -1.442695, %v2849_v13 }
0x1ee3   :  { %6789 = vpow2.f32 %v5679_v15  ;;  %v7955_v15 = vld [vmem:[%s8517_s16 + $0x18] sm:$0xff] }
0x1ee4   :  { %6354 = vmatpush3.msra.mxu1 %v7955_v15 }
0x1ee5   :  { %6355 = vmatprep.subr.mxu1 %v7145_v0 }
0x1ef0   :  { %v6790_v16 = vpop.eup %6789 }
0x1ef1   :  { %v2855_v17 = vadd.f32 1.0, %v6790_v16  ;;  %v7960_v16 = vld [vmem:[%s8517_s16 + $0x10] sm:$0xff] }
0x1ef2   :  { %6356 = vmatpush3.msra.mxu1 %v7960_v16 }
0x1ef3   :  { %6791 = vrcp.f32 %v2855_v17  ;;  %v7967_v17 = vld [vmem:[%s8517_s16 + $0x8] sm:$0xff]  ;;  %6357 = vmatprep.subr.mxu1 %v7145_v0 }
0x1ef4   :  { %6358 = vmatpush3.msra.mxu1 %v7967_v17 }
0x1ef5   :  { %6359 = vmatprep.subr.mxu1 %v7145_v0 }
0x1f00   :  { %v6792_v18 = vpop.eup %6791 }
0x1f53   :  { %v2860_v54 = vpop.permute.xlu0 %2859 }
0x1f54   :  { %v2862_v2 = vmul.f32 %v6792_v18, %v2860_v54  ;;  %v7976_v54 = vld [vmem:[%s8517_s16] sm:$0xff] }
0x1f55   :  { %6360 = vmatpush3.msra.mxu1 %v7976_v54 }
0x1f56   :  { %2864 = vrot.lane.b32.xlu1 %v2862_v2, %s7148_s23  ;;  %6375 = vmatprep.subr.mxu1 %v7145_v0 }
0x1fc8   :  { %v2865_v4 = vpop.permute.xlu1 %2864 }
0x1fc9   :  { %v2867_v7 = vadd.f32 %v2865_v4, %v2849_v13 }
0x1fcb   :  { %6793 = vtanh.f32 %v2867_v7 }
0x1fd8   :  { %v6794_v52 = vpop.eup %6793 }
0x1fd9   :  { %2870 = vrot.lane.b32.xlu0 %v6794_v52, %s7148_s23 }
0x204b   :  { %v2871_v8 = vpop.permute.xlu0 %2870 }
0x204c   :  { %v2873_v19 = vsub.f32 %v7859_v35, %v2871_v8 }
0x204e   :  { %2875 = vrot.lane.b32.xlu1 %v2873_v19, %s7147_s2 }
0x20c0   :  { %v2876_v24 = vpop.permute.xlu1 %2875 }
0x20c1   :  { %v2878_v25 = vmul.f32 %v6792_v18, %v2876_v24 }
0x20c3   :  { %2880 = vrot.lane.b32.xlu0 %v2878_v25, %s7147_s2 }
0x2135   :  { %v2881_v27 = vpop.permute.xlu0 %2880 }
0x2136   :  { %v2883_v29 = vadd.f32 %v6794_v52, %v2881_v27 }
0x2138   :  { %2955 = vrot.lane.b32.xlu1 %v2883_v29, %s7148_s23 }
0x21aa   :  { %v2956_v32 = vpop.permute.xlu1 %2955 }
0x21ab   :  { %6351 = vmatmul.mubr.msk.f32.vlgmr.msra.gmra.mxu0 %vm388_vm2, %v2956_v32 }
0x21ac   :  { %6365 = vmatpush3.msra.mxu0 %v7804_v61  ;;  %6372 = vmatprep.mubr.msk.f32.mxu0 %vm7146_vm0, %v7145_v0 }
0x21ad   :  { %6366 = vmatprep.subr.mxu0 %v7145_v0 }
0x21ae   :  { %6367 = vmatpush3.msra.mxu0 %v7811_v62 }
0x21af   :  { %6368 = vmatprep.subr.mxu0 %v7145_v0 }
0x21b0   :  { %6369 = vmatpush3.msra.mxu0 %v7834_v9 }
0x21b1   :  { %6370 = vmatprep.subr.mxu0 %v7145_v0 }
0x21b2   :  { %6371 = vmatpush3.msra.mxu0 %v7848_v28 }
0x21b3   :  { %6373 = vmatmul.mubr.msk.f32.vlgmr.msra.gmra.mxu0 %vm388_vm2, %v2956_v32  ;;  %6386 = vmatprep.subr.mxu0 %v7145_v0 }
0x21b4   :  { %6387 = vmatpush3.msra.mxu0 %v7885_v20  ;;  %6394 = vmatprep.mubr.msk.f32.mxu0 %vm7146_vm0, %v7145_v0 }
0x21b5   :  { %6388 = vmatprep.subr.mxu0 %v7145_v0 }
0x21b6   :  { %6389 = vmatpush3.msra.mxu0 %v7890_v21 }
0x21b7   :  { %6390 = vmatprep.subr.mxu0 %v7145_v0 }
0x21b8   :  { %6391 = vmatpush3.msra.mxu0 %v7897_v22 }
0x21b9   :  { %6392 = vmatprep.subr.mxu0 %v7145_v0 }
0x21ba   :  { %6393 = vmatpush3.msra.mxu0 %v7904_v23 }
0x21bb   :  { %6408 = vmatprep.subr.mxu0 %v7145_v0 }
0x226b   :  { %v3025_v37 = vpop.f32.mrf.mxu0 }
0x226c   :  { %v3026_v10 = vadd.f32 %v3025_v37, %v7874_v12 }
0x226d   :  { %v6352_v49 = vpop.f32.mrf.mxu0 }
0x226e   :  { %v3029_v38 = vadd.f32 %v7937_v34, %v3026_v10 }
0x2270   :  { %3037 = vrot.lane.b32.xlu0 %v3029_v38, %s7147_s2  ;;  %v5682_v43 = vmul.f32 -1.442695, %v3029_v38 }
0x2272   :  { %6795 = vpow2.f32 %v5682_v43 }
0x2273   :  { %v3203_v39 = vpop.f32.mrf.mxu0 }
0x2274   :  { %v3204_v40 = vadd.f32 %v7872_v11, %v3203_v39 }
0x2275   :  { %v6374_v42 = vpop.f32.mrf.mxu0 }
0x2276   :  { %3214 = vrot.lane.b32.xlu0 %v3204_v40, %s7147_s2  ;;  %v5685_v44 = vmul.f32 -1.442695, %v3204_v40 }
0x2278   :  { %6797 = vpow2.f32 %v5685_v44 }
0x227f   :  { %v6796_v45 = vpop.eup %6795 }
0x2280   :  { %v3033_v46 = vadd.f32 1.0, %v6796_v45 }
0x2282   :  { %6799 = vrcp.f32 %v3033_v46 }
0x2285   :  { %v6798_v53 = vpop.eup %6797 }
0x2286   :  { %v3210_v55 = vadd.f32 1.0, %v6798_v53 }
0x2288   :  { %6801 = vrcp.f32 %v3210_v55 }
0x228f   :  { %v6800_v56 = vpop.eup %6799 }
0x2295   :  { %v6802_v50 = vpop.eup %6801 }
0x22e2   :  { %v3038_v57 = vpop.permute.xlu0 %3037 }
0x22e3   :  { %v3040_v58 = vmul.f32 %v6800_v56, %v3038_v57 }
0x22e5   :  { %3042 = vrot.lane.b32.xlu1 %v3040_v58, %s7148_s23 }
0x22e8   :  { %v3215_v59 = vpop.permute.xlu0 %3214 }
0x22e9   :  { %v3217_v60 = vmul.f32 %v6802_v50, %v3215_v59 }
0x22eb   :  { %3219 = vrot.lane.b32.xlu1 %v3217_v60, %s7148_s23 }
0x2357   :  { %v3043_v47 = vpop.permute.xlu1 %3042 }
0x2358   :  { %v3045_v63 = vadd.f32 %v3043_v47, %v3029_v38 }
0x235a   :  { %6803 = vtanh.f32 %v3045_v63 }
0x235d   :  { %v3220_v1 = vpop.permute.xlu1 %3219 }
0x235e   :  { %v3222_v3 = vadd.f32 %v3220_v1, %v3204_v40 }
0x2360   :  { %6805 = vtanh.f32 %v3222_v3 }
0x2367   :  { %v6804_v6 = vpop.eup %6803 }
0x2368   :  { %3048 = vrot.lane.b32.xlu0 %v6804_v6, %s7148_s23 }
0x236d   :  { %v6806_v33 = vpop.eup %6805 }
0x236e   :  { %v3224_v51 = vsub.f32 %v2883_v29, %v6806_v33 }
0x2370   :  { %3226 = vrot.lane.b32.xlu0 %v3224_v51, %s7149_s24 }
0x23da   :  { %v3049_v31 = vpop.permute.xlu0 %3048 }
0x23db   :  { %v3051_v36 = vsub.f32 %v7859_v35, %v3049_v31 }
0x23dd   :  { %3053 = vrot.lane.b32.xlu1 %v3051_v36, %s7147_s2 }
0x23e2   :  { %v3227_v12 = vpop.permute.xlu0 %3226 }
0x23e3   :  { %v3229_v13 = vmul.f32 %v6802_v50, %v3227_v12 }
0x23e5   :  { %3231 = vrot.lane.b32.xlu0 %v3229_v13, %s7147_s2 }
0x244f   :  { %v3054_v14 = vpop.permute.xlu1 %3053 }
0x2450   :  { %v3056_v41 = vmul.f32 %v6800_v56, %v3054_v14 }
0x2452   :  { %3058 = vrot.lane.b32.xlu1 %v3056_v41, %s7147_s2 }
0x2457   :  { %v3232_v35 = vpop.permute.xlu0 %3231 }
0x2458   :  { %v7969_v18 = vadd.f32 %v6806_v33, %v3232_v35 }
0x245a   :  { %3306 = vrot.lane.b32.xlu0 %v7969_v18, %s7148_s23 }
0x24c4   :  { %v3059_v2 = vpop.permute.xlu1 %3058 }
0x24c5   :  { %v7984_v4 = vadd.f32 %v6804_v6, %v3059_v2 }
0x24c7   :  { %3063 = vrot.lane.b32.xlu1 %v7984_v4, %s7148_s23 }
0x24cc   :  { %v3307_v7 = vpop.permute.xlu0 %3306 }
0x24cd   :  { %6395 = vmatmul.mubr.msk.f32.vlgmr.msra.gmra.mxu0 %vm388_vm2, %v3307_v7 }
0x24ce   :  { %6409 = vmatpush3.msra.mxu0 %v7804_v61  ;;  %6416 = vmatprep.mubr.msk.f32.mxu0 %vm7146_vm0, %v7145_v0 }
0x24cf   :  { %6410 = vmatprep.subr.mxu0 %v7145_v0 }
0x24d0   :  { %6411 = vmatpush3.msra.mxu0 %v7811_v62 }
0x24d1   :  { %6412 = vmatprep.subr.mxu0 %v7145_v0 }
0x24d2   :  { %6413 = vmatpush3.msra.mxu0 %v7834_v9 }
0x24d3   :  { %6414 = vmatprep.subr.mxu0 %v7145_v0 }
0x24d4   :  { %6415 = vmatpush3.msra.mxu0 %v7848_v28 }
0x24d5   :  { %6417 = vmatmul.mubr.msk.f32.vlgmr.msra.gmra.mxu0 %vm388_vm2, %v3307_v7  ;;  %6430 = vmatprep.subr.mxu0 %v7145_v0 }
0x24d6   :  { %6431 = vmatpush3.msra.mxu0 %v7885_v20  ;;  %6438 = vmatprep.mubr.msk.f32.mxu0 %vm7146_vm0, %v7145_v0 }
0x24d7   :  { %6432 = vmatprep.subr.mxu0 %v7145_v0 }
0x24d8   :  { %6433 = vmatpush3.msra.mxu0 %v7890_v21 }
0x24d9   :  { %6434 = vmatprep.subr.mxu0 %v7145_v0 }
0x24da   :  { %6435 = vmatpush3.msra.mxu0 %v7897_v22 }
0x24db   :  { %6436 = vmatprep.subr.mxu0 %v7145_v0 }
0x24dc   :  { %6437 = vmatpush3.msra.mxu0 %v7904_v23 }
0x24dd   :  { %6452 = vmatprep.subr.mxu0 %v7145_v0 }
0x2539   :  { %v3064_v52 = vpop.permute.xlu1 %3063 }
0x253a   :  { %6362 = vmatmul.mubr.msk.f32.vlgmr.msra.gmra.mxu1 %vm388_vm2, %v3064_v52 }
0x253b   :  { %6376 = vmatpush3.msra.mxu1 %v7818_v5  ;;  %6383 = vmatprep.mubr.msk.f32.mxu1 %vm7146_vm0, %v7145_v0 }
0x253c   :  { %6377 = vmatprep.subr.mxu1 %v7145_v0 }
0x253d   :  { %6378 = vmatpush3.msra.mxu1 %v7823_v48 }
0x253e   :  { %6379 = vmatprep.subr.mxu1 %v7145_v0 }
0x253f   :  { %6380 = vmatpush3.msra.mxu1 %v7839_v26 }
0x2540   :  { %6381 = vmatprep.subr.mxu1 %v7145_v0 }
0x2541   :  { %6382 = vmatpush3.msra.mxu1 %v7853_v30 }
0x2542   :  { %6384 = vmatmul.mubr.msk.f32.vlgmr.msra.gmra.mxu1 %vm388_vm2, %v3064_v52  ;;  %6397 = vmatprep.subr.mxu1 %v7145_v0 }
0x2543   :  { %6398 = vmatpush3.msra.mxu1 %v7955_v15  ;;  %6405 = vmatprep.mubr.msk.f32.mxu1 %vm7146_vm0, %v7145_v0 }
0x2544   :  { %6399 = vmatprep.subr.mxu1 %v7145_v0 }
0x2545   :  { %6400 = vmatpush3.msra.mxu1 %v7960_v16 }
0x2546   :  { %6401 = vmatprep.subr.mxu1 %v7145_v0 }
0x2547   :  { %6402 = vmatpush3.msra.mxu1 %v7967_v17 }
0x2548   :  { %6403 = vmatprep.subr.mxu1 %v7145_v0 }
0x2549   :  { %6404 = vmatpush3.msra.mxu1 %v7976_v54 }
0x254a   :  { %6419 = vmatprep.subr.mxu1 %v7145_v0 }
0x258d   :  { %v3376_v8 = vpop.f32.mrf.mxu0 }
0x258f   :  { %v6396_v19 = vpop.f32.mrf.mxu0 }
0x2595   :  { %v3550_v24 = vpop.f32.mrf.mxu0 }
0x2596   :  { %v3551_v25 = vadd.f32 %v7872_v11, %v3550_v24 }
0x2597   :  { %v6418_v27 = vpop.f32.mrf.mxu0 }
0x2598   :  { %3561 = vrot.lane.b32.xlu0 %v3551_v25, %s7147_s2  ;;  %v5691_v29 = vmul.f32 -1.442695, %v3551_v25 }
0x259a   :  { %6807 = vpow2.f32 %v5691_v29 }
0x25a7   :  { %v6808_v32 = vpop.eup %6807 }
0x25a8   :  { %v3557_v37 = vadd.f32 1.0, %v6808_v32 }
0x25aa   :  { %6809 = vrcp.f32 %v3557_v37 }
0x25b7   :  { %v6810_v43 = vpop.eup %6809 }
0x25fa   :  { %v8034_v10 = vpop.f32.mrf.mxu1 }
0x25fc   :  { %v6363_v49 = vpop.f32.mrf.mxu1 }
0x2602   :  { %v3301_v38 = vpop.f32.mrf.mxu1 }
0x2603   :  { %v3377_v39 = vadd.f32 %v3376_v8, %v3301_v38 }
0x2604   :  { %v6385_v40 = vpop.f32.mrf.mxu1 }
0x2605   :  { %v3380_v42 = vadd.f32 %v7937_v34, %v3377_v39 }
0x2607   :  { %3388 = vrot.lane.b32.xlu1 %v3380_v42, %s7147_s2  ;;  %v5688_v46 = vmul.f32 -1.442695, %v3380_v42 }
0x2609   :  { %6811 = vpow2.f32 %v5688_v46 }
0x260a   :  { %v3562_v44 = vpop.permute.xlu0 %3561 }
0x260b   :  { %v3564_v45 = vmul.f32 %v6810_v43, %v3562_v44 }
0x260d   :  { %3566 = vrot.lane.b32.xlu0 %v3564_v45, %s7148_s23 }
0x2616   :  { %v6812_v53 = vpop.eup %6811 }
0x2617   :  { %v3384_v55 = vadd.f32 1.0, %v6812_v53 }
0x2619   :  { %6813 = vrcp.f32 %v3384_v55 }
0x2626   :  { %v6814_v56 = vpop.eup %6813 }
0x2679   :  { %v3389_v57 = vpop.permute.xlu1 %3388 }
0x267a   :  { %v3391_v58 = vmul.f32 %v6814_v56, %v3389_v57 }
0x267c   :  { %3393 = vrot.lane.b32.xlu1 %v3391_v58, %s7148_s23 }
0x267f   :  { %v3567_v50 = vpop.permute.xlu0 %3566 }
0x2680   :  { %v3569_v59 = vadd.f32 %v3567_v50, %v3551_v25 }
0x2682   :  { %6815 = vtanh.f32 %v3569_v59 }
0x268f   :  { %v6816_v60 = vpop.eup %6815 }
0x2690   :  { %v3571_v47 = vsub.f32 %v7969_v18, %v6816_v60 }
0x2692   :  { %3573 = vrot.lane.b32.xlu0 %v3571_v47, %s7149_s24 }
0x26ee   :  { %v3394_v63 = vpop.permute.xlu1 %3393 }
0x26ef   :  { %v3396_v1 = vadd.f32 %v3394_v63, %v3380_v42 }
0x26f1   :  { %6817 = vtanh.f32 %v3396_v1 }
0x26fe   :  { %v6818_v3 = vpop.eup %6817 }
0x26ff   :  { %v3398_v6 = vsub.f32 %v7984_v4, %v6818_v3 }
0x2701   :  { %3400 = vrot.lane.b32.xlu1 %v3398_v6, %s7149_s24 }
0x2704   :  { %v3574_v33 = vpop.permute.xlu0 %3573 }
0x2705   :  { %v3576_v51 = vmul.f32 %v6810_v43, %v3574_v33 }
0x2707   :  { %3578 = vrot.lane.b32.xlu0 %v3576_v51, %s7147_s2 }
0x2773   :  { %v3401_v31 = vpop.permute.xlu1 %3400 }
0x2774   :  { %v3403_v36 = vmul.f32 %v6814_v56, %v3401_v31 }
0x2776   :  { %3405 = vrot.lane.b32.xlu1 %v3403_v36, %s7147_s2 }
0x2779   :  { %v3579_v12 = vpop.permute.xlu0 %3578 }
0x277a   :  { %v8046_v13 = vadd.f32 %v6816_v60, %v3579_v12 }
0x277c   :  { %3653 = vrot.lane.b32.xlu0 %v8046_v13, %s7148_s23 }
0x27e8   :  { %v3406_v14 = vpop.permute.xlu1 %3405 }
0x27e9   :  { %v8050_v41 = vadd.f32 %v6818_v3, %v3406_v14 }
0x27eb   :  { %3410 = vrot.lane.b32.xlu1 %v8050_v41, %s7148_s23 }
0x27ee   :  { %v3654_v35 = vpop.permute.xlu0 %3653 }
0x27ef   :  { %6439 = vmatmul.mubr.msk.f32.vlgmr.msra.gmra.mxu0 %vm388_vm2, %v3654_v35 }
0x27f0   :  { %6453 = vmatpush3.msra.mxu0 %v7804_v61  ;;  %6460 = vmatprep.mubr.msk.f32.mxu0 %vm7146_vm0, %v7145_v0 }
0x27f1   :  { %6454 = vmatprep.subr.mxu0 %v7145_v0 }
0x27f2   :  { %6455 = vmatpush3.msra.mxu0 %v7811_v62 }
0x27f3   :  { %6456 = vmatprep.subr.mxu0 %v7145_v0 }
0x27f4   :  { %6457 = vmatpush3.msra.mxu0 %v7834_v9 }
0x27f5   :  { %6458 = vmatprep.subr.mxu0 %v7145_v0 }
0x27f6   :  { %6459 = vmatpush3.msra.mxu0 %v7848_v28 }
0x27f7   :  { %6461 = vmatmul.mubr.msk.f32.vlgmr.msra.gmra.mxu0 %vm388_vm2, %v3654_v35  ;;  %6474 = vmatprep.subr.mxu0 %v7145_v0 }
0x27f8   :  { %6475 = vmatpush3.msra.mxu0 %v7885_v20  ;;  %6482 = vmatprep.mubr.msk.f32.mxu0 %vm7146_vm0, %v7145_v0 }
0x27f9   :  { %6476 = vmatprep.subr.mxu0 %v7145_v0 }
0x27fa   :  { %6477 = vmatpush3.msra.mxu0 %v7890_v21 }
0x27fb   :  { %6478 = vmatprep.subr.mxu0 %v7145_v0 }
0x27fc   :  { %6479 = vmatpush3.msra.mxu0 %v7897_v22 }
0x27fd   :  { %6480 = vmatprep.subr.mxu0 %v7145_v0 }
0x27fe   :  { %6481 = vmatpush3.msra.mxu0 %v7904_v23 }
0x27ff   :  { %6496 = vmatprep.subr.mxu0 %v7145_v0 }
0x285d   :  { %v3411_v18 = vpop.permute.xlu1 %3410 }
0x285e   :  { %6406 = vmatmul.mubr.msk.f32.vlgmr.msra.gmra.mxu1 %vm388_vm2, %v3411_v18 }
0x285f   :  { %6420 = vmatpush3.msra.mxu1 %v7818_v5  ;;  %6427 = vmatprep.mubr.msk.f32.mxu1 %vm7146_vm0, %v7145_v0 }
0x2860   :  { %6421 = vmatprep.subr.mxu1 %v7145_v0 }
0x2861   :  { %6422 = vmatpush3.msra.mxu1 %v7823_v48 }
0x2862   :  { %6423 = vmatprep.subr.mxu1 %v7145_v0 }
0x2863   :  { %6424 = vmatpush3.msra.mxu1 %v7839_v26 }
0x2864   :  { %6425 = vmatprep.subr.mxu1 %v7145_v0 }
0x2865   :  { %6426 = vmatpush3.msra.mxu1 %v7853_v30 }
0x2866   :  { %6428 = vmatmul.mubr.msk.f32.vlgmr.msra.gmra.mxu1 %vm388_vm2, %v3411_v18  ;;  %6441 = vmatprep.subr.mxu1 %v7145_v0 }
0x2867   :  { %6442 = vmatpush3.msra.mxu1 %v7955_v15  ;;  %6449 = vmatprep.mubr.msk.f32.mxu1 %vm7146_vm0, %v7145_v0 }
0x2868   :  { %6443 = vmatprep.subr.mxu1 %v7145_v0 }
0x2869   :  { %6444 = vmatpush3.msra.mxu1 %v7960_v16 }
0x286a   :  { %6445 = vmatprep.subr.mxu1 %v7145_v0 }
0x286b   :  { %6446 = vmatpush3.msra.mxu1 %v7967_v17 }
0x286c   :  { %6447 = vmatprep.subr.mxu1 %v7145_v0 }
0x286d   :  { %6448 = vmatpush3.msra.mxu1 %v7976_v54 }
0x286e   :  { %6463 = vmatprep.subr.mxu1 %v7145_v0 }
0x28af   :  { %v3723_v2 = vpop.f32.mrf.mxu0 }
0x28b1   :  { %v6440_v4 = vpop.f32.mrf.mxu0 }
0x28b7   :  { %v3897_v7 = vpop.f32.mrf.mxu0 }
0x28b8   :  { %v3898_v52 = vadd.f32 %v7872_v11, %v3897_v7 }
0x28b9   :  { %v6462_v8 = vpop.f32.mrf.mxu0 }
0x28ba   :  { %3908 = vrot.lane.b32.xlu0 %v3898_v52, %s7147_s2  ;;  %v5697_v19 = vmul.f32 -1.442695, %v3898_v52 }
0x28bc   :  { %6819 = vpow2.f32 %v5697_v19 }
0x28c9   :  { %v6820_v24 = vpop.eup %6819 }
0x28ca   :  { %v3904_v25 = vadd.f32 1.0, %v6820_v24 }
0x28cc   :  { %6821 = vrcp.f32 %v3904_v25 }
0x28d9   :  { %v6822_v39 = vpop.eup %6821 }
0x291e   :  { %v8100_v27 = vpop.f32.mrf.mxu1 }
0x2920   :  { %v6407_v29 = vpop.f32.mrf.mxu1 }
0x2926   :  { %v3648_v32 = vpop.f32.mrf.mxu1 }
0x2927   :  { %v3724_v37 = vadd.f32 %v3723_v2, %v3648_v32 }
0x2928   :  { %v6429_v49 = vpop.f32.mrf.mxu1 }
0x2929   :  { %v3727_v38 = vadd.f32 %v7937_v34, %v3724_v37 }
0x292b   :  { %3735 = vrot.lane.b32.xlu1 %v3727_v38, %s7147_s2  ;;  %v5694_v43 = vmul.f32 -1.442695, %v3727_v38 }
0x292c   :  { %v3909_v40 = vpop.permute.xlu0 %3908 }
0x292d   :  { %v3911_v42 = vmul.f32 %v6822_v39, %v3909_v40  ;;  %6823 = vpow2.f32 %v5694_v43 }
0x292f   :  { %3913 = vrot.lane.b32.xlu0 %v3911_v42, %s7148_s23 }
0x293a   :  { %v6824_v44 = vpop.eup %6823 }
0x293b   :  { %v3731_v45 = vadd.f32 1.0, %v6824_v44 }
0x293d   :  { %6825 = vrcp.f32 %v3731_v45 }
0x294a   :  { %v6826_v46 = vpop.eup %6825 }
0x299d   :  { %v3736_v53 = vpop.permute.xlu1 %3735 }
0x299e   :  { %v3738_v55 = vmul.f32 %v6826_v46, %v3736_v53 }
0x29a0   :  { %3740 = vrot.lane.b32.xlu1 %v3738_v55, %s7148_s23 }
0x29a1   :  { %v3914_v56 = vpop.permute.xlu0 %3913 }
0x29a2   :  { %v3916_v57 = vadd.f32 %v3914_v56, %v3898_v52 }
0x29a4   :  { %6827 = vtanh.f32 %v3916_v57 }
0x29b1   :  { %v6828_v58 = vpop.eup %6827 }
0x29b2   :  { %v3918_v50 = vsub.f32 %v8046_v13, %v6828_v58 }
0x29b4   :  { %3920 = vrot.lane.b32.xlu0 %v3918_v50, %s7149_s24 }
0x2a12   :  { %v3741_v59 = vpop.permute.xlu1 %3740 }
0x2a13   :  { %v3743_v60 = vadd.f32 %v3741_v59, %v3727_v38 }
0x2a15   :  { %6829 = vtanh.f32 %v3743_v60 }
0x2a22   :  { %v6830_v47 = vpop.eup %6829 }
0x2a23   :  { %v3745_v63 = vsub.f32 %v8050_v41, %v6830_v47 }
0x2a25   :  { %3747 = vrot.lane.b32.xlu1 %v3745_v63, %s7149_s24 }
0x2a26   :  { %v3921_v1 = vpop.permute.xlu0 %3920 }
0x2a27   :  { %v3923_v3 = vmul.f32 %v6822_v39, %v3921_v1 }
0x2a29   :  { %3925 = vrot.lane.b32.xlu0 %v3923_v3, %s7147_s2 }
0x2a97   :  { %v3748_v6 = vpop.permute.xlu1 %3747 }
0x2a98   :  { %v3750_v33 = vmul.f32 %v6826_v46, %v3748_v6 }
0x2a9a   :  { %3752 = vrot.lane.b32.xlu1 %v3750_v33, %s7147_s2 }
0x2a9b   :  { %v3926_v51 = vpop.permute.xlu0 %3925 }
0x2a9c   :  { %v8112_v31 = vadd.f32 %v6828_v58, %v3926_v51 }
0x2a9e   :  { %4000 = vrot.lane.b32.xlu0 %v8112_v31, %s7148_s23 }
0x2b0c   :  { %v3753_v36 = vpop.permute.xlu1 %3752 }
0x2b0d   :  { %v8116_v12 = vadd.f32 %v6830_v47, %v3753_v36 }
0x2b0f   :  { %3757 = vrot.lane.b32.xlu1 %v8116_v12, %s7148_s23 }
0x2b10   :  { %v4001_v13 = vpop.permute.xlu0 %4000 }
0x2b11   :  { %6483 = vmatmul.mubr.msk.f32.vlgmr.msra.gmra.mxu0 %vm388_vm2, %v4001_v13 }
0x2b12   :  { %6497 = vmatpush3.msra.mxu0 %v7804_v61  ;;  %6504 = vmatprep.mubr.msk.f32.mxu0 %vm7146_vm0, %v7145_v0 }
0x2b13   :  { %6498 = vmatprep.subr.mxu0 %v7145_v0 }
0x2b14   :  { %6499 = vmatpush3.msra.mxu0 %v7811_v62 }
0x2b15   :  { %6500 = vmatprep.subr.mxu0 %v7145_v0 }
0x2b16   :  { %6501 = vmatpush3.msra.mxu0 %v7834_v9 }
0x2b17   :  { %6502 = vmatprep.subr.mxu0 %v7145_v0 }
0x2b18   :  { %6503 = vmatpush3.msra.mxu0 %v7848_v28 }
0x2b19   :  { %6505 = vmatmul.mubr.msk.f32.vlgmr.msra.gmra.mxu0 %vm388_vm2, %v4001_v13  ;;  %6518 = vmatprep.subr.mxu0 %v7145_v0 }
0x2b1a   :  { %6519 = vmatpush3.msra.mxu0 %v7885_v20  ;;  %6526 = vmatprep.mubr.msk.f32.mxu0 %vm7146_vm0, %v7145_v0 }
0x2b1b   :  { %6520 = vmatprep.subr.mxu0 %v7145_v0 }
0x2b1c   :  { %6521 = vmatpush3.msra.mxu0 %v7890_v21 }
0x2b1d   :  { %6522 = vmatprep.subr.mxu0 %v7145_v0 }
0x2b1e   :  { %6523 = vmatpush3.msra.mxu0 %v7897_v22 }
0x2b1f   :  { %6524 = vmatprep.subr.mxu0 %v7145_v0 }
0x2b20   :  { %6525 = vmatpush3.msra.mxu0 %v7904_v23 }
0x2b21   :  { %6540 = vmatprep.subr.mxu0 %v7145_v0 }
0x2b81   :  { %v3758_v14 = vpop.permute.xlu1 %3757 }
0x2b82   :  { %6450 = vmatmul.mubr.msk.f32.vlgmr.msra.gmra.mxu1 %vm388_vm2, %v3758_v14 }
0x2b83   :  { %6464 = vmatpush3.msra.mxu1 %v7818_v5  ;;  %6471 = vmatprep.mubr.msk.f32.mxu1 %vm7146_vm0, %v7145_v0 }
0x2b84   :  { %6465 = vmatprep.subr.mxu1 %v7145_v0 }
0x2b85   :  { %6466 = vmatpush3.msra.mxu1 %v7823_v48 }
0x2b86   :  { %6467 = vmatprep.subr.mxu1 %v7145_v0 }
0x2b87   :  { %6468 = vmatpush3.msra.mxu1 %v7839_v26 }
0x2b88   :  { %6469 = vmatprep.subr.mxu1 %v7145_v0 }
0x2b89   :  { %6470 = vmatpush3.msra.mxu1 %v7853_v30 }
0x2b8a   :  { %6472 = vmatmul.mubr.msk.f32.vlgmr.msra.gmra.mxu1 %vm388_vm2, %v3758_v14  ;;  %6485 = vmatprep.subr.mxu1 %v7145_v0 }
0x2b8b   :  { %6486 = vmatpush3.msra.mxu1 %v7955_v15  ;;  %6493 = vmatprep.mubr.msk.f32.mxu1 %vm7146_vm0, %v7145_v0 }
0x2b8c   :  { %6487 = vmatprep.subr.mxu1 %v7145_v0 }
0x2b8d   :  { %6488 = vmatpush3.msra.mxu1 %v7960_v16 }
0x2b8e   :  { %6489 = vmatprep.subr.mxu1 %v7145_v0 }
0x2b8f   :  { %6490 = vmatpush3.msra.mxu1 %v7967_v17 }
0x2b90   :  { %6491 = vmatprep.subr.mxu1 %v7145_v0 }
0x2b91   :  { %6492 = vmatpush3.msra.mxu1 %v7976_v54 }
0x2b92   :  { %6507 = vmatprep.subr.mxu1 %v7145_v0 }
0x2bd1   :  { %v4070_v41 = vpop.f32.mrf.mxu0 }
0x2bd3   :  { %v6484_v35 = vpop.f32.mrf.mxu0 }
0x2bd9   :  { %v4244_v18 = vpop.f32.mrf.mxu0 }
0x2bda   :  { %v4245_v2 = vadd.f32 %v7872_v11, %v4244_v18 }
0x2bdb   :  { %v6506_v4 = vpop.f32.mrf.mxu0 }
0x2bdc   :  { %4255 = vrot.lane.b32.xlu0 %v4245_v2, %s7147_s2  ;;  %v5703_v7 = vmul.f32 -1.442695, %v4245_v2 }
0x2bde   :  { %6831 = vpow2.f32 %v5703_v7 }
0x2beb   :  { %v6832_v52 = vpop.eup %6831 }
0x2bec   :  { %v4251_v8 = vadd.f32 1.0, %v6832_v52 }
0x2bee   :  { %6833 = vrcp.f32 %v4251_v8 }
0x2bfb   :  { %v6834_v49 = vpop.eup %6833 }
0x2c42   :  { %v8166_v19 = vpop.f32.mrf.mxu1 }
0x2c44   :  { %v6451_v24 = vpop.f32.mrf.mxu1 }
0x2c4a   :  { %v3995_v25 = vpop.f32.mrf.mxu1 }
0x2c4b   :  { %v4071_v29 = vadd.f32 %v4070_v41, %v3995_v25 }
0x2c4c   :  { %v6473_v32 = vpop.f32.mrf.mxu1 }
0x2c4d   :  { %v4074_v37 = vadd.f32 %v7937_v34, %v4071_v29 }
0x2c4e   :  { %v4256_v38 = vpop.permute.xlu0 %4255 }
0x2c4f   :  { %v4258_v39 = vmul.f32 %v6834_v49, %v4256_v38  ;;  %4082 = vrot.lane.b32.xlu1 %v4074_v37, %s7147_s2  ;;  %v5700_v40 = vmul.f32 -1.442695, %v4074_v37 }
0x2c51   :  { %4260 = vrot.lane.b32.xlu0 %v4258_v39, %s7148_s23  ;;  %6835 = vpow2.f32 %v5700_v40 }
0x2c5e   :  { %v6836_v42 = vpop.eup %6835 }
0x2c5f   :  { %v4078_v43 = vadd.f32 1.0, %v6836_v42 }
0x2c61   :  { %6837 = vrcp.f32 %v4078_v43 }
0x2c6e   :  { %v6838_v44 = vpop.eup %6837 }
0x2cc1   :  { %v4083_v45 = vpop.permute.xlu1 %4082 }
0x2cc2   :  { %v4085_v46 = vmul.f32 %v6838_v44, %v4083_v45 }
0x2cc3   :  { %v4261_v53 = vpop.permute.xlu0 %4260 }
0x2cc4   :  { %v4263_v55 = vadd.f32 %v4261_v53, %v4245_v2  ;;  %4087 = vrot.lane.b32.xlu1 %v4085_v46, %s7148_s23 }
0x2cc6   :  { %6839 = vtanh.f32 %v4263_v55 }
0x2cd3   :  { %v6840_v56 = vpop.eup %6839 }
0x2cd4   :  { %v4265_v57 = vsub.f32 %v8112_v31, %v6840_v56 }
0x2cd6   :  { %4267 = vrot.lane.b32.xlu0 %v4265_v57, %s7149_s24 }
0x2d36   :  { %v4088_v58 = vpop.permute.xlu1 %4087 }
0x2d37   :  { %v4090_v50 = vadd.f32 %v4088_v58, %v4074_v37 }
0x2d39   :  { %6841 = vtanh.f32 %v4090_v50 }
0x2d46   :  { %v6842_v59 = vpop.eup %6841 }
0x2d47   :  { %v4092_v60 = vsub.f32 %v8116_v12, %v6842_v59 }
0x2d48   :  { %v4268_v47 = vpop.permute.xlu0 %4267 }
0x2d49   :  { %v4270_v63 = vmul.f32 %v6834_v49, %v4268_v47  ;;  %4094 = vrot.lane.b32.xlu1 %v4092_v60, %s7149_s24  ;;  %v8265_v60 = vld [vmem:[%s8512_s11 + $0x10] sm:$0xff]  ;;  %v8272_v47 = vld [vmem:[%s8512_s11 + $0x8] sm:$0xff] }
0x2d4b   :  { %4272 = vrot.lane.b32.xlu0 %v4270_v63, %s7147_s2  ;;  %v8279_v63 = vld [vmem:[%s8512_s11] sm:$0xff] }
0x2dbb   :  { %v4095_v1 = vpop.permute.xlu1 %4094 }
0x2dbc   :  { %v4097_v3 = vmul.f32 %v6838_v44, %v4095_v1 }
0x2dbd   :  { %v4273_v6 = vpop.permute.xlu0 %4272 }
0x2dbe   :  { %v8177_v33 = vadd.f32 %v6840_v56, %v4273_v6  ;;  %4099 = vrot.lane.b32.xlu1 %v4097_v3, %s7147_s2 }
0x2dc0   :  { %4347 = vrot.lane.b32.xlu0 %v8177_v33, %s7148_s23 }
0x2e30   :  { %v4100_v51 = vpop.permute.xlu1 %4099 }
0x2e31   :  { %v8182_v31 = vadd.f32 %v6842_v59, %v4100_v51  ;;  %v8254_v59 = vld [vmem:[%s8512_s11 + $0x18] sm:$0xff] }
0x2e32   :  { %v4348_v36 = vpop.permute.xlu0 %4347 }
0x2e33   :  { %6527 = vmatmul.mubr.msk.f32.vlgmr.msra.gmra.mxu0 %vm388_vm2, %v4348_v36  ;;  %4104 = vrot.lane.b32.xlu1 %v8182_v31, %s7148_s23 }
0x2e34   :  { %6541 = vmatpush3.msra.mxu0 %v7804_v61  ;;  %6548 = vmatprep.mubr.msk.f32.mxu0 %vm7146_vm0, %v7145_v0 }
0x2e35   :  { %6542 = vmatprep.subr.mxu0 %v7145_v0 }
0x2e36   :  { %6543 = vmatpush3.msra.mxu0 %v7811_v62 }
0x2e37   :  { %6544 = vmatprep.subr.mxu0 %v7145_v0 }
0x2e38   :  { %6545 = vmatpush3.msra.mxu0 %v7834_v9 }
0x2e39   :  { %6546 = vmatprep.subr.mxu0 %v7145_v0 }
0x2e3a   :  { %6547 = vmatpush3.msra.mxu0 %v7848_v28 }
0x2e3b   :  { %6549 = vmatmul.mubr.msk.f32.vlgmr.msra.gmra.mxu0 %vm388_vm2, %v4348_v36  ;;  %6562 = vmatprep.subr.mxu0 %v7145_v0 }
0x2e3c   :  { %6563 = vmatpush3.msra.mxu0 %v7885_v20  ;;  %6570 = vmatprep.mubr.msk.f32.mxu0 %vm7146_vm0, %v7145_v0 }
0x2e3d   :  { %6564 = vmatprep.subr.mxu0 %v7145_v0 }
0x2e3e   :  { %6565 = vmatpush3.msra.mxu0 %v7890_v21 }
0x2e3f   :  { %6566 = vmatprep.subr.mxu0 %v7145_v0 }
0x2e40   :  { %6567 = vmatpush3.msra.mxu0 %v7897_v22 }
0x2e41   :  { %6568 = vmatprep.subr.mxu0 %v7145_v0 }
0x2e42   :  { %6569 = vmatpush3.msra.mxu0 %v7904_v23 }
0x2e43   :  { %6584 = vmatprep.subr.mxu0 %v7145_v0 }
0x2ea5   :  { %v4105_v61 = vpop.permute.xlu1 %4104 }
0x2ea6   :  { %6494 = vmatmul.mubr.msk.f32.vlgmr.msra.gmra.mxu1 %vm388_vm2, %v4105_v61 }
0x2ea7   :  { %6508 = vmatpush3.msra.mxu1 %v7818_v5  ;;  %6515 = vmatprep.mubr.msk.f32.mxu1 %vm7146_vm0, %v7145_v0 }
0x2ea8   :  { %6509 = vmatprep.subr.mxu1 %v7145_v0 }
0x2ea9   :  { %6510 = vmatpush3.msra.mxu1 %v7823_v48 }
0x2eaa   :  { %6511 = vmatprep.subr.mxu1 %v7145_v0 }
0x2eab   :  { %6512 = vmatpush3.msra.mxu1 %v7839_v26 }
0x2eac   :  { %6513 = vmatprep.subr.mxu1 %v7145_v0 }
0x2ead   :  { %6514 = vmatpush3.msra.mxu1 %v7853_v30 }
0x2eae   :  { %6516 = vmatmul.mubr.msk.f32.vlgmr.msra.gmra.mxu1 %vm388_vm2, %v4105_v61  ;;  %6529 = vmatprep.subr.mxu1 %v7145_v0 }
0x2eaf   :  { %6530 = vmatpush3.msra.mxu1 %v7955_v15  ;;  %6537 = vmatprep.mubr.msk.f32.mxu1 %vm7146_vm0, %v7145_v0 }
0x2eb0   :  { %6531 = vmatprep.subr.mxu1 %v7145_v0 }
0x2eb1   :  { %6532 = vmatpush3.msra.mxu1 %v7960_v16 }
0x2eb2   :  { %6533 = vmatprep.subr.mxu1 %v7145_v0 }
0x2eb3   :  { %6534 = vmatpush3.msra.mxu1 %v7967_v17 }
0x2eb4   :  { %6535 = vmatprep.subr.mxu1 %v7145_v0 }
0x2eb5   :  { %6536 = vmatpush3.msra.mxu1 %v7976_v54 }
0x2eb6   :  { %6551 = vmatprep.subr.mxu1 %v7145_v0 }
0x2ef3   :  { %v4417_v62 = vpop.f32.mrf.mxu0 }
0x2ef5   :  { %v6528_v5 = vpop.f32.mrf.mxu0 }
0x2efb   :  { %v4591_v48 = vpop.f32.mrf.mxu0 }
0x2efc   :  { %v4592_v9 = vadd.f32 %v7872_v11, %v4591_v48 }
0x2efd   :  { %v6550_v26 = vpop.f32.mrf.mxu0 }
0x2efe   :  { %4602 = vrot.lane.b32.xlu0 %v4592_v9, %s7147_s2  ;;  %v5709_v28 = vmul.f32 -1.442695, %v4592_v9 }
0x2f00   :  { %6843 = vpow2.f32 %v5709_v28 }
0x2f0d   :  { %v6844_v30 = vpop.eup %6843 }
0x2f0e   :  { %v4598_v12 = vadd.f32 1.0, %v6844_v30  ;;  %v8348_v30 = vld [vmem:[%s8516_s15] ss:$0 sm:$0xff] }
0x2f10   :  { %6845 = vrcp.f32 %v4598_v12 }
0x2f1d   :  { %v6846_v18 = vpop.eup %6845 }
0x2f66   :  { %v8232_v13 = vpop.f32.mrf.mxu1 }
0x2f68   :  { %v6495_v14 = vpop.f32.mrf.mxu1 }
0x2f6e   :  { %v4342_v41 = vpop.f32.mrf.mxu1 }
0x2f6f   :  { %v4418_v35 = vadd.f32 %v4417_v62, %v4342_v41 }
0x2f70   :  { %v4603_v2 = vpop.permute.xlu0 %4602  ;;  %v6517_v4 = vpop.f32.mrf.mxu1 }
0x2f71   :  { %v4421_v7 = vadd.f32 %v7937_v34, %v4418_v35  ;;  %v4605_v52 = vmul.f32 %v6846_v18, %v4603_v2 }
0x2f73   :  { %4607 = vrot.lane.b32.xlu0 %v4605_v52, %s7148_s23  ;;  %4429 = vrot.lane.b32.xlu1 %v4421_v7, %s7147_s2  ;;  %v5706_v11 = vmul.f32 -1.442695, %v4421_v7 }
0x2f75   :  { %6847 = vpow2.f32 %v5706_v11 }
0x2f82   :  { %v6848_v8 = vpop.eup %6847 }
0x2f83   :  { %v4425_v24 = vadd.f32 1.0, %v6848_v8 }
0x2f85   :  { %6849 = vrcp.f32 %v4425_v24 }
0x2f92   :  { %v6850_v25 = vpop.eup %6849 }
0x2fe5   :  { %v4608_v29 = vpop.permute.xlu0 %4607  ;;  %v4430_v32 = vpop.permute.xlu1 %4429 }
0x2fe6   :  { %v4610_v37 = vadd.f32 %v4608_v29, %v4592_v9  ;;  %v4432_v49 = vmul.f32 %v6850_v25, %v4430_v32 }
0x2fe8   :  { %6851 = vtanh.f32 %v4610_v37  ;;  %4434 = vrot.lane.b32.xlu1 %v4432_v49, %s7148_s23 }
0x2ff5   :  { %v6852_v38 = vpop.eup %6851 }
0x2ff6   :  { %v4612_v34 = vsub.f32 %v8177_v33, %v6852_v38  ;;  %v8339_v33 = vld [vmem:[%s8513_s12] ss:$0 sm:$0xff] }
0x2ff8   :  { %4614 = vrot.lane.b32.xlu0 %v4612_v34, %s7149_s24 }
0x305a   :  { %v4435_v39 = vpop.permute.xlu1 %4434 }
0x305b   :  { %v4437_v40 = vadd.f32 %v4435_v39, %v4421_v7 }
0x305d   :  { %6853 = vtanh.f32 %v4437_v40 }
0x306a   :  { %v6854_v42 = vpop.eup %6853  ;;  %v4615_v43 = vpop.permute.xlu0 %4614 }
0x306b   :  { %v4617_v44 = vmul.f32 %v6846_v18, %v4615_v43  ;;  %v4439_v45 = vsub.f32 %v8182_v31, %v6854_v42 }
0x306d   :  { %4619 = vrot.lane.b32.xlu0 %v4617_v44, %s7147_s2  ;;  %4441 = vrot.lane.b32.xlu1 %v4439_v45, %s7149_s24  ;;  %v6913_v45 = vld [vmem:[%s8514_s13 + $0x18] sm:$0xff] }
0x30df   :  { %v4620_v46 = vpop.permute.xlu0 %4619  ;;  %v4442_v53 = vpop.permute.xlu1 %4441 }
0x30e0   :  { %v8243_v55 = vadd.f32 %v6852_v38, %v4620_v46  ;;  %v4444_v56 = vmul.f32 %v6850_v25, %v4442_v53  ;;  %v6914_v46 = vld [vmem:[%s8514_s13 + $0x10] sm:$0xff]  ;;  %v6915_v53 = vld [vmem:[%s8514_s13 + $0x8] sm:$0xff] }
0x30e2   :  { %4694 = vrot.lane.b32.xlu0 %v8243_v55, %s7148_s23  ;;  %4446 = vrot.lane.b32.xlu1 %v4444_v56, %s7147_s2 }
0x3154   :  { %v4695_v57 = vpop.permute.xlu0 %4694  ;;  %v4447_v58 = vpop.permute.xlu1 %4446 }
0x3155   :  { %6571 = vmatmul.mubr.msk.f32.vlgmr.msra.gmra.mxu0 %vm388_vm2, %v4695_v57  ;;  %v8249_v50 = vadd.f32 %v6854_v42, %v4447_v58  ;;  %v8421_v58 = vld [vmem:[%s8517_s16 + $0x10] sm:$0xff] }
0x3156   :  { %6585 = vmatpush3.msra.mxu0 %v8254_v59  ;;  %6592 = vmatprep.mubr.msk.f32.mxu0 %vm7146_vm0, %v7145_v0 }
0x3157   :  { %6586 = vmatprep.subr.mxu0 %v7145_v0  ;;  %4451 = vrot.lane.b32.xlu1 %v8249_v50, %s7148_s23 }
0x3158   :  { %6587 = vmatpush3.msra.mxu0 %v8265_v60 }
0x3159   :  { %6588 = vmatprep.subr.mxu0 %v7145_v0 }
0x315a   :  { %6589 = vmatpush3.msra.mxu0 %v8272_v47 }
0x315b   :  { %6590 = vmatprep.subr.mxu0 %v7145_v0 }
0x315c   :  { %6591 = vmatpush3.msra.mxu0 %v8279_v63 }
0x315d   :  { %6593 = vmatmul.mubr.msk.f32.vlgmr.msra.gmra.mxu0 %vm388_vm2, %v4695_v57  ;;  %6606 = vmatprep.subr.mxu0 %v7145_v0  ;;  %v8412_v57 = vld [vmem:[%s8517_s16 + $0x18] sm:$0xff] }
0x315e   :  { %6607 = vmatpush3.msra.mxu0 %v7885_v20  ;;  %6614 = vmatprep.mubr.msk.f32.mxu0 %vm7146_vm0, %v7145_v0  ;;  %v8298_v20 = vld [vmem:[%s8515_s14 + $0x18] sm:$0xff] }
0x315f   :  { %6608 = vmatprep.subr.mxu0 %v7145_v0 }
0x3160   :  { %6609 = vmatpush3.msra.mxu0 %v7890_v21  ;;  %v8307_v21 = vld [vmem:[%s8515_s14 + $0x10] sm:$0xff] }
0x3161   :  { %6610 = vmatprep.subr.mxu0 %v7145_v0 }
0x3162   :  { %6611 = vmatpush3.msra.mxu0 %v7897_v22  ;;  %v8314_v22 = vld [vmem:[%s8515_s14 + $0x8] sm:$0xff] }
0x3163   :  { %6612 = vmatprep.subr.mxu0 %v7145_v0 }
0x3164   :  { %6613 = vmatpush3.msra.mxu0 %v7904_v23  ;;  %v8321_v23 = vld [vmem:[%s8515_s14] sm:$0xff] }
0x3165   :  { %6628 = vmatprep.subr.mxu0 %v7145_v0 }
0x31c9   :  { %v4452_v1 = vpop.permute.xlu1 %4451 }
0x31ca   :  { %6538 = vmatmul.mubr.msk.f32.vlgmr.msra.gmra.mxu1 %vm388_vm2, %v4452_v1 }
0x31cb   :  { %6552 = vmatpush3.msra.mxu1 %v8298_v20  ;;  %6559 = vmatprep.mubr.msk.f32.mxu1 %vm7146_vm0, %v7145_v0 }
0x31cc   :  { %6553 = vmatprep.subr.mxu1 %v7145_v0 }
0x31cd   :  { %6554 = vmatpush3.msra.mxu1 %v8307_v21 }
0x31ce   :  { %6555 = vmatprep.subr.mxu1 %v7145_v0 }
0x31cf   :  { %6556 = vmatpush3.msra.mxu1 %v8314_v22 }
0x31d0   :  { %6557 = vmatprep.subr.mxu1 %v7145_v0 }
0x31d1   :  { %6558 = vmatpush3.msra.mxu1 %v8321_v23 }
0x31d2   :  { %6560 = vmatmul.mubr.msk.f32.vlgmr.msra.gmra.mxu1 %vm388_vm2, %v4452_v1  ;;  %6573 = vmatprep.subr.mxu1 %v7145_v0 }
0x31d3   :  { %6574 = vmatpush3.msra.mxu1 %v7955_v15  ;;  %6581 = vmatprep.mubr.msk.f32.mxu1 %vm7146_vm0, %v7145_v0 }
0x31d4   :  { %6575 = vmatprep.subr.mxu1 %v7145_v0 }
0x31d5   :  { %6576 = vmatpush3.msra.mxu1 %v7960_v16 }
0x31d6   :  { %6577 = vmatprep.subr.mxu1 %v7145_v0 }
0x31d7   :  { %6578 = vmatpush3.msra.mxu1 %v7967_v17 }
0x31d8   :  { %6579 = vmatprep.subr.mxu1 %v7145_v0 }
0x31d9   :  { %6580 = vmatpush3.msra.mxu1 %v7976_v54 }
0x31da   :  { %6595 = vmatprep.subr.mxu1 %v7145_v0 }
0x3215   :  { %v4764_v3 = vpop.f32.mrf.mxu0 }
0x3217   :  { %v6572_v6 = vpop.f32.mrf.mxu0 }
0x321d   :  { %v4938_v15 = vpop.f32.mrf.mxu0 }
0x321e   :  { %v4939_v16 = vadd.f32 %v8339_v33, %v4938_v15 }
0x321f   :  { %v6594_v51 = vpop.f32.mrf.mxu0 }
0x3220   :  { %4949 = vrot.lane.b32.xlu0 %v4939_v16, %s7147_s2  ;;  %v5715_v17 = vmul.f32 -1.442695, %v4939_v16 }
0x3222   :  { %6855 = vpow2.f32 %v5715_v17 }
0x322f   :  { %v6856_v31 = vpop.eup %6855 }
0x3230   :  { %v4945_v36 = vadd.f32 1.0, %v6856_v31 }
0x3232   :  { %6857 = vrcp.f32 %v4945_v36 }
0x323f   :  { %v6858_v62 = vpop.eup %6857 }
0x328a   :  { %v8343_v54 = vpop.f32.mrf.mxu1 }
0x328c   :  { %v6539_v61 = vpop.f32.mrf.mxu1 }
0x3292   :  { %v4950_v5 = vpop.permute.xlu0 %4949  ;;  %v4689_v48 = vpop.f32.mrf.mxu1 }
0x3293   :  { %v4952_v9 = vmul.f32 %v6858_v62, %v4950_v5  ;;  %v4765_v26 = vadd.f32 %v4764_v3, %v4689_v48 }
0x3294   :  { %v6561_v28 = vpop.f32.mrf.mxu1 }
0x3295   :  { %v4768_v12 = vadd.f32 %v8348_v30, %v4765_v26  ;;  %4954 = vrot.lane.b32.xlu0 %v4952_v9, %s7148_s23 }
0x3297   :  { %4776 = vrot.lane.b32.xlu1 %v4768_v12, %s7147_s2  ;;  %v5712_v14 = vmul.f32 -1.442695, %v4768_v12 }
0x3299   :  { %6859 = vpow2.f32 %v5712_v14 }
0x32a6   :  { %v6860_v41 = vpop.eup %6859 }
0x32a7   :  { %v4772_v35 = vadd.f32 1.0, %v6860_v41 }
0x32a9   :  { %6861 = vrcp.f32 %v4772_v35 }
0x32b6   :  { %v6862_v4 = vpop.eup %6861 }
0x3307   :  { %v4955_v18 = vpop.permute.xlu0 %4954 }
0x3308   :  { %v4957_v2 = vadd.f32 %v4955_v18, %v4939_v16 }
0x3309   :  { %v4777_v7 = vpop.permute.xlu1 %4776 }
0x330a   :  { %6863 = vtanh.f32 %v4957_v2  ;;  %v4779_v52 = vmul.f32 %v6862_v4, %v4777_v7 }
0x330c   :  { %4781 = vrot.lane.b32.xlu1 %v4779_v52, %s7148_s23 }
0x3317   :  { %v6864_v11 = vpop.eup %6863 }
0x3318   :  { %v4959_v8 = vsub.f32 %v8243_v55, %v6864_v11  ;;  %v6916_v55 = vld [vmem:[%s8514_s13] sm:$0xff] }
0x331a   :  { %4961 = vrot.lane.b32.xlu0 %v4959_v8, %s7149_s24 }
0x337e   :  { %v4782_v24 = vpop.permute.xlu1 %4781 }
0x337f   :  { %v4784_v25 = vadd.f32 %v4782_v24, %v4768_v12 }
0x3381   :  { %6865 = vtanh.f32 %v4784_v25 }
0x338c   :  { %v4962_v29 = vpop.permute.xlu0 %4961 }
0x338d   :  { %v4964_v32 = vmul.f32 %v6858_v62, %v4962_v29 }
0x338e   :  { %v6866_v37 = vpop.eup %6865 }
0x338f   :  { %4966 = vrot.lane.b32.xlu0 %v4964_v32, %s7147_s2  ;;  %v4786_v49 = vsub.f32 %v8249_v50, %v6866_v37  ;;  %v8428_v50 = vld [vmem:[%s8517_s16 + $0x8] sm:$0xff] }
0x3391   :  { %4788 = vrot.lane.b32.xlu1 %v4786_v49, %s7149_s24 }
0x3401   :  { %v4967_v38 = vpop.permute.xlu0 %4966 }
0x3402   :  { %v8359_v34 = vadd.f32 %v6864_v11, %v4967_v38 }
0x3403   :  { %v4789_v39 = vpop.permute.xlu1 %4788 }
0x3404   :  { %5041 = vrot.lane.b32.xlu0 %v8359_v34, %s7148_s23  ;;  %v4791_v40 = vmul.f32 %v6862_v4, %v4789_v39 }
0x3406   :  { %4793 = vrot.lane.b32.xlu1 %v4791_v40, %s7147_s2 }
0x3476   :  { %v5042_v42 = vpop.permute.xlu0 %5041 }
0x3477   :  { %6615 = vmatmul.mubr.msk.f32.vlgmr.msra.gmra.mxu0 %vm388_vm2, %v5042_v42 }
0x3478   :  { %6629 = vmatpush3.msra.mxu0 %v8254_v59  ;;  %v4794_v43 = vpop.permute.xlu1 %4793  ;;  %6636 = vmatprep.mubr.msk.f32.mxu0 %vm7146_vm0, %v7145_v0  ;;  %v8435_v59 = vld [vmem:[%s8517_s16] sm:$0xff] }
0x3479   :  { %6630 = vmatprep.subr.mxu0 %v7145_v0  ;;  %v8369_v44 = vadd.f32 %v6866_v37, %v4794_v43 }
0x347a   :  { %6631 = vmatpush3.msra.mxu0 %v8265_v60 }
0x347b   :  { %6632 = vmatprep.subr.mxu0 %v7145_v0  ;;  %4798 = vrot.lane.b32.xlu1 %v8369_v44, %s7148_s23 }
0x347c   :  { %6633 = vmatpush3.msra.mxu0 %v8272_v47 }
0x347d   :  { %6634 = vmatprep.subr.mxu0 %v7145_v0 }
0x347e   :  { %6635 = vmatpush3.msra.mxu0 %v8279_v63 }
0x347f   :  { %6637 = vmatmul.mubr.msk.f32.vlgmr.msra.gmra.mxu0 %vm388_vm2, %v5042_v42  ;;  %6650 = vmatprep.subr.mxu0 %v7145_v0 }
0x3480   :  { %6651 = vmatpush3.msra.mxu0 %v6913_v45  ;;  %6658 = vmatprep.mubr.msk.f32.mxu0 %vm7146_vm0, %v7145_v0 }
0x3481   :  { %6652 = vmatprep.subr.mxu0 %v7145_v0 }
0x3482   :  { %6653 = vmatpush3.msra.mxu0 %v6914_v46 }
0x3483   :  { %6654 = vmatprep.subr.mxu0 %v7145_v0 }
0x3484   :  { %6655 = vmatpush3.msra.mxu0 %v6915_v53 }
0x3485   :  { %6656 = vmatprep.subr.mxu0 %v7145_v0 }
0x3486   :  { %6657 = vmatpush3.msra.mxu0 %v6916_v55 }
0x34ed   :  { %v4799_v56 = vpop.permute.xlu1 %4798 }
0x34ee   :  { %6582 = vmatmul.mubr.msk.f32.vlgmr.msra.gmra.mxu1 %vm388_vm2, %v4799_v56 }
0x34ef   :  { %6596 = vmatpush3.msra.mxu1 %v8298_v20  ;;  %6603 = vmatprep.mubr.msk.f32.mxu1 %vm7146_vm0, %v7145_v0 }
0x34f0   :  { %6597 = vmatprep.subr.mxu1 %v7145_v0 }
0x34f1   :  { %6598 = vmatpush3.msra.mxu1 %v8307_v21 }
0x34f2   :  { %6599 = vmatprep.subr.mxu1 %v7145_v0 }
0x34f3   :  { %6600 = vmatpush3.msra.mxu1 %v8314_v22 }
0x34f4   :  { %6601 = vmatprep.subr.mxu1 %v7145_v0 }
0x34f5   :  { %6602 = vmatpush3.msra.mxu1 %v8321_v23 }
0x34f6   :  { %6604 = vmatmul.mubr.msk.f32.vlgmr.msra.gmra.mxu1 %vm388_vm2, %v4799_v56  ;;  %6617 = vmatprep.subr.mxu1 %v7145_v0 }
0x34f7   :  { %6618 = vmatpush3.msra.mxu1 %v8412_v57  ;;  %6625 = vmatprep.mubr.msk.f32.mxu1 %vm7146_vm0, %v7145_v0 }
0x34f8   :  { %6619 = vmatprep.subr.mxu1 %v7145_v0 }
0x34f9   :  { %6620 = vmatpush3.msra.mxu1 %v8421_v58 }
0x34fa   :  { %6621 = vmatprep.subr.mxu1 %v7145_v0 }
0x34fb   :  { %6622 = vmatpush3.msra.mxu1 %v8428_v50 }
0x34fc   :  { %6623 = vmatprep.subr.mxu1 %v7145_v0 }
0x34fd   :  { %6624 = vmatpush3.msra.mxu1 %v8435_v59 }
0x34fe   :  { %6639 = vmatprep.subr.mxu1 %v7145_v0 }
0x3537   :  { %v5111_v60 = vpop.f32.mrf.mxu0 }
0x3539   :  { %v6616_v47 = vpop.f32.mrf.mxu0 }
0x353f   :  { %v5285_v63 = vpop.f32.mrf.mxu0 }
0x3540   :  { %v5286_v1 = vadd.f32 %v8339_v33, %v5285_v63  ;;  %v5626_v63 = vld [vmem:[%s8518_s17] ss:$0 sm:$0xff]  ;;  %s7153_s17 = smov 112  }
0x3541   :  { %v6638_v3 = vpop.f32.mrf.mxu0 }
0x3542   :  { %5296 = vrot.lane.b32.xlu0 %v5286_v1, %s7147_s2  ;;  %v5721_v6 = vmul.f32 -1.442695, %v5286_v1  ;;  %v4175_v3 = vadd.f32 %v5626_v63, %v8232_v13 }
0x3544   :  { %6867 = vpow2.f32 %v5721_v6 }
0x3551   :  { %v6868_v15 = vpop.eup %6867 }
0x3552   :  { %v5292_v16 = vadd.f32 1.0, %v6868_v15 }
0x3554   :  { %6869 = vrcp.f32 %v5292_v16 }
0x3561   :  { %v6870_v31 = vpop.eup %6869 }
0x35ae   :  { %v8441_v51 = vpop.f32.mrf.mxu1 }
0x35af   :  { %v4869_v6 = vadd.f32 %v5626_v63, %v8441_v51 }
0x35b0   :  { %v6583_v17 = vpop.f32.mrf.mxu1 }
0x35b1   :  { %v3828_v17 = vadd.f32 %v5626_v63, %v8166_v19  ;;  %v3134_v19 = vadd.f32 %v5626_v63, %v8034_v10 }
0x35b4   :  { %v5297_v36 = vpop.permute.xlu0 %5296 }
0x35b5   :  { %v5299_v61 = vmul.f32 %v6870_v31, %v5297_v36 }
0x35b6   :  { %v5036_v62 = vpop.f32.mrf.mxu1 }
0x35b7   :  { %5301 = vrot.lane.b32.xlu0 %v5299_v61, %s7148_s23  ;;  %v5112_v5 = vadd.f32 %v5111_v60, %v5036_v62 }
0x35b8   :  { %v6605_v48 = vpop.f32.mrf.mxu1 }
0x35b9   :  { %v5115_v33 = vadd.f32 %v8348_v30, %v5112_v5 }
0x35bb   :  { %5123 = vrot.lane.b32.xlu1 %v5115_v33, %s7147_s2  ;;  %v5718_v9 = vmul.f32 -1.442695, %v5115_v33 }
0x35bd   :  { %6871 = vpow2.f32 %v5718_v9 }
0x35ca   :  { %v6872_v26 = vpop.eup %6871 }
0x35cb   :  { %v5119_v28 = vadd.f32 1.0, %v6872_v26 }
0x35cd   :  { %6873 = vrcp.f32 %v5119_v28 }
0x35da   :  { %v6874_v41 = vpop.eup %6873 }
0x3629   :  { %v5302_v12 = vpop.permute.xlu0 %5301 }
0x362a   :  { %v5304_v14 = vadd.f32 %v5302_v12, %v5286_v1  ;;  %v3481_v1 = vadd.f32 %v5626_v63, %v8100_v27  ;;  %v4522_v27 = vadd.f32 %v5626_v63, %v8343_v54 }
0x362c   :  { %6875 = vtanh.f32 %v5304_v14 }
0x362d   :  { %v5124_v35 = vpop.permute.xlu1 %5123 }
0x362e   :  { %v5126_v18 = vmul.f32 %v6874_v41, %v5124_v35 }
0x3630   :  { %5128 = vrot.lane.b32.xlu1 %v5126_v18, %s7148_s23 }
0x3639   :  { %v6876_v2 = vpop.eup %6875 }
0x363a   :  { %v5306_v4 = vsub.f32 %v8359_v34, %v6876_v2 }
0x363c   :  { %5308 = vrot.lane.b32.xlu0 %v5306_v4, %s7149_s24 }
0x36a2   :  { %v5129_v7 = vpop.permute.xlu1 %5128 }
0x36a3   :  { %v5131_v52 = vadd.f32 %v5129_v7, %v5115_v33 }
0x36a5   :  { %6877 = vtanh.f32 %v5131_v52 }
0x36ae   :  { %v5309_v11 = vpop.permute.xlu0 %5308 }
0x36af   :  { %v5311_v8 = vmul.f32 %v6870_v31, %v5309_v11 }
0x36b1   :  { %5313 = vrot.lane.b32.xlu0 %v5311_v8, %s7147_s2 }
0x36b2   :  { %v6878_v24 = vpop.eup %6877 }
0x36b3   :  { %v5133_v25 = vsub.f32 %v8369_v44, %v6878_v24 }
0x36b5   :  { %5135 = vrot.lane.b32.xlu1 %v5133_v25, %s7149_s24 }
0x3723   :  { %v5314_v29 = vpop.permute.xlu0 %5313 }
0x3724   :  { %v5316_v32 = vadd.f32 %v6876_v2, %v5314_v29 }
0x3726   :  { %5388 = vrot.lane.b32.xlu0 %v5316_v32, %s7148_s23 }
0x3727   :  { %v5136_v37 = vpop.permute.xlu1 %5135 }
0x3728   :  { %v5138_v49 = vmul.f32 %v6874_v41, %v5136_v37 }
0x372a   :  { %5140 = vrot.lane.b32.xlu1 %v5138_v49, %s7147_s2 }
0x3798   :  { %v5389_v38 = vpop.permute.xlu0 %5388 }
0x3799   :  { %6659 = vmatmul.mubr.msk.f32.vlgmr.msra.gmra.mxu0 %vm388_vm2, %v5389_v38 }
0x379c   :  { %v5141_v34 = vpop.permute.xlu1 %5140 }
0x379d   :  { %v5143_v39 = vadd.f32 %v6878_v24, %v5141_v34 }
0x379f   :  { %5145 = vrot.lane.b32.xlu1 %v5143_v39, %s7148_s23 }
0x3811   :  { %v5146_v40 = vpop.permute.xlu1 %5145 }
0x3812   :  { %6626 = vmatmul.mubr.msk.f32.vlgmr.msra.gmra.mxu1 %vm388_vm2, %v5146_v40 }
0x3813   :  { %6640 = vmatpush3.msra.mxu1 %v8298_v20  ;;  %6647 = vmatprep.mubr.msk.f32.mxu1 %vm7146_vm0, %v7145_v0 }
0x3814   :  { %6641 = vmatprep.subr.mxu1 %v7145_v0 }
0x3815   :  { %6642 = vmatpush3.msra.mxu1 %v8307_v21 }
0x3816   :  { %6643 = vmatprep.subr.mxu1 %v7145_v0 }
0x3817   :  { %6644 = vmatpush3.msra.mxu1 %v8314_v22 }
0x3818   :  { %6645 = vmatprep.subr.mxu1 %v7145_v0 }
0x3819   :  { %6646 = vmatpush3.msra.mxu1 %v8321_v23 }
0x381a   :  { %6648 = vmatmul.mubr.msk.f32.vlgmr.msra.gmra.mxu1 %vm388_vm2, %v5146_v40  ;;  %6661 = vmatprep.subr.mxu1 %v7145_v0 }
0x381b   :  { %6662 = vmatpush3.msra.mxu1 %v8412_v57  ;;  %6669 = vmatprep.mubr.msk.f32.mxu1 %vm7146_vm0, %v7145_v0 }
0x381c   :  { %6663 = vmatprep.subr.mxu1 %v7145_v0 }
0x381d   :  { %6664 = vmatpush3.msra.mxu1 %v8421_v58 }
0x381e   :  { %6665 = vmatprep.subr.mxu1 %v7145_v0 }
0x381f   :  { %6666 = vmatpush3.msra.mxu1 %v8428_v50 }
0x3820   :  { %6667 = vmatprep.subr.mxu1 %v7145_v0 }
0x3821   :  { %6668 = vmatpush3.msra.mxu1 %v8435_v59 }
0x3859   :  { %v5458_v20 = vpop.f32.mrf.mxu0 }
0x385b   :  { %v6660_v21 = vpop.f32.mrf.mxu0 }
0x38d2   :  { %v5215_v22 = vpop.f32.mrf.mxu1 }
0x38d3   :  { %v5216_v31 = vadd.f32 %v5626_v63, %v5215_v22 }
0x38d4   :  { %v6627_v23 = vpop.f32.mrf.mxu1 }
0x38da   :  { %v5383_v42 = vpop.f32.mrf.mxu1 }
0x38db   :  { %v5459_v43 = vadd.f32 %v5458_v20, %v5383_v42 }
0x38dc   :  { %v6649_v44 = vpop.f32.mrf.mxu1 }
0x38dd   :  { %v5462_v45 = vadd.f32 %v8348_v30, %v5459_v43 }
0x38df   :  { %5470 = vrot.lane.b32.xlu1 %v5462_v45, %s7147_s2  ;;  %v5724_v46 = vmul.f32 -1.442695, %v5462_v45 }
0x38e1   :  { %6879 = vpow2.f32 %v5724_v46 }
0x38ee   :  { %v6880_v53 = vpop.eup %6879 }
0x38ef   :  { %v5466_v55 = vadd.f32 1.0, %v6880_v53 }
0x38f1   :  { %6881 = vrcp.f32 %v5466_v55 }
0x38fe   :  { %v6882_v56 = vpop.eup %6881 }
0x3951   :  { %v5471_v0 = vpop.permute.xlu1 %5470 }
0x3952   :  { %v5473_v57 = vmul.f32 %v6882_v56, %v5471_v0 }
0x3954   :  { %5475 = vrot.lane.b32.xlu0 %v5473_v57, %s7148_s23 }
0x39c6   :  { %v5476_v58 = vpop.permute.xlu0 %5475 }
0x39c7   :  { %v5478_v50 = vadd.f32 %v5476_v58, %v5462_v45 }
0x39c9   :  { %6883 = vtanh.f32 %v5478_v50 }
0x39d6   :  { %v6884_v59 = vpop.eup %6883 }
0x39d7   :  { %v5480_v60 = vsub.f32 %v5143_v39, %v6884_v59 }
0x39d9   :  { %5482 = vrot.lane.b32.xlu1 %v5480_v60, %s7149_s24 }
0x3a4b   :  { %v5483_v30 = vpop.permute.xlu1 %5482 }
0x3a4c   :  { %v5485_v47 = vmul.f32 %v6882_v56, %v5483_v30 }
0x3a4e   :  { %5487 = vrot.lane.b32.xlu0 %v5485_v47, %s7147_s2 }
0x3a52   :  { %5567 = vrot.lane.b32.xlu0 %v3481_v1, %s7150_s30 }
0x3a56   :  { %5575 = vrot.lane.b32.xlu0 %v4175_v3, %s7151_s25 }
0x3a5a   :  { %5583 = vrot.lane.b32.xlu0 %v4869_v6, %s7152_s3 }
0x3ac0   :  { %v5488_v15 = vpop.permute.xlu0 %5487 }
0x3ac1   :  { %v5490_v16 = vadd.f32 %v6884_v59, %v5488_v15 }
0x3ac3   :  { %5492 = vrot.lane.b32.xlu1 %v5490_v16, %s7148_s23 }
0x3ac4   :  { %v5568_v62 = vpop.permute.xlu0 %5567 }
0x3ac5   :  { %v5594_v54 = vsel %vm258_vm1, %v3134_v19, %v5568_v62 }
0x3ac7   :  { %5571 = vrot.lane.b32.xlu1 %v3828_v17, %s7147_s2 }
0x3ac8   :  { %v5576_v48 = vpop.permute.xlu0 %5575 }
0x3acb   :  { %5579 = vrot.lane.b32.xlu1 %v4522_v27, %s7148_s23 }
0x3acc   :  { %v5584_v28 = vpop.permute.xlu0 %5583 }
0x3acf   :  { %5587 = vrot.lane.b32.xlu1 %v5216_v31, %s7149_s24 }
0x3b35   :  { %v5493_v13 = vpop.permute.xlu1 %5492 }
0x3b36   :  { %6670 = vmatmul.mubr.msk.f32.vlgmr.msra.gmra.mxu1 %vm388_vm2, %v5493_v13 }
0x3b39   :  { %v5572_v5 = vpop.permute.xlu1 %5571 }
0x3b3a   :  { %v5595_v9 = vsel %vm388_vm2, %v5594_v54, %v5572_v5 }
0x3b3b   :  { %v5597_v26 = vsel %vm5596_vm4, %v5595_v9, %v5576_v48 }
0x3b3d   :  { %v5580_v33 = vpop.permute.xlu1 %5579 }
0x3b3e   :  { %v5599_v12 = vsel %vm5598_vm5, %v5597_v26, %v5580_v33 }
0x3b3f   :  { %v5601_v41 = vsel %vm5600_vm6, %v5599_v12, %v5584_v28 }
0x3b41   :  { %v5588_v14 = vpop.permute.xlu1 %5587 }
0x3b42   :  { %v5603_v35 = vsel %vm5602_vm7, %v5601_v41, %v5588_v14 }
0x3bf6   :  { %v5562_v51 = vpop.f32.mrf.mxu1 }
0x3bf7   :  { %v5563_v36 = vadd.f32 %v5626_v63, %v5562_v51 }
0x3bf8   :  { %v6671_v61 = vpop.f32.mrf.mxu1 }
0x3bf9   :  { %5591 = vrot.lane.b32.xlu0 %v5563_v36, %s7153_s17 }
0x3c6b   :  { %v5592_v18 = vpop.permute.xlu0 %5591 }
0x3c6c   :  { %v5605_v2 = vsel %vm5604_vm8, %v5603_v35, %v5592_v18 }
0x3c6d   :  { %v5726_v10 = vmul.f32 -1.442695, %v5605_v2 }
0x3c6f   :  { %6885 = vpow2.f32 %v5726_v10 }
0x3c7c   :  { %v6886_v4 = vpop.eup %6885 }
0x3c7d   :  { %v5609_v7 = vadd.f32 1.0, %v6886_v4 }
0x3c7f   :  { %6887 = vrcp.f32 %v5609_v7 }
0x3c8c   :  { %v6888_v52 = vpop.eup %6887 }
0x3c8d   :  { %5612 = vst [vmem:[%s8519_s18] sm:$0xff] %v6888_v52 }
0x3c8e   :  { %5617 = vsyncpa [#allocation3], 1 }
0x3c8f   :  { %5618 = vsyncpa [#allocation5], 1 }
0x3c90   :  { %5619 = vsyncpa [#allocation8], 1 }
0x3c91   :  { %5620 = vsyncpa [#allocation11], 1 }
0x3c92   :  { %5621 = vsyncpa [#allocation14], 1 }
0x3c93   :  { %5622 = vsyncpa [#allocation17], 1 }

</bundles_post_ra>
